<compile_context>
chip_gen: v5e
topology: v5e:2x2
jax: 0.10.0
libtpu: 0.0.40
codegen_flags: <defaults>
</compile_context>

<pallas_src>
import functools
import math

import jax
import jax.numpy as jnp
from jax.experimental import pallas as pl
from jax.experimental.pallas import tpu as pltpu


# ----------------------------- fused Pallas kernel -----------------------------

def _fused_deit_kernel(patches_ref, pw_ref, ebias_ref,
                       ln1g_ref, ln1b_ref, qkvw_ref, qkvb_ref,
                       projw_ref, projb_ref, ln2g_ref, ln2b_ref,
                       fc1w_ref, fc1b_ref, fc2w_ref, fc2b_ref,
                       nfg_ref, nfb_ref,
                       out_ref, *, heads, scale, eps):
    """Grid = (batch, depth). out_ref (N, E) is the residual stream, resident in VMEM
    across the depth axis for a given batch element."""
    d = pl.program_id(1)
    n_layers = pl.num_programs(1)
    E = out_ref.shape[-1]
    dh = E // heads

    def ln(v, g, b):
        # LayerNorm statistics kept in f32.
        mu = jnp.mean(v, axis=-1, keepdims=True)
        var = jnp.mean(jnp.square(v - mu), axis=-1, keepdims=True)
        return (v - mu) * jax.lax.rsqrt(var + eps) * g + b

    # ---- prologue (first layer only): patch projection + cls token + pos embed ----
    # patches_ref row 0 is a zero row, ebias_ref row 0 = cls + pos[0],
    # ebias_ref rows 1.. = patch_bias + pos[1:], so one matmul builds the whole sequence.
    @pl.when(d == 0)
    def _embed():
        tok = jnp.dot(patches_ref[...], pw_ref[...],
                      preferred_element_type=jnp.float32)
        out_ref[...] = (tok + ebias_ref[...]).astype(out_ref.dtype)

    x = out_ref[...].astype(jnp.float32)                       # (N, E) residual stream

    # ---- attention sub-block (pre-LN) ----
    x2 = ln(x, ln1g_ref[...], ln1b_ref[...])
    qkv = (jnp.dot(x2, qkvw_ref[...], preferred_element_type=jnp.float32)
           + qkvb_ref[...])                                    # (N, 3E)

    attn = jnp.zeros_like(x)                                   # (N, E)
    for h in range(heads):                                     # unrolled (heads is small)
        qh = qkv[:, h * dh:(h + 1) * dh] * scale               # fold 1/sqrt(dh) into q
        kh = qkv[:, E + h * dh:E + (h + 1) * dh]
        vh = qkv[:, 2 * E + h * dh:2 * E + (h + 1) * dh]
        # q @ k^T without an explicit transpose (contract on last axes).
        s = jax.lax.dot_general(qh, kh, (((1,), (1,)), ((), ())),
                                preferred_element_type=jnp.float32)
        s = s - jnp.max(s, axis=-1, keepdims=True)
        p = jnp.exp(s)
        p = p * pl.reciprocal(jnp.sum(p, axis=-1, keepdims=True), approx=True)
        oh = jnp.dot(p, vh, preferred_element_type=jnp.float32)           # (N, dh)
        # concat_h(o_h) @ W_proj  ==  sum_h  o_h @ W_proj[h*dh:(h+1)*dh, :]
        attn = attn + jnp.dot(oh, projw_ref[h * dh:(h + 1) * dh, :],
                              preferred_element_type=jnp.float32)
    x = x + attn + projb_ref[...]                              # residual add fused

    # ---- MLP sub-block (pre-LN) ----
    x3 = ln(x, ln2g_ref[...], ln2b_ref[...])
    h1 = (jnp.dot(x3, fc1w_ref[...], preferred_element_type=jnp.float32)
          + fc1b_ref[...])
    # exact (erf) GELU, matching torch.nn.GELU
    h1 = 0.5 * h1 * (1.0 + jax.lax.erf(h1 * (1.0 / math.sqrt(2.0))))
    h2 = (jnp.dot(h1, fc2w_ref[...], preferred_element_type=jnp.float32)
          + fc2b_ref[...])
    x = x + h2                                                 # residual add fused

    @pl.when(d < n_layers - 1)
    def _store():
        out_ref[...] = x.astype(out_ref.dtype)

    # final LayerNorm fused into the last depth step
    @pl.when(d == n_layers - 1)
    def _store_final():
        out_ref[...] = ln(x, nfg_ref[...], nfb_ref[...]).astype(out_ref.dtype)


# ----------------------------- parameter setup -----------------------------

def init_params(key, *, in_chans, patch, embed_dim, depth, heads, mlp_ratio, num_patches):
    del heads
    std = 0.02
    hidden = embed_dim * mlp_ratio
    rnd_shapes = {
        "patch_w": (in_chans * patch * patch, embed_dim),
        "cls_token": (1, 1, embed_dim),
        "pos_embed": (1, 1 + num_patches, embed_dim),
        "qkv_w": (depth, embed_dim, 3 * embed_dim),
        "proj_w": (depth, embed_dim, embed_dim),
        "fc1_w": (depth, embed_dim, hidden),
        "fc2_w": (depth, hidden, embed_dim),
    }
    keys = jax.random.split(key, len(rnd_shapes))
    params = {name: (std * jax.random.normal(k, shp)).astype(jnp.float32)
              for (name, shp), k in zip(rnd_shapes.items(), keys)}
    params.update({
        "patch_b": jnp.zeros((embed_dim,), jnp.float32),
        "norm_g": jnp.ones((embed_dim,), jnp.float32),
        "norm_b": jnp.zeros((embed_dim,), jnp.float32),
        "ln1_g": jnp.ones((depth, 1, embed_dim), jnp.float32),
        "ln1_b": jnp.zeros((depth, 1, embed_dim), jnp.float32),
        "ln2_g": jnp.ones((depth, 1, embed_dim), jnp.float32),
        "ln2_b": jnp.zeros((depth, 1, embed_dim), jnp.float32),
        "qkv_b": jnp.zeros((depth, 1, 3 * embed_dim), jnp.float32),
        "proj_b": jnp.zeros((depth, 1, embed_dim), jnp.float32),
        "fc1_b": jnp.zeros((depth, 1, hidden), jnp.float32),
        "fc2_b": jnp.zeros((depth, 1, embed_dim), jnp.float32),
    })
    return params


# ----------------------------- forward pass -----------------------------

def custom_deit_forward(params, x, *, patch, embed_dim, heads, eps=1e-6):
    """x: (B, C, H, W) NCHW image -> (B, embed_dim, H/patch, W/patch) NCHW features."""
    B, C, H, W = x.shape
    p = patch
    Hp, Wp = H // p, W // p
    L = Hp * Wp
    N = L + 1
    E = embed_dim
    Cp2 = C * p * p
    depth = params["qkv_w"].shape[0]
    hidden = params["fc1_w"].shape[-1]
    head_dim = E // heads
    scale = head_dim ** -0.5

    # patch embed: stride-p conv == non-overlapping patch extraction + linear projection.
    # TODO(synk): for large (224x224) images fold this transpose into the patch-embed DMA via an
    #             Element-indexed BlockSpec so the shuffle never materializes in HBM.
    patches = (x.reshape(B, C, Hp, p, Wp, p)
                .transpose(0, 2, 4, 1, 3, 5)          # (B, Hp, Wp, C, p, p)
                .reshape(B, L, Cp2))
    # prepend a zero row per batch so the cls slot falls out of the same in-kernel matmul
    patches = jnp.concatenate([jnp.zeros((B, 1, Cp2), patches.dtype), patches], axis=1)

    # additive "embed bias": row 0 = cls + pos[0]; rows 1.. = patch_bias + pos[1:]
    pos = params["pos_embed"][0]                                       # (N, E)
    embed_bias = jnp.concatenate(
        [params["cls_token"].reshape(1, E) + pos[:1],
         pos[1:] + params["patch_b"].reshape(1, E)], axis=0)           # (N, E)

    def full_spec(r, c):
        return pl.BlockSpec((r, c), lambda b, d: (0, 0))

    def per_layer(r, c):
        return pl.BlockSpec((None, r, c), lambda b, d: (d, 0, 0))

    out = pl.pallas_call(
        functools.partial(_fused_deit_kernel, heads=heads, scale=scale, eps=eps),
        out_shape=jax.ShapeDtypeStruct((B, N, E), jnp.float32),
        grid=(B, depth),
        in_specs=[
            pl.BlockSpec((None, N, Cp2), lambda b, d: (b, 0, 0)),      # padded patches
            full_spec(Cp2, E),                                         # patch_w
            full_spec(N, E),                                           # embed bias (cls/pos/b)
            per_layer(1, E), per_layer(1, E),                          # ln1 g, b
            per_layer(E, 3 * E), per_layer(1, 3 * E),                  # qkv w, b
            per_layer(E, E), per_layer(1, E),                          # proj w, b
            per_layer(1, E), per_layer(1, E),                          # ln2 g, b
            per_layer(E, hidden), per_layer(1, hidden),                # fc1 w, b
            per_layer(hidden, E), per_layer(1, E),                     # fc2 w, b
            full_spec(1, E), full_spec(1, E),                          # final norm g, b
        ],
        out_specs=pl.BlockSpec((None, N, E), lambda b, d: (b, 0, 0)),
        compiler_params=pltpu.CompilerParams(
            dimension_semantics=("parallel", "arbitrary"),
            vmem_limit_bytes=32 * 1024 * 1024,
        ),
    )(
        patches, params["patch_w"], embed_bias,
        params["ln1_g"], params["ln1_b"],
        params["qkv_w"], params["qkv_b"],
        params["proj_w"], params["proj_b"],
        params["ln2_g"], params["ln2_b"],
        params["fc1_w"], params["fc1_b"],
        params["fc2_w"], params["fc2_b"],
        params["norm_g"].reshape(1, E), params["norm_b"].reshape(1, E),
    )

    # CustomDeiT.forward: drop cls token, grid-reshape, NHWC -> NCHW
    feats = out[:, 1:]                                                  # (B, L, E)
    return feats.reshape(B, Hp, Wp, E).transpose(0, 3, 1, 2)            # (B, E, Hp, Wp)


# ----------------------------- pure-JAX reference (loose parity check) -----------------------------

def _reference_forward(params, x, *, patch, embed_dim, heads, eps=1e-6):
    B, C, H, W = x.shape
    p = patch
    Hp, Wp = H // p, W // p
    L = Hp * Wp
    E = embed_dim
    depth = params["qkv_w"].shape[0]
    dh = E // heads
    scale = dh ** -0.5

    patches = (x.reshape(B, C, Hp, p, Wp, p).transpose(0, 2, 4, 1, 3, 5)
                .reshape(B, L, C * p * p))
    tok = patches @ params["patch_w"] + params["patch_b"]
    cls = jnp.broadcast_to(params["cls_token"], (B, 1, E))
    seq = jnp.concatenate([cls, tok], axis=1) + params["pos_embed"]
    N = seq.shape[1]

    def ln(v, g, b):
        mu = v.mean(-1, keepdims=True)
        var = jnp.square(v - mu).mean(-1, keepdims=True)
        return (v - mu) * jax.lax.rsqrt(var + eps) * g + b

    for i in range(depth):
        x2 = ln(seq, params["ln1_g"][i, 0], params["ln1_b"][i, 0])
        qkv = x2 @ params["qkv_w"][i] + params["qkv_b"][i, 0]
        qkv = qkv.reshape(B, N, 3, heads, dh).transpose(2, 0, 3, 1, 4)
        q, k, v = qkv[0], qkv[1], qkv[2]
        s = jnp.einsum("bhnd,bhmd->bhnm", q, k) * scale
        pr = jax.nn.softmax(s, axis=-1)
        o = jnp.einsum("bhnm,bhmd->bhnd", pr, v).transpose(0, 2, 1, 3).reshape(B, N, E)
        seq = seq + o @ params["proj_w"][i] + params["proj_b"][i, 0]
        x3 = ln(seq, params["ln2_g"][i, 0], params["ln2_b"][i, 0])
        h1 = x3 @ params["fc1_w"][i] + params["fc1_b"][i, 0]
        h1 = 0.5 * h1 * (1.0 + jax.lax.erf(h1 / math.sqrt(2.0)))
        seq = seq + h1 @ params["fc2_w"][i] + params["fc2_b"][i, 0]
    seq = ln(seq, params["norm_g"], params["norm_b"])
    feats = seq[:, 1:]
    return feats.reshape(B, Hp, Wp, E).transpose(0, 3, 1, 2)


# ----------------------------- main -----------------------------

if __name__ == "__main__":
    # small config consistent with the DeiT structure; embed_dim = 128 keeps every
    # activation / weight tile lane-dense (exact multiples of the 128-lane vreg width).
    B, IN_CHANS, IMG = 2, 3, 16
    PATCH, EMBED, DEPTH, HEADS, MLP_RATIO = 4, 128, 4, 4, 4
    NUM_PATCHES = (IMG // PATCH) ** 2

    key = jax.random.PRNGKey(0)
    k_param, k_x = jax.random.split(key)
    params = init_params(k_param, in_chans=IN_CHANS, patch=PATCH, embed_dim=EMBED,
                         depth=DEPTH, heads=HEADS, mlp_ratio=MLP_RATIO,
                         num_patches=NUM_PATCHES)
    x = jax.random.normal(k_x, (B, IN_CHANS, IMG, IMG), dtype=jnp.float32)  # NCHW

    fwd = jax.jit(functools.partial(custom_deit_forward,
                                    patch=PATCH, embed_dim=EMBED, heads=HEADS))
    out = fwd(params, x)
    jax.block_until_ready(out)

    expected = (B, EMBED, IMG // PATCH, IMG // PATCH)
    assert out.shape == expected, (out.shape, expected)
    assert bool(jnp.all(jnp.isfinite(out)))

    # loose parity check vs pure-JAX reference (approx reciprocal in the softmax is the only
    # intentional numeric deviation)
    ref = _reference_forward(params, x, patch=PATCH, embed_dim=EMBED, heads=HEADS)
    max_diff = float(jnp.max(jnp.abs(out - ref)))
    assert max_diff < 5e-2, max_diff

    print("KERNEL_OK")
</pallas_src>

<mosaic_0001>
module attributes {stable_mosaic.version = 11 : i64} {
  func.func @_fused_deit_kernel(%arg0: i32, %arg1: i32, %arg2: memref<1x17x48xf32, #tpu.memory_space<vmem>>, %arg3: memref<48x128xf32, #tpu.memory_space<vmem>>, %arg4: memref<17x128xf32, #tpu.memory_space<vmem>>, %arg5: memref<1x1x128xf32, #tpu.memory_space<vmem>>, %arg6: memref<1x1x128xf32, #tpu.memory_space<vmem>>, %arg7: memref<1x128x384xf32, #tpu.memory_space<vmem>>, %arg8: memref<1x1x384xf32, #tpu.memory_space<vmem>>, %arg9: memref<1x128x128xf32, #tpu.memory_space<vmem>>, %arg10: memref<1x1x128xf32, #tpu.memory_space<vmem>>, %arg11: memref<1x1x128xf32, #tpu.memory_space<vmem>>, %arg12: memref<1x1x128xf32, #tpu.memory_space<vmem>>, %arg13: memref<1x128x512xf32, #tpu.memory_space<vmem>>, %arg14: memref<1x1x512xf32, #tpu.memory_space<vmem>>, %arg15: memref<1x512x128xf32, #tpu.memory_space<vmem>>, %arg16: memref<1x1x128xf32, #tpu.memory_space<vmem>>, %arg17: memref<1x128xf32, #tpu.memory_space<vmem>>, %arg18: memref<1x128xf32, #tpu.memory_space<vmem>>, %arg19: memref<1x17x128xf32, #tpu.memory_space<vmem>>) attributes {dimension_semantics = [#tpu.dimension_semantics<parallel>, #tpu.dimension_semantics<arbitrary>], iteration_bounds = array<i64: 2, 4>, scalar_prefetch = 0 : i64, scratch_operands = 0 : i64, tpu.core_type = #tpu.core_type<tc>, window_params = [{transform_indices = @transform_0, window_bounds = array<i64: 1, 17, 48>}, {pipeline_mode = #tpu.pipeline_mode<synchronous>, transform_indices = @transform_1, window_bounds = array<i64: 48, 128>}, {pipeline_mode = #tpu.pipeline_mode<synchronous>, transform_indices = @transform_2, window_bounds = array<i64: 17, 128>}, {transform_indices = @transform_3, window_bounds = array<i64: 1, 1, 128>}, {transform_indices = @transform_4, window_bounds = array<i64: 1, 1, 128>}, {transform_indices = @transform_5, window_bounds = array<i64: 1, 128, 384>}, {transform_indices = @transform_6, window_bounds = array<i64: 1, 1, 384>}, {transform_indices = @transform_7, window_bounds = array<i64: 1, 128, 128>}, {transform_indices = @transform_8, window_bounds = array<i64: 1, 1, 128>}, {transform_indices = @transform_9, window_bounds = array<i64: 1, 1, 128>}, {transform_indices = @transform_10, window_bounds = array<i64: 1, 1, 128>}, {transform_indices = @transform_11, window_bounds = array<i64: 1, 128, 512>}, {transform_indices = @transform_12, window_bounds = array<i64: 1, 1, 512>}, {transform_indices = @transform_13, window_bounds = array<i64: 1, 512, 128>}, {transform_indices = @transform_14, window_bounds = array<i64: 1, 1, 128>}, {pipeline_mode = #tpu.pipeline_mode<synchronous>, transform_indices = @transform_15, window_bounds = array<i64: 1, 128>}, {pipeline_mode = #tpu.pipeline_mode<synchronous>, transform_indices = @transform_16, window_bounds = array<i64: 1, 128>}, {transform_indices = @transform_17, window_bounds = array<i64: 1, 17, 128>}]} {
    %c0_i32 = arith.constant 0 : i32
    %0 = arith.cmpi eq, %arg1, %c0_i32 : i32
    %1 = arith.extui %0 : i1 to i32
    %c0_i32_0 = arith.constant 0 : i32
    %2 = arith.cmpi ne, %1, %c0_i32_0 : i32
    scf.if %2 {
      %c0_88 = arith.constant 0 : index
      %c0_89 = arith.constant 0 : index
      %c0_90 = arith.constant 0 : index
      %183 = vector.load %arg2[%c0_88, %c0_89, %c0_90] : memref<1x17x48xf32, #tpu.memory_space<vmem>>, vector<1x17x48xf32>
      %184 = vector.shape_cast %183 : vector<1x17x48xf32> to vector<17x48xf32>
      %c0_91 = arith.constant 0 : index
      %c0_92 = arith.constant 0 : index
      %185 = vector.load %arg3[%c0_91, %c0_92] : memref<48x128xf32, #tpu.memory_space<vmem>>, vector<48x128xf32>
      %cst_93 = arith.constant dense<0.000000e+00> : vector<17x128xf32>
      %186 = tpu.matmul %184, %185, %cst_93 {dimension_numbers = #tpu.dot_dimension_numbers<[1], [0], [0], [1], [0, 0, 1, 1], [], []>} : vector<17x48xf32>, vector<48x128xf32>, vector<17x128xf32> -> vector<17x128xf32>
      %c0_94 = arith.constant 0 : index
      %c0_95 = arith.constant 0 : index
      %187 = vector.load %arg4[%c0_94, %c0_95] : memref<17x128xf32, #tpu.memory_space<vmem>>, vector<17x128xf32>
      %188 = arith.addf %186, %187 : vector<17x128xf32>
      %c0_96 = arith.constant 0 : index
      %c0_97 = arith.constant 0 : index
      %c0_98 = arith.constant 0 : index
      %189 = vector.load %arg19[%c0_96, %c0_97, %c0_98] : memref<1x17x128xf32, #tpu.memory_space<vmem>>, vector<1x17x128xf32>
      %190 = vector.shape_cast %189 : vector<1x17x128xf32> to vector<17x128xf32>
      %191 = vector.shape_cast %188 : vector<17x128xf32> to vector<1x17x128xf32>
      tpu.vector_store %arg19[%c0_96, %c0_97, %c0_98], %191 {strides = array<i32>} : memref<1x17x128xf32, #tpu.memory_space<vmem>>, vector<1x17x128xf32>,
    } else {
    }
    %c0 = arith.constant 0 : index
    %c0_1 = arith.constant 0 : index
    %c0_2 = arith.constant 0 : index
    %3 = vector.load %arg19[%c0, %c0_1, %c0_2] : memref<1x17x128xf32, #tpu.memory_space<vmem>>, vector<1x17x128xf32>
    %4 = vector.shape_cast %3 : vector<1x17x128xf32> to vector<17x128xf32>
    %c0_3 = arith.constant 0 : index
    %c0_4 = arith.constant 0 : index
    %c0_5 = arith.constant 0 : index
    %5 = vector.load %arg5[%c0_3, %c0_4, %c0_5] : memref<1x1x128xf32, #tpu.memory_space<vmem>>, vector<1x1x128xf32>
    %6 = vector.shape_cast %5 : vector<1x1x128xf32> to vector<1x128xf32>
    %c0_6 = arith.constant 0 : index
    %c0_7 = arith.constant 0 : index
    %c0_8 = arith.constant 0 : index
    %7 = vector.load %arg6[%c0_6, %c0_7, %c0_8] : memref<1x1x128xf32, #tpu.memory_space<vmem>>, vector<1x1x128xf32>
    %8 = vector.shape_cast %7 : vector<1x1x128xf32> to vector<1x128xf32>
    %cst = arith.constant dense<0.000000e+00> : vector<17xf32>
    %9 = vector.multi_reduction <add>, %4, %cst [1] : vector<17x128xf32> to vector<17xf32>
    %10 = vector.shape_cast %9 : vector<17xf32> to vector<17x1xf32>
    %cst_9 = arith.constant 1.280000e+02 : f32
    %11 = vector.broadcast %cst_9 : f32 to vector<17x1xf32>
    %12 = arith.divf %10, %11 : vector<17x1xf32>
    %13 = vector.broadcast %12 : vector<17x1xf32> to vector<17x128xf32>
    %14 = arith.subf %4, %13 : vector<17x128xf32>
    %15 = arith.mulf %14, %14 : vector<17x128xf32>
    %cst_10 = arith.constant dense<0.000000e+00> : vector<17xf32>
    %16 = vector.multi_reduction <add>, %15, %cst_10 [1] : vector<17x128xf32> to vector<17xf32>
    %17 = vector.shape_cast %16 : vector<17xf32> to vector<17x1xf32>
    %cst_11 = arith.constant 1.280000e+02 : f32
    %18 = vector.broadcast %cst_11 : f32 to vector<17x1xf32>
    %19 = arith.divf %17, %18 : vector<17x1xf32>
    %20 = vector.broadcast %12 : vector<17x1xf32> to vector<17x128xf32>
    %21 = arith.subf %4, %20 : vector<17x128xf32>
    %cst_12 = arith.constant 9.99999997E-7 : f32
    %22 = vector.broadcast %cst_12 : f32 to vector<17x1xf32>
    %23 = arith.addf %19, %22 : vector<17x1xf32>
    %24 = math.rsqrt %23 : vector<17x1xf32>
    %25 = vector.broadcast %24 : vector<17x1xf32> to vector<17x128xf32>
    %26 = arith.mulf %21, %25 : vector<17x128xf32>
    %27 = vector.broadcast %6 : vector<1x128xf32> to vector<17x128xf32>
    %28 = arith.mulf %26, %27 : vector<17x128xf32>
    %29 = vector.broadcast %8 : vector<1x128xf32> to vector<17x128xf32>
    %30 = arith.addf %28, %29 : vector<17x128xf32>
    %c0_13 = arith.constant 0 : index
    %c0_14 = arith.constant 0 : index
    %c0_15 = arith.constant 0 : index
    %31 = vector.load %arg7[%c0_13, %c0_14, %c0_15] : memref<1x128x384xf32, #tpu.memory_space<vmem>>, vector<1x128x384xf32>
    %32 = vector.shape_cast %31 : vector<1x128x384xf32> to vector<128x384xf32>
    %cst_16 = arith.constant dense<0.000000e+00> : vector<17x384xf32>
    %33 = tpu.matmul %30, %32, %cst_16 {dimension_numbers = #tpu.dot_dimension_numbers<[1], [0], [0], [1], [0, 0, 1, 1], [], []>} : vector<17x128xf32>, vector<128x384xf32>, vector<17x384xf32> -> vector<17x384xf32>
    %c0_17 = arith.constant 0 : index
    %c0_18 = arith.constant 0 : index
    %c0_19 = arith.constant 0 : index
    %34 = vector.load %arg8[%c0_17, %c0_18, %c0_19] : memref<1x1x384xf32, #tpu.memory_space<vmem>>, vector<1x1x384xf32>
    %35 = vector.shape_cast %34 : vector<1x1x384xf32> to vector<1x384xf32>
    %36 = vector.broadcast %35 : vector<1x384xf32> to vector<17x384xf32>
    %37 = arith.addf %33, %36 : vector<17x384xf32>
    %cst_20 = arith.constant 0.000000e+00 : f32
    %38 = vector.broadcast %cst_20 : f32 to vector<17x128xf32>
    %39 = vector.extract_strided_slice %37 {offsets = [0, 0], sizes = [17, 32], strides = [1, 1]} : vector<17x384xf32> to vector<17x32xf32>
    %cst_21 = arith.constant 0.176776692 : f32
    %40 = vector.broadcast %cst_21 : f32 to vector<17x32xf32>
    %41 = arith.mulf %39, %40 : vector<17x32xf32>
    %42 = vector.extract_strided_slice %37 {offsets = [0, 128], sizes = [17, 32], strides = [1, 1]} : vector<17x384xf32> to vector<17x32xf32>
    %43 = vector.extract_strided_slice %37 {offsets = [0, 256], sizes = [17, 32], strides = [1, 1]} : vector<17x384xf32> to vector<17x32xf32>
    %cst_22 = arith.constant dense<0.000000e+00> : vector<17x17xf32>
    %44 = tpu.matmul %41, %42, %cst_22 {dimension_numbers = #tpu.dot_dimension_numbers<[1], [1], [0], [0], [0, 0, 1, 0], [], []>} : vector<17x32xf32>, vector<17x32xf32>, vector<17x17xf32> -> vector<17x17xf32>
    %cst_23 = arith.constant dense<0xFF800000> : vector<17xf32>
    %45 = vector.multi_reduction <maximumf>, %44, %cst_23 [1] : vector<17x17xf32> to vector<17xf32>
    %46 = vector.shape_cast %45 : vector<17xf32> to vector<17x1xf32>
    %47 = vector.broadcast %46 : vector<17x1xf32> to vector<17x17xf32>
    %48 = arith.subf %44, %47 : vector<17x17xf32>
    %49 = math.exp %48 : vector<17x17xf32>
    %cst_24 = arith.constant dense<0.000000e+00> : vector<17xf32>
    %50 = vector.multi_reduction <add>, %49, %cst_24 [1] : vector<17x17xf32> to vector<17xf32>
    %51 = vector.shape_cast %50 : vector<17xf32> to vector<17x1xf32>
    %52 = tpu.reciprocal %51 {approx = true} : vector<17x1xf32> -> vector<17x1xf32>
    %53 = vector.broadcast %52 : vector<17x1xf32> to vector<17x17xf32>
    %54 = arith.mulf %49, %53 : vector<17x17xf32>
    %cst_25 = arith.constant dense<0.000000e+00> : vector<17x32xf32>
    %55 = tpu.matmul %54, %43, %cst_25 {dimension_numbers = #tpu.dot_dimension_numbers<[1], [0], [0], [1], [0, 0, 1, 1], [], []>} : vector<17x17xf32>, vector<17x32xf32>, vector<17x32xf32> -> vector<17x32xf32>
    %c0_26 = arith.constant 0 : index
    %c0_27 = arith.constant 0 : index
    %c0_28 = arith.constant 0 : index
    %56 = vector.load %arg9[%c0_26, %c0_27, %c0_28] : memref<1x128x128xf32, #tpu.memory_space<vmem>>, vector<1x32x128xf32>
    %57 = vector.shape_cast %56 : vector<1x32x128xf32> to vector<32x128xf32>
    %cst_29 = arith.constant dense<0.000000e+00> : vector<17x128xf32>
    %58 = tpu.matmul %55, %57, %cst_29 {dimension_numbers = #tpu.dot_dimension_numbers<[1], [0], [0], [1], [0, 0, 1, 1], [], []>} : vector<17x32xf32>, vector<32x128xf32>, vector<17x128xf32> -> vector<17x128xf32>
    %59 = arith.addf %38, %58 : vector<17x128xf32>
    %60 = vector.extract_strided_slice %37 {offsets = [0, 32], sizes = [17, 32], strides = [1, 1]} : vector<17x384xf32> to vector<17x32xf32>
    %cst_30 = arith.constant 0.176776692 : f32
    %61 = vector.broadcast %cst_30 : f32 to vector<17x32xf32>
    %62 = arith.mulf %60, %61 : vector<17x32xf32>
    %63 = vector.extract_strided_slice %37 {offsets = [0, 160], sizes = [17, 32], strides = [1, 1]} : vector<17x384xf32> to vector<17x32xf32>
    %64 = vector.extract_strided_slice %37 {offsets = [0, 288], sizes = [17, 32], strides = [1, 1]} : vector<17x384xf32> to vector<17x32xf32>
    %cst_31 = arith.constant dense<0.000000e+00> : vector<17x17xf32>
    %65 = tpu.matmul %62, %63, %cst_31 {dimension_numbers = #tpu.dot_dimension_numbers<[1], [1], [0], [0], [0, 0, 1, 0], [], []>} : vector<17x32xf32>, vector<17x32xf32>, vector<17x17xf32> -> vector<17x17xf32>
    %cst_32 = arith.constant dense<0xFF800000> : vector<17xf32>
    %66 = vector.multi_reduction <maximumf>, %65, %cst_32 [1] : vector<17x17xf32> to vector<17xf32>
    %67 = vector.shape_cast %66 : vector<17xf32> to vector<17x1xf32>
    %68 = vector.broadcast %67 : vector<17x1xf32> to vector<17x17xf32>
    %69 = arith.subf %65, %68 : vector<17x17xf32>
    %70 = math.exp %69 : vector<17x17xf32>
    %cst_33 = arith.constant dense<0.000000e+00> : vector<17xf32>
    %71 = vector.multi_reduction <add>, %70, %cst_33 [1] : vector<17x17xf32> to vector<17xf32>
    %72 = vector.shape_cast %71 : vector<17xf32> to vector<17x1xf32>
    %73 = tpu.reciprocal %72 {approx = true} : vector<17x1xf32> -> vector<17x1xf32>
    %74 = vector.broadcast %73 : vector<17x1xf32> to vector<17x17xf32>
    %75 = arith.mulf %70, %74 : vector<17x17xf32>
    %cst_34 = arith.constant dense<0.000000e+00> : vector<17x32xf32>
    %76 = tpu.matmul %75, %64, %cst_34 {dimension_numbers = #tpu.dot_dimension_numbers<[1], [0], [0], [1], [0, 0, 1, 1], [], []>} : vector<17x17xf32>, vector<17x32xf32>, vector<17x32xf32> -> vector<17x32xf32>
    %c0_35 = arith.constant 0 : index
    %c32 = arith.constant 32 : index
    %c0_36 = arith.constant 0 : index
    %77 = vector.load %arg9[%c0_35, %c32, %c0_36] : memref<1x128x128xf32, #tpu.memory_space<vmem>>, vector<1x32x128xf32>
    %78 = vector.shape_cast %77 : vector<1x32x128xf32> to vector<32x128xf32>
    %cst_37 = arith.constant dense<0.000000e+00> : vector<17x128xf32>
    %79 = tpu.matmul %76, %78, %cst_37 {dimension_numbers = #tpu.dot_dimension_numbers<[1], [0], [0], [1], [0, 0, 1, 1], [], []>} : vector<17x32xf32>, vector<32x128xf32>, vector<17x128xf32> -> vector<17x128xf32>
    %80 = arith.addf %59, %79 : vector<17x128xf32>
    %81 = vector.extract_strided_slice %37 {offsets = [0, 64], sizes = [17, 32], strides = [1, 1]} : vector<17x384xf32> to vector<17x32xf32>
    %cst_38 = arith.constant 0.176776692 : f32
    %82 = vector.broadcast %cst_38 : f32 to vector<17x32xf32>
    %83 = arith.mulf %81, %82 : vector<17x32xf32>
    %84 = vector.extract_strided_slice %37 {offsets = [0, 192], sizes = [17, 32], strides = [1, 1]} : vector<17x384xf32> to vector<17x32xf32>
    %85 = vector.extract_strided_slice %37 {offsets = [0, 320], sizes = [17, 32], strides = [1, 1]} : vector<17x384xf32> to vector<17x32xf32>
    %cst_39 = arith.constant dense<0.000000e+00> : vector<17x17xf32>
    %86 = tpu.matmul %83, %84, %cst_39 {dimension_numbers = #tpu.dot_dimension_numbers<[1], [1], [0], [0], [0, 0, 1, 0], [], []>} : vector<17x32xf32>, vector<17x32xf32>, vector<17x17xf32> -> vector<17x17xf32>
    %cst_40 = arith.constant dense<0xFF800000> : vector<17xf32>
    %87 = vector.multi_reduction <maximumf>, %86, %cst_40 [1] : vector<17x17xf32> to vector<17xf32>
    %88 = vector.shape_cast %87 : vector<17xf32> to vector<17x1xf32>
    %89 = vector.broadcast %88 : vector<17x1xf32> to vector<17x17xf32>
    %90 = arith.subf %86, %89 : vector<17x17xf32>
    %91 = math.exp %90 : vector<17x17xf32>
    %cst_41 = arith.constant dense<0.000000e+00> : vector<17xf32>
    %92 = vector.multi_reduction <add>, %91, %cst_41 [1] : vector<17x17xf32> to vector<17xf32>
    %93 = vector.shape_cast %92 : vector<17xf32> to vector<17x1xf32>
    %94 = tpu.reciprocal %93 {approx = true} : vector<17x1xf32> -> vector<17x1xf32>
    %95 = vector.broadcast %94 : vector<17x1xf32> to vector<17x17xf32>
    %96 = arith.mulf %91, %95 : vector<17x17xf32>
    %cst_42 = arith.constant dense<0.000000e+00> : vector<17x32xf32>
    %97 = tpu.matmul %96, %85, %cst_42 {dimension_numbers = #tpu.dot_dimension_numbers<[1], [0], [0], [1], [0, 0, 1, 1], [], []>} : vector<17x17xf32>, vector<17x32xf32>, vector<17x32xf32> -> vector<17x32xf32>
    %c0_43 = arith.constant 0 : index
    %c64 = arith.constant 64 : index
    %c0_44 = arith.constant 0 : index
    %98 = vector.load %arg9[%c0_43, %c64, %c0_44] : memref<1x128x128xf32, #tpu.memory_space<vmem>>, vector<1x32x128xf32>
    %99 = vector.shape_cast %98 : vector<1x32x128xf32> to vector<32x128xf32>
    %cst_45 = arith.constant dense<0.000000e+00> : vector<17x128xf32>
    %100 = tpu.matmul %97, %99, %cst_45 {dimension_numbers = #tpu.dot_dimension_numbers<[1], [0], [0], [1], [0, 0, 1, 1], [], []>} : vector<17x32xf32>, vector<32x128xf32>, vector<17x128xf32> -> vector<17x128xf32>
    %101 = arith.addf %80, %100 : vector<17x128xf32>
    %102 = vector.extract_strided_slice %37 {offsets = [0, 96], sizes = [17, 32], strides = [1, 1]} : vector<17x384xf32> to vector<17x32xf32>
    %cst_46 = arith.constant 0.176776692 : f32
    %103 = vector.broadcast %cst_46 : f32 to vector<17x32xf32>
    %104 = arith.mulf %102, %103 : vector<17x32xf32>
    %105 = vector.extract_strided_slice %37 {offsets = [0, 224], sizes = [17, 32], strides = [1, 1]} : vector<17x384xf32> to vector<17x32xf32>
    %106 = vector.extract_strided_slice %37 {offsets = [0, 352], sizes = [17, 32], strides = [1, 1]} : vector<17x384xf32> to vector<17x32xf32>
    %cst_47 = arith.constant dense<0.000000e+00> : vector<17x17xf32>
    %107 = tpu.matmul %104, %105, %cst_47 {dimension_numbers = #tpu.dot_dimension_numbers<[1], [1], [0], [0], [0, 0, 1, 0], [], []>} : vector<17x32xf32>, vector<17x32xf32>, vector<17x17xf32> -> vector<17x17xf32>
    %cst_48 = arith.constant dense<0xFF800000> : vector<17xf32>
    %108 = vector.multi_reduction <maximumf>, %107, %cst_48 [1] : vector<17x17xf32> to vector<17xf32>
    %109 = vector.shape_cast %108 : vector<17xf32> to vector<17x1xf32>
    %110 = vector.broadcast %109 : vector<17x1xf32> to vector<17x17xf32>
    %111 = arith.subf %107, %110 : vector<17x17xf32>
    %112 = math.exp %111 : vector<17x17xf32>
    %cst_49 = arith.constant dense<0.000000e+00> : vector<17xf32>
    %113 = vector.multi_reduction <add>, %112, %cst_49 [1] : vector<17x17xf32> to vector<17xf32>
    %114 = vector.shape_cast %113 : vector<17xf32> to vector<17x1xf32>
    %115 = tpu.reciprocal %114 {approx = true} : vector<17x1xf32> -> vector<17x1xf32>
    %116 = vector.broadcast %115 : vector<17x1xf32> to vector<17x17xf32>
    %117 = arith.mulf %112, %116 : vector<17x17xf32>
    %cst_50 = arith.constant dense<0.000000e+00> : vector<17x32xf32>
    %118 = tpu.matmul %117, %106, %cst_50 {dimension_numbers = #tpu.dot_dimension_numbers<[1], [0], [0], [1], [0, 0, 1, 1], [], []>} : vector<17x17xf32>, vector<17x32xf32>, vector<17x32xf32> -> vector<17x32xf32>
    %c0_51 = arith.constant 0 : index
    %c96 = arith.constant 96 : index
    %c0_52 = arith.constant 0 : index
    %119 = vector.load %arg9[%c0_51, %c96, %c0_52] : memref<1x128x128xf32, #tpu.memory_space<vmem>>, vector<1x32x128xf32>
    %120 = vector.shape_cast %119 : vector<1x32x128xf32> to vector<32x128xf32>
    %cst_53 = arith.constant dense<0.000000e+00> : vector<17x128xf32>
    %121 = tpu.matmul %118, %120, %cst_53 {dimension_numbers = #tpu.dot_dimension_numbers<[1], [0], [0], [1], [0, 0, 1, 1], [], []>} : vector<17x32xf32>, vector<32x128xf32>, vector<17x128xf32> -> vector<17x128xf32>
    %122 = arith.addf %101, %121 : vector<17x128xf32>
    %123 = arith.addf %4, %122 : vector<17x128xf32>
    %c0_54 = arith.constant 0 : index
    %c0_55 = arith.constant 0 : index
    %c0_56 = arith.constant 0 : index
    %124 = vector.load %arg10[%c0_54, %c0_55, %c0_56] : memref<1x1x128xf32, #tpu.memory_space<vmem>>, vector<1x1x128xf32>
    %125 = vector.shape_cast %124 : vector<1x1x128xf32> to vector<1x128xf32>
    %126 = vector.broadcast %125 : vector<1x128xf32> to vector<17x128xf32>
    %127 = arith.addf %123, %126 : vector<17x128xf32>
    %c0_57 = arith.constant 0 : index
    %c0_58 = arith.constant 0 : index
    %c0_59 = arith.constant 0 : index
    %128 = vector.load %arg11[%c0_57, %c0_58, %c0_59] : memref<1x1x128xf32, #tpu.memory_space<vmem>>, vector<1x1x128xf32>
    %129 = vector.shape_cast %128 : vector<1x1x128xf32> to vector<1x128xf32>
    %c0_60 = arith.constant 0 : index
    %c0_61 = arith.constant 0 : index
    %c0_62 = arith.constant 0 : index
    %130 = vector.load %arg12[%c0_60, %c0_61, %c0_62] : memref<1x1x128xf32, #tpu.memory_space<vmem>>, vector<1x1x128xf32>
    %131 = vector.shape_cast %130 : vector<1x1x128xf32> to vector<1x128xf32>
    %cst_63 = arith.constant dense<0.000000e+00> : vector<17xf32>
    %132 = vector.multi_reduction <add>, %127, %cst_63 [1] : vector<17x128xf32> to vector<17xf32>
    %133 = vector.shape_cast %132 : vector<17xf32> to vector<17x1xf32>
    %cst_64 = arith.constant 1.280000e+02 : f32
    %134 = vector.broadcast %cst_64 : f32 to vector<17x1xf32>
    %135 = arith.divf %133, %134 : vector<17x1xf32>
    %136 = vector.broadcast %135 : vector<17x1xf32> to vector<17x128xf32>
    %137 = arith.subf %127, %136 : vector<17x128xf32>
    %138 = arith.mulf %137, %137 : vector<17x128xf32>
    %cst_65 = arith.constant dense<0.000000e+00> : vector<17xf32>
    %139 = vector.multi_reduction <add>, %138, %cst_65 [1] : vector<17x128xf32> to vector<17xf32>
    %140 = vector.shape_cast %139 : vector<17xf32> to vector<17x1xf32>
    %cst_66 = arith.constant 1.280000e+02 : f32
    %141 = vector.broadcast %cst_66 : f32 to vector<17x1xf32>
    %142 = arith.divf %140, %141 : vector<17x1xf32>
    %143 = vector.broadcast %135 : vector<17x1xf32> to vector<17x128xf32>
    %144 = arith.subf %127, %143 : vector<17x128xf32>
    %cst_67 = arith.constant 9.99999997E-7 : f32
    %145 = vector.broadcast %cst_67 : f32 to vector<17x1xf32>
    %146 = arith.addf %142, %145 : vector<17x1xf32>
    %147 = math.rsqrt %146 : vector<17x1xf32>
    %148 = vector.broadcast %147 : vector<17x1xf32> to vector<17x128xf32>
    %149 = arith.mulf %144, %148 : vector<17x128xf32>
    %150 = vector.broadcast %129 : vector<1x128xf32> to vector<17x128xf32>
    %151 = arith.mulf %149, %150 : vector<17x128xf32>
    %152 = vector.broadcast %131 : vector<1x128xf32> to vector<17x128xf32>
    %153 = arith.addf %151, %152 : vector<17x128xf32>
    %c0_68 = arith.constant 0 : index
    %c0_69 = arith.constant 0 : index
    %c0_70 = arith.constant 0 : index
    %154 = vector.load %arg13[%c0_68, %c0_69, %c0_70] : memref<1x128x512xf32, #tpu.memory_space<vmem>>, vector<1x128x512xf32>
    %155 = vector.shape_cast %154 : vector<1x128x512xf32> to vector<128x512xf32>
    %cst_71 = arith.constant dense<0.000000e+00> : vector<17x512xf32>
    %156 = tpu.matmul %153, %155, %cst_71 {dimension_numbers = #tpu.dot_dimension_numbers<[1], [0], [0], [1], [0, 0, 1, 1], [], []>} : vector<17x128xf32>, vector<128x512xf32>, vector<17x512xf32> -> vector<17x512xf32>
    %c0_72 = arith.constant 0 : index
    %c0_73 = arith.constant 0 : index
    %c0_74 = arith.constant 0 : index
    %157 = vector.load %arg14[%c0_72, %c0_73, %c0_74] : memref<1x1x512xf32, #tpu.memory_space<vmem>>, vector<1x1x512xf32>
    %158 = vector.shape_cast %157 : vector<1x1x512xf32> to vector<1x512xf32>
    %159 = vector.broadcast %158 : vector<1x512xf32> to vector<17x512xf32>
    %160 = arith.addf %156, %159 : vector<17x512xf32>
    %cst_75 = arith.constant 5.000000e-01 : f32
    %161 = vector.broadcast %cst_75 : f32 to vector<17x512xf32>
    %162 = arith.mulf %161, %160 : vector<17x512xf32>
    %cst_76 = arith.constant 0.707106769 : f32
    %163 = vector.broadcast %cst_76 : f32 to vector<17x512xf32>
    %164 = arith.mulf %160, %163 : vector<17x512xf32>
    %165 = math.erf %164 : vector<17x512xf32>
    %cst_77 = arith.constant 1.000000e+00 : f32
    %166 = vector.broadcast %cst_77 : f32 to vector<17x512xf32>
    %167 = arith.addf %166, %165 : vector<17x512xf32>
    %168 = arith.mulf %162, %167 : vector<17x512xf32>
    %c0_78 = arith.constant 0 : index
    %c0_79 = arith.constant 0 : index
    %c0_80 = arith.constant 0 : index
    %169 = vector.load %arg15[%c0_78, %c0_79, %c0_80] : memref<1x512x128xf32, #tpu.memory_space<vmem>>, vector<1x512x128xf32>
    %170 = vector.shape_cast %169 : vector<1x512x128xf32> to vector<512x128xf32>
    %cst_81 = arith.constant dense<0.000000e+00> : vector<17x128xf32>
    %171 = tpu.matmul %168, %170, %cst_81 {dimension_numbers = #tpu.dot_dimension_numbers<[1], [0], [0], [1], [0, 0, 1, 1], [], []>} : vector<17x512xf32>, vector<512x128xf32>, vector<17x128xf32> -> vector<17x128xf32>
    %c0_82 = arith.constant 0 : index
    %c0_83 = arith.constant 0 : index
    %c0_84 = arith.constant 0 : index
    %172 = vector.load %arg16[%c0_82, %c0_83, %c0_84] : memref<1x1x128xf32, #tpu.memory_space<vmem>>, vector<1x1x128xf32>
    %173 = vector.shape_cast %172 : vector<1x1x128xf32> to vector<1x128xf32>
    %174 = vector.broadcast %173 : vector<1x128xf32> to vector<17x128xf32>
    %175 = arith.addf %171, %174 : vector<17x128xf32>
    %176 = arith.addf %127, %175 : vector<17x128xf32>
    %c3_i32 = arith.constant 3 : i32
    %177 = arith.cmpi slt, %arg1, %c3_i32 : i32
    %178 = arith.extui %177 : i1 to i32
    %c0_i32_85 = arith.constant 0 : i32
    %179 = arith.cmpi ne, %178, %c0_i32_85 : i32
    scf.if %179 {
      %c0_88 = arith.constant 0 : index
      %c0_89 = arith.constant 0 : index
      %c0_90 = arith.constant 0 : index
      %183 = vector.load %arg19[%c0_88, %c0_89, %c0_90] : memref<1x17x128xf32, #tpu.memory_space<vmem>>, vector<1x17x128xf32>
      %184 = vector.shape_cast %183 : vector<1x17x128xf32> to vector<17x128xf32>
      %185 = vector.shape_cast %176 : vector<17x128xf32> to vector<1x17x128xf32>
      tpu.vector_store %arg19[%c0_88, %c0_89, %c0_90], %185 {strides = array<i32>} : memref<1x17x128xf32, #tpu.memory_space<vmem>>, vector<1x17x128xf32>,
    } else {
    }
    %c3_i32_86 = arith.constant 3 : i32
    %180 = arith.cmpi eq, %arg1, %c3_i32_86 : i32
    %181 = arith.extui %180 : i1 to i32
    %c0_i32_87 = arith.constant 0 : i32
    %182 = arith.cmpi ne, %181, %c0_i32_87 : i32
    scf.if %182 {
      %c0_88 = arith.constant 0 : index
      %c0_89 = arith.constant 0 : index
      %183 = vector.load %arg17[%c0_88, %c0_89] : memref<1x128xf32, #tpu.memory_space<vmem>>, vector<1x128xf32>
      %c0_90 = arith.constant 0 : index
      %c0_91 = arith.constant 0 : index
      %184 = vector.load %arg18[%c0_90, %c0_91] : memref<1x128xf32, #tpu.memory_space<vmem>>, vector<1x128xf32>
      %cst_92 = arith.constant dense<0.000000e+00> : vector<17xf32>
      %185 = vector.multi_reduction <add>, %176, %cst_92 [1] : vector<17x128xf32> to vector<17xf32>
      %186 = vector.shape_cast %185 : vector<17xf32> to vector<17x1xf32>
      %cst_93 = arith.constant 1.280000e+02 : f32
      %187 = vector.broadcast %cst_93 : f32 to vector<17x1xf32>
      %188 = arith.divf %186, %187 : vector<17x1xf32>
      %189 = vector.broadcast %188 : vector<17x1xf32> to vector<17x128xf32>
      %190 = arith.subf %176, %189 : vector<17x128xf32>
      %191 = arith.mulf %190, %190 : vector<17x128xf32>
      %cst_94 = arith.constant dense<0.000000e+00> : vector<17xf32>
      %192 = vector.multi_reduction <add>, %191, %cst_94 [1] : vector<17x128xf32> to vector<17xf32>
      %193 = vector.shape_cast %192 : vector<17xf32> to vector<17x1xf32>
      %cst_95 = arith.constant 1.280000e+02 : f32
      %194 = vector.broadcast %cst_95 : f32 to vector<17x1xf32>
      %195 = arith.divf %193, %194 : vector<17x1xf32>
      %196 = vector.broadcast %188 : vector<17x1xf32> to vector<17x128xf32>
      %197 = arith.subf %176, %196 : vector<17x128xf32>
      %cst_96 = arith.constant 9.99999997E-7 : f32
      %198 = vector.broadcast %cst_96 : f32 to vector<17x1xf32>
      %199 = arith.addf %195, %198 : vector<17x1xf32>
      %200 = math.rsqrt %199 : vector<17x1xf32>
      %201 = vector.broadcast %200 : vector<17x1xf32> to vector<17x128xf32>
      %202 = arith.mulf %197, %201 : vector<17x128xf32>
      %203 = vector.broadcast %183 : vector<1x128xf32> to vector<17x128xf32>
      %204 = arith.mulf %202, %203 : vector<17x128xf32>
      %205 = vector.broadcast %184 : vector<1x128xf32> to vector<17x128xf32>
      %206 = arith.addf %204, %205 : vector<17x128xf32>
      %c0_97 = arith.constant 0 : index
      %c0_98 = arith.constant 0 : index
      %c0_99 = arith.constant 0 : index
      %207 = vector.load %arg19[%c0_97, %c0_98, %c0_99] : memref<1x17x128xf32, #tpu.memory_space<vmem>>, vector<1x17x128xf32>
      %208 = vector.shape_cast %207 : vector<1x17x128xf32> to vector<17x128xf32>
      %209 = vector.shape_cast %206 : vector<17x128xf32> to vector<1x17x128xf32>
      tpu.vector_store %arg19[%c0_97, %c0_98, %c0_99], %209 {strides = array<i32>} : memref<1x17x128xf32, #tpu.memory_space<vmem>>, vector<1x17x128xf32>,
    } else {
    }
    return
  }
  func.func @transform_0(%arg0: i32, %arg1: i32) -> (i32, i32, i32) {
    %c0_i32 = arith.constant 0 : i32
    %c0_i32_0 = arith.constant 0 : i32
    %c0_i32_1 = arith.constant 0 : i32
    return %arg0, %c0_i32, %c0_i32_0 : i32, i32, i32
  }
  func.func @transform_1(%arg0: i32, %arg1: i32) -> (i32, i32) {
    %c0_i32 = arith.constant 0 : i32
    %c0_i32_0 = arith.constant 0 : i32
    %c0_i32_1 = arith.constant 0 : i32
    return %c0_i32, %c0_i32_0 : i32, i32
  }
  func.func @transform_2(%arg0: i32, %arg1: i32) -> (i32, i32) {
    %c0_i32 = arith.constant 0 : i32
    %c0_i32_0 = arith.constant 0 : i32
    %c0_i32_1 = arith.constant 0 : i32
    return %c0_i32, %c0_i32_0 : i32, i32
  }
  func.func @transform_3(%arg0: i32, %arg1: i32) -> (i32, i32, i32) {
    %c0_i32 = arith.constant 0 : i32
    %c0_i32_0 = arith.constant 0 : i32
    %c0_i32_1 = arith.constant 0 : i32
    return %arg1, %c0_i32, %c0_i32_0 : i32, i32, i32
  }
  func.func @transform_4(%arg0: i32, %arg1: i32) -> (i32, i32, i32) {
    %c0_i32 = arith.constant 0 : i32
    %c0_i32_0 = arith.constant 0 : i32
    %c0_i32_1 = arith.constant 0 : i32
    return %arg1, %c0_i32, %c0_i32_0 : i32, i32, i32
  }
  func.func @transform_5(%arg0: i32, %arg1: i32) -> (i32, i32, i32) {
    %c0_i32 = arith.constant 0 : i32
    %c0_i32_0 = arith.constant 0 : i32
    %c0_i32_1 = arith.constant 0 : i32
    return %arg1, %c0_i32, %c0_i32_0 : i32, i32, i32
  }
  func.func @transform_6(%arg0: i32, %arg1: i32) -> (i32, i32, i32) {
    %c0_i32 = arith.constant 0 : i32
    %c0_i32_0 = arith.constant 0 : i32
    %c0_i32_1 = arith.constant 0 : i32
    return %arg1, %c0_i32, %c0_i32_0 : i32, i32, i32
  }
  func.func @transform_7(%arg0: i32, %arg1: i32) -> (i32, i32, i32) {
    %c0_i32 = arith.constant 0 : i32
    %c0_i32_0 = arith.constant 0 : i32
    %c0_i32_1 = arith.constant 0 : i32
    return %arg1, %c0_i32, %c0_i32_0 : i32, i32, i32
  }
  func.func @transform_8(%arg0: i32, %arg1: i32) -> (i32, i32, i32) {
    %c0_i32 = arith.constant 0 : i32
    %c0_i32_0 = arith.constant 0 : i32
    %c0_i32_1 = arith.constant 0 : i32
    return %arg1, %c0_i32, %c0_i32_0 : i32, i32, i32
  }
  func.func @transform_9(%arg0: i32, %arg1: i32) -> (i32, i32, i32) {
    %c0_i32 = arith.constant 0 : i32
    %c0_i32_0 = arith.constant 0 : i32
    %c0_i32_1 = arith.constant 0 : i32
    return %arg1, %c0_i32, %c0_i32_0 : i32, i32, i32
  }
  func.func @transform_10(%arg0: i32, %arg1: i32) -> (i32, i32, i32) {
    %c0_i32 = arith.constant 0 : i32
    %c0_i32_0 = arith.constant 0 : i32
    %c0_i32_1 = arith.constant 0 : i32
    return %arg1, %c0_i32, %c0_i32_0 : i32, i32, i32
  }
  func.func @transform_11(%arg0: i32, %arg1: i32) -> (i32, i32, i32) {
    %c0_i32 = arith.constant 0 : i32
    %c0_i32_0 = arith.constant 0 : i32
    %c0_i32_1 = arith.constant 0 : i32
    return %arg1, %c0_i32, %c0_i32_0 : i32, i32, i32
  }
  func.func @transform_12(%arg0: i32, %arg1: i32) -> (i32, i32, i32) {
    %c0_i32 = arith.constant 0 : i32
    %c0_i32_0 = arith.constant 0 : i32
    %c0_i32_1 = arith.constant 0 : i32
    return %arg1, %c0_i32, %c0_i32_0 : i32, i32, i32
  }
  func.func @transform_13(%arg0: i32, %arg1: i32) -> (i32, i32, i32) {
    %c0_i32 = arith.constant 0 : i32
    %c0_i32_0 = arith.constant 0 : i32
    %c0_i32_1 = arith.constant 0 : i32
    return %arg1, %c0_i32, %c0_i32_0 : i32, i32, i32
  }
  func.func @transform_14(%arg0: i32, %arg1: i32) -> (i32, i32, i32) {
    %c0_i32 = arith.constant 0 : i32
    %c0_i32_0 = arith.constant 0 : i32
    %c0_i32_1 = arith.constant 0 : i32
    return %arg1, %c0_i32, %c0_i32_0 : i32, i32, i32
  }
  func.func @transform_15(%arg0: i32, %arg1: i32) -> (i32, i32) {
    %c0_i32 = arith.constant 0 : i32
    %c0_i32_0 = arith.constant 0 : i32
    %c0_i32_1 = arith.constant 0 : i32
    return %c0_i32, %c0_i32_0 : i32, i32
  }
  func.func @transform_16(%arg0: i32, %arg1: i32) -> (i32, i32) {
    %c0_i32 = arith.constant 0 : i32
    %c0_i32_0 = arith.constant 0 : i32
    %c0_i32_1 = arith.constant 0 : i32
    return %c0_i32, %c0_i32_0 : i32, i32
  }
  func.func @transform_17(%arg0: i32, %arg1: i32) -> (i32, i32, i32) {
    %c0_i32 = arith.constant 0 : i32
    %c0_i32_0 = arith.constant 0 : i32
    %c0_i32_1 = arith.constant 0 : i32
    return %arg0, %c0_i32, %c0_i32_0 : i32, i32, i32
  }
}

</mosaic_0001>

<bundles_post_ra>
// kernel: custom_deit_forward.1
= control target key start
LH: loop header
LB: loop body
LE: loop exit
PB: predicated region body
PF: predicated region fallthrough
CT: control target
= control target key end

     0   :  { %s4777_s0 = inlined_call_operand.vmem [shape: f32[2,17,48], index: 0, kind: input, shape index: {}]   ;;  %s4778_s1 = inlined_call_operand.vmem [shape: f32[48,128], index: 1, kind: input, shape index: {}]   ;;  %s4779_s2 = inlined_call_operand.vmem [shape: f32[17,128], index: 2, kind: input, shape index: {}]   ;;  %s4780_s3 = inlined_call_operand.vmem [shape: f32[4,1,128], index: 3, kind: input, shape index: {}]   ;;  %s4781_s4 = inlined_call_operand.vmem [shape: f32[4,1,128], index: 4, kind: input, shape index: {}]   ;;  %s4782_s5 = inlined_call_operand.vmem [shape: f32[4,128,384], index: 5, kind: input, shape index: {}]   ;;  %s4783_s6 = inlined_call_operand.vmem [shape: f32[4,1,384], index: 6, kind: input, shape index: {}]   ;;  %s4784_s7 = inlined_call_operand.hbm [shape: f32[4,128,128], index: 7, kind: input, shape index: {}]   ;;  %s4785_s8 = inlined_call_operand.vmem [shape: f32[4,1,128], index: 8, kind: input, shape index: {}]   ;;  %s4786_s9 = inlined_call_operand.vmem [shape: f32[4,1,128], index: 9, kind: input, shape index: {}]   ;;  %s4787_s10 = inlined_call_operand.vmem [shape: f32[4,1,128], index: 10, kind: input, shape index: {}]   ;;  %s4788_s11 = inlined_call_operand.hbm [shape: f32[4,128,512], index: 11, kind: input, shape index: {}]   ;;  %s4789_s12 = inlined_call_operand.vmem [shape: f32[4,1,512], index: 12, kind: input, shape index: {}]   ;;  %s4790_s13 = inlined_call_operand.hbm [shape: f32[4,512,128], index: 13, kind: input, shape index: {}]   ;;  %s4791_s14 = inlined_call_operand.vmem [shape: f32[4,1,128], index: 14, kind: input, shape index: {}]   ;;  %s4792_s15 = inlined_call_operand.vmem [shape: f32[1,128], index: 15, kind: input, shape index: {}]   ;;  %s4793_s16 = inlined_call_operand.vmem [shape: f32[1,128], index: 16, kind: input, shape index: {}]   ;;  %s4794_s17 = inlined_call_operand.vmem [shape: f32[2,17,128], index: 17, kind: output, shape index: {}]  }
   0x1   :  { %4805 = sst [smem:[#allocation18_spill]] %s4777_s0 }
   0x2   :  { %4806 = sst [smem:[#allocation19_spill]] %s4778_s1 }
   0x3   :  { %4807 = sst [smem:[#allocation20_spill]] %s4779_s2 }
   0x4   :  { %4808 = sst [smem:[#allocation21_spill]] %s4782_s5 }
   0x5   :  { %4809 = sst [smem:[#allocation22_spill]] %s4784_s7 }
   0x6   :  { %4810 = sst [smem:[#allocation23_spill]] %s4785_s8 }
   0x7   :  { %4811 = sst [smem:[#allocation24_spill]] %s4787_s10 }
   0x8   :  { %4812 = sst [smem:[#allocation25_spill]] %s4788_s11 }
   0x9   :  { %4813 = sst [smem:[#allocation26_spill]] %s4789_s12 }
   0xa   :  { %4814 = sst [smem:[#allocation27_spill]] %s4790_s13 }
   0xb   :  { %4815 = sst [smem:[#allocation28_spill]] %s4791_s14 }
   0xc   :  { %4816 = sst [smem:[#allocation29_spill]] %s4792_s15 }
   0xd   :  { %4817 = sst [smem:[#allocation30_spill]] %s4793_s16 }
   0xe   :  { %4818 = sst [smem:[#allocation31_spill]] %s4794_s17 }
   0xf   :  { %22 = vsyncpa [#allocation3], 0 }
  0x10   :  { %24 = vsyncpa [#allocation3 + $0x1], 0 }
  0x11   :  { %25 = vsyncpa [#allocation5], 0 }
  0x12   :  { %27 = vsyncpa [#allocation5 + $0x1], 0  ;;  %s3631_s24 = smov 0   ;;  %s3633_s25 = smov 0  }
  0x13   :  { %s3635_s26 = smov 0   ;;  %s3637_s27 = smov 0  }
  0x14   :  { %s3639_s28 = smov 0   ;;  %s3641_s29 = smov 0  }
  0x15   :  { %s3643_s0 = smov 0   ;;  %s3645_s30 = smov 0  }
  0x16 LB: > { %4819 = sst [smem:[#allocation9_spill]] %s3507_s25  ;;  %s4798_s18 = sadd.s32 4294967295, %s3531_s30   ;;  %s3531_s30 = sphi %s3645_s30, %s33_s30   ;;  %s3527_s0 = sphi %s3643_s0, %s4875_s0   ;;  %s3523_s29 = sphi %s3641_s29, %s4874_s29   ;;  %s3519_s28 = sphi %s3639_s28, %s4873_s28   ;;  %s3515_s27 = sphi %s3637_s27, %s4872_s27   ;;  %s3511_s26 = sphi %s3635_s26, %s4871_s26   ;;  %s3507_s25 = sphi %s3633_s25, %s4870_s25   ;;  %s3503_s24 = sphi %s3631_s24, %s4869_s24  }
  0x17   : > { %4820 = sst [smem:[#allocation10_spill]] %s3511_s26  ;;  %s42_s19 = sadd.s32 1, %s3523_s29 }
  0x18   : > { %4821 = sst [smem:[#allocation11_spill]] %s3523_s29  ;;  %p43_p0 = scmp.ge.s32.totalorder %s42_s19, 4 }
  0x19   : > { %4822 = sst [smem:[#allocation12_spill]] %s3527_s0  ;;  %s45_s1 = sadd.s32 1, %s3527_s0 }
  0x1a   : > { %4823 = sst [smem:[#allocation13_spill]] %s3531_s30  ;;  %s224_s20 = sadd.s32 1, %s3511_s26 }
  0x1b   : > { %p231_p1 = scmp.ne.s32.totalorder %s3511_s26, %s3507_s25  ;;  %s4877_s19 = smov (%p43_p0, %s42_s19), 0 }
  0x1c   : > { %4824 = sst [smem:[#allocation14_spill]] %s4877_s19  ;;  %s4879_s1 = smov (!%p43_p0, %s45_s1), %s3527_s0 }
  0x1d   : > { %s221_s21 = ssub.s32 %s3523_s29, %s4877_s19  ;;  %p232_p2 = scmp.eq.s32.totalorder %s3531_s30, 0 }
  0x1e   : > { %p47_p3 = scmp.ge.s32.totalorder %s4879_s1, 2  ;;  %p222_p4 = scmp.eq.s32.totalorder %s221_s21, 0 }
  0x1f   : > { %p233_p5 = por %p232_p2, %p231_p1  ;;  %p237_p6 = scmp.ne.s32.totalorder %s3507_s25, %s3503_s24 }
  0x20   : > { %s4881_s1 = smov (%p47_p3, %s4879_s1), 0  ;;  %p238_p7 = scmp.eq.s32.totalorder %s4798_s18, 0 }
  0x21   : > { %4825 = sst [smem:[#allocation15_spill]] %s4881_s1  ;;  %p3180_p8 = scmp.lt.s32.totalorder %s3531_s30, 8 }
  0x22   : > { %s3685_s22 = scalar_select %p222_p4, %s3511_s26, %s224_s20  }
  0x23   : > { %s3691_s23 = sand.u32 1, %s3511_s26   ;;  %p3693_p9 = por %p238_p7, %p237_p6 }
  0x24   : > { %4826 = sst [smem:[#allocation16_spill]] %s3685_s22  ;;  %s598_s19 = sand.u32 1, %s3531_s30  }
  0x25   : > { %p3698_p10 = pnand %p3180_p8, %p233_p5  ;;  %s3054_s24 = sshll.u32 %s3691_s23, 9 }
  0x26   : > { %s3141_s21 = sshll.u32 %s3523_s29, 9  ;;  %s4829_s11 = sld [smem:[#allocation25_spill]] }
  0x27   : > { %s602_s22 = scalar_lea.vmem [#allocation4], %s3054_s24  ;;  %s3707_s2 = scalar_lea.sflag [#allocation5], %s598_s19 }
  0x28   : > { %s610_s26 = sshll.u32 %s602_s22, 4  ;;  %s3533_s17 = smov 512   ;;  %s611_s26 = int_to_ptr.vmem [resolvable:$true] %s610_s26 }
  0x29   : > { %s3534_s12 = smov 32   ;;  %s4830_s13 = sld [smem:[#allocation27_spill]] }
  0x2a   : > { %s631_s20 = scalar_lea.vmem [#allocation6], %s3054_s24  ;;  %p3060_p11 = scmp.ge.s32.totalorder %s3531_s30, 1 }
  0x2b   : > { %p653_p12 = scmp.lt.s32.totalorder %s3531_s30, 9  ;;  %s4832_s7 = sld [smem:[#allocation22_spill]] }
  0x2c   : > { %s607_s18 = scalar_lea.hbm %s4829_s11, %s3141_s21  ;;  %s639_s11 = sshll.u32 %s631_s20, 4  ;;  %s640_s11 = int_to_ptr.vmem [resolvable:$true] %s639_s11 }
  0x2d   : > { %s608_s15 = sshll.u32 %s607_s18, 4  ;;  %p3717_p13 = pnand %p3060_p11, %p653_p12  ;;  %s609_s15 = int_to_ptr.hbm [resolvable:$true] %s608_s15 }
  0x2e   : > { %3176 = dma.hbm_to_vmem [thread:$0]  (!%p3698_p10), %s609_s15, 8192, %s611_s26, %s3707_s2, %s3533_s17, %s3533_s17, %s3534_s12  }
  0x2f   : > { %s636_s1 = scalar_lea.hbm %s4830_s13, %s3141_s21  ;;  %s3051_s12 = sshll.u32 %s3691_s23, 7 }
  0x30   : > { %s637_s22 = sshll.u32 %s636_s1, 4  ;;  %s3140_s15 = sshll.u32 %s3523_s29, 7  ;;  %s638_s22 = int_to_ptr.hbm [resolvable:$true] %s637_s22 }
  0x31   : > { %s567_s14 = scalar_lea.hbm %s4832_s7, %s3140_s15  ;;  %s562_s26 = scalar_lea.vmem [#allocation2], %s3051_s12 }
  0x32   : > { %s570_s19 = sshll.u32 %s562_s26, 4  ;;  %s568_s24 = sshll.u32 %s567_s14, 4  ;;  %s571_s19 = int_to_ptr.vmem [resolvable:$true] %s570_s19  ;;  %s569_s24 = int_to_ptr.hbm [resolvable:$true] %s568_s24 }
  0x33   : > { %s559_s21 = scalar_lea.sflag [#allocation3], %s3691_s23  ;;  %s3535_s1 = smov 128  }
  0x34   : > { %s3536_s20 = smov 8   ;;  %657 = sbr.rel (%p3717_p13) target bundleno = 2852 (0xb24), region = 88 }
  0x35   : > { %3173 = dma.hbm_to_vmem [thread:$0]  (!%p3698_p10), %s569_s24, 2048, %s571_s19, %s559_s21, %s3535_s1, %s3535_s1, %s3536_s20  }
  0x36   : > { %3179 = dma.hbm_to_vmem [thread:$0]  (!%p3698_p10), %s638_s22, 8192, %s640_s11, %s3707_s2, %s3535_s1, %s3535_s1, %s3536_s20  }
  0x39   : > { %s3735_s13 = sand.u32 1, %s3507_s25  }
  0x3a   : > { %s3061_s12 = sshll.u32 %s3735_s13, 7  ;;  %s660_s15 = scalar_lea.sflag [#allocation3], %s3735_s13 }
  0x3b   : > { %s3739_s17 = scalar_lea.vmem [#allocation2], %s3061_s12 }
  0x3c   : > { %3494 = dma.done.wait (%p3693_p9), %s660_s15, 2048  }
  0x3d   : > { %3496 = vsyncadd (%p3693_p9), %s660_s15, 4294965248  ;;  %s4833_s2 = sadd.s32 4294967295, %s3531_s30   ;;  %s3062_s0 = sshll.u32 %s3735_s13, 9 }
  0x3e   : > { %s669_s11 = sand.u32 1, %s4833_s2   ;;  %s3748_s22 = scalar_lea.vmem [#allocation4], %s3062_s0 }
  0x3f   : > { %s670_s23 = scalar_lea.sflag [#allocation5], %s669_s11  ;;  %4834 = sst [smem:[#allocation17_spill]] %s3748_s22 }
  0x40   : > { %3498 = dma.done.wait (%p3693_p9), %s670_s23, 16384  }
  0x41   : > { %3500 = vsyncadd (%p3693_p9), %s670_s23, 4294950912  ;;  %p781_p0 = scmp.lt.s32.totalorder %s3519_s28, 1  ;;  %p786_p1 = scmp.lt.s32.totalorder %s3515_s27, 3 }
  0x42   : > { %s4835_s20 = sld [smem:[#allocation18_spill]]  ;;  %p3068_p2 = scmp.ne.s32.totalorder %s3515_s27, 0 }
  0x43   : > { %s4883_s28 = smov (!%p781_p0, %s3519_s28), 1  ;;  %s4837_s5 = sld [smem:[#allocation21_spill]] }
  0x44   : > { %s3758_s18 = scalar_select %p786_p1, %s3515_s27, 3 }
  0x45   : > { %s3161_s13 = smul.u32 24, %s4883_s28  ;;  %s4838_s25 = sld [smem:[#allocation24_spill]] }
  0x46   : > { %s3162_s15 = smul.u32 384, %s3758_s18  ;;  %s3066_s11 = sshll.u32 %s3758_s18, 2 }
  0x47   : > { %s3163_s2 = smul.u32 3, %s3758_s18  ;;  %s4839_s22 = sld [smem:[#allocation28_spill]] }
  0x48   : > { %s3771_s12 = scalar_lea.vmem %s4835_s20, %s3161_s13  ;;  %s4841_s26 = sld [smem:[#allocation31_spill]] }
  0x49   : > { %s3782_s16 = scalar_lea.vmem %s4837_s5, %s3162_s15  ;;  %s3791_s21 = scalar_lea.vmem %s4783_s6, %s3163_s2 }
  0x4a   : > { %s4840_s5 = sld [smem:[#allocation26_spill]]  ;;  %s3812_s2 = scalar_lea.vmem [#allocation6], %s3062_s0 }
  0x4b   : > { %s809_s30 = scalar_lea.vmem %s4838_s25, %s3758_s18  ;;  %s4842_s1 = sld [smem:[#allocation19_spill]] (!%p3068_p2) }
  0x4c   : > { %825 = sbr.rel (%p3068_p2) target bundleno = 228 (0xe4), region = 104  ;;  %s4843_s10 = sld [smem:[#allocation20_spill]] (!%p3068_p2) }
  0x4d   : > { %s816_s29 = scalar_lea.vmem %s4839_s22, %s3758_s18 }
  0x4e   : > { %s3810_s24 = scalar_lea.vmem %s4841_s26, %s3161_s13 }
  0x50   : > { %s3805_s8 = scalar_lea.vmem %s4840_s5, %s3066_s11 }
  0x51   : > { %v834_v0 = vld [vmem:[%s4842_s1 + $0x28] sm:$0xff]  ;;  %v833_v1 = vld [vmem:[%s4842_s1 + $0x20] sm:$0xff]  ;;  %v832_v2 = vld [vmem:[%s4842_s1 + $0x18] sm:$0xff]  ;;  %vm838_vm0 = vcmask 392192  }
  0x52   : > { %3144 = vmatpush.msra.mxu2 %v834_v0  ;;  %858 = vmatpush.msra.mxu0 %v834_v0  ;;  %v831_v3 = vld [vmem:[%s4842_s1 + $0x10] sm:$0xff]  ;;  %v830_v4 = vld [vmem:[%s4842_s1 + $0x8] sm:$0xff]  ;;  %v829_v5 = vld [vmem:[%s4842_s1] sm:$0xff] }
  0x53   : > { %3143 = vmatpush.msra.mxu1 %v834_v0  ;;  %v828_v6 = vld [vmem:[%s3771_s12 + $0x10] sm:$0x1]  ;;  %v826_v7 = vld [vmem:[%s3771_s12] sm:$0xff]  ;;  %v827_v8 = vld [vmem:[%s3771_s12 + $0x8] sm:$0xff] }
  0x54   : > { %3146 = vmatpush.msra.mxu2 %v833_v1  ;;  %859 = vmatpush.msra.mxu0 %v833_v1  ;;  %v835_v9 = vld [vmem:[%s4843_s10] sm:$0xff]  ;;  %v836_v10 = vld [vmem:[%s4843_s10 + $0x8] sm:$0xff]  ;;  %v837_v15 = vld [vmem:[%s4843_s10 + $0x10] sm:$0x1] }
  0x55   : > { %3145 = vmatpush.msra.mxu1 %v833_v1 }
  0x56   : > { %3148 = vmatpush.msra.mxu2 %v832_v2  ;;  %860 = vmatpush.msra.mxu0 %v832_v2 }
  0x57   : > { %3147 = vmatpush.msra.mxu1 %v832_v2 }
  0x58   : > { %3150 = vmatpush.msra.mxu2 %v831_v3  ;;  %861 = vmatpush.msra.mxu0 %v831_v3 }
  0x59   : > { %3149 = vmatpush.msra.mxu1 %v831_v3 }
  0x5a   : > { %3152 = vmatpush.msra.mxu2 %v830_v4  ;;  %862 = vmatpush.msra.mxu0 %v830_v4 }
  0x5b   : > { %3151 = vmatpush.msra.mxu1 %v830_v4 }
  0x5c   : > { %3154 = vmatpush.msra.mxu2 %v829_v5  ;;  %863 = vmatpush.msra.mxu0 %v829_v5 }
  0x5d   : > { %3071 = vmatmul.msk.f32.vlgmr.msra.gmra.mxu2 %vm838_vm0, %v828_v6  ;;  %3153 = vmatpush.msra.mxu1 %v829_v5 }
  0x5e   : > { %3069 = vmatmul.msk.f32.vlgmr.msra.gmra.mxu0 %vm838_vm0, %v826_v7  ;;  %3070 = vmatmul.msk.f32.vlgmr.msra.gmra.mxu1 %vm838_vm0, %v827_v8 }
  0xdb   : > { %v865_v11 = vpop.f32.mrf.mxu0  ;;  %v868_v12 = vpop.f32.mrf.mxu1 }
  0xdc   : > { %v866_v13 = vadd.f32 %v865_v11, %v835_v9  ;;  %v869_v14 = vadd.f32 %v868_v12, %v836_v10 }
  0xde   : > { %874 = vst [vmem:[%s3810_s24] sm:$0xff] %v866_v13 }
  0xdf   : > { %875 = vst [vmem:[%s3810_s24 + $0x8] sm:$0xff] %v869_v14 }
  0xe0   : > { %v871_v16 = vpop.f32.mrf.mxu2 }
  0xe1   : > { %v872_v17 = vadd.f32 %v871_v16, %v837_v15 }
  0xe3   : > { %876 = vst [vmem:[%s3810_s24 + $0x10] sm:$0x1] %v872_v17 }
  0xe4 PF: > { %vm886_vm1 = vcmask 1040384   ;;  %v3537_v22 = vmov 128.0   ;;  %v1009_v27 = vld [vmem:[%s3782_s16 + $0x168] sm:$0xff]  ;;  %v1010_v28 = vld [vmem:[%s3782_s16 + $0x170] sm:$0xff]  ;;  %v1011_v29 = vld [vmem:[%s3782_s16 + $0x178] sm:$0xff]  ;;  %s4844_s5 = scalar_lea.vmem %s4780_s3, %s3758_s18  ;;  %s4845_s13 = scalar_lea.vmem %s4781_s4, %s3758_s18  ;;  %vm1101_vm12 = vcmask 261120  }
  0xe5   : > { %v877_v18 = vld [vmem:[%s3810_s24] sm:$0xff]  ;;  %3274 = vrcp.f32 %v3537_v22  ;;  %1020 = vmatpush.msra.mxu0 %v1009_v27  ;;  %1046 = vmatpush.msra.mxu1 %v1010_v28  ;;  %v1006_v30 = vld [vmem:[%s3782_s16 + $0x150] sm:$0xff]  ;;  %v1007_v31 = vld [vmem:[%s3782_s16 + $0x158] sm:$0xff]  ;;  %s3538_s26 = smov 96   ;;  %vm1146_vm13 = vcmask 138240   ;;  %vm1153_vm14 = vcmask 131072   ;;  %s4849_s12 = scalar_lea.vmem %s4786_s9, %s3758_s18 }
  0xe6   : > { %882 = vadd.xlane.f32.xlu0 %v877_v18  ;;  %v878_v21 = vld [vmem:[%s3810_s24 + $0x8] sm:$0xff]  ;;  %v1008_v32 = vld [vmem:[%s3782_s16 + $0x160] sm:$0xff]  ;;  %1072 = vmatpush.msra.mxu2 %v1011_v29  ;;  %v1003_v48 = vld [vmem:[%s3782_s16 + $0x138] sm:$0xff]  ;;  %s3540_s11 = smov 32   ;;  %s4846_s15 = sld [smem:[#allocation23_spill]] }
  0xe7   : > { %1021 = vmatpush.msra.mxu0 %v1006_v30  ;;  %1047 = vmatpush.msra.mxu1 %v1007_v31  ;;  %v1004_v49 = vld [vmem:[%s3782_s16 + $0x140] sm:$0xff]  ;;  %v1005_v50 = vld [vmem:[%s3782_s16 + $0x148] sm:$0xff]  ;;  %v1002_v53 = vld [vmem:[%s3782_s16 + $0x130] sm:$0xff]  ;;  %s4848_s14 = sld [smem:[#allocation17_spill]]  ;;  %p3136_p3 = scmp.ge.s32.totalorder %s3515_s27, 3 }
  0xe8   : > { %1073 = vmatpush.msra.mxu2 %v1008_v32  ;;  %v1000_v51 = vld [vmem:[%s3782_s16 + $0x120] sm:$0xff]  ;;  %v1001_v52 = vld [vmem:[%s3782_s16 + $0x128] sm:$0xff]  ;;  %v998_v55 = vld [vmem:[%s3782_s16 + $0x110] sm:$0xff] }
  0xe9   : > { %1022 = vmatpush.msra.mxu0 %v1003_v48  ;;  %1048 = vmatpush.msra.mxu1 %v1004_v49  ;;  %v997_v54 = vld [vmem:[%s3782_s16 + $0x108] sm:$0xff]  ;;  %v999_v56 = vld [vmem:[%s3782_s16 + $0x118] sm:$0xff]  ;;  %v994_v57 = vld [vmem:[%s3782_s16 + $0xf0] sm:$0xff] }
  0xea   : > { %v879_v19 = vld [vmem:[%s3810_s24 + $0x10] sm:$0x1]  ;;  %1074 = vmatpush.msra.mxu2 %v1005_v50  ;;  %v995_v58 = vld [vmem:[%s3782_s16 + $0xf8] sm:$0xff]  ;;  %v996_v59 = vld [vmem:[%s3782_s16 + $0x100] sm:$0xff] }
  0xeb   : > { %v887_v20 = vsel %vm886_vm1, %v879_v19, 0.0  ;;  %v3275_v23 = vpop.eup %3274  ;;  %1023 = vmatpush.msra.mxu0 %v1000_v51  ;;  %1049 = vmatpush.msra.mxu1 %v1001_v52  ;;  %v991_v60 = vld [vmem:[%s3782_s16 + $0xd8] sm:$0xff]  ;;  %v992_v61 = vld [vmem:[%s3782_s16 + $0xe0] sm:$0xff]  ;;  %v993_v62 = vld [vmem:[%s3782_s16 + $0xe8] sm:$0xff] }
  0xec   : > { %888 = vadd.xlane.f32.xlu1 %v887_v20  ;;  %v891_v24 = vmul.f32 128.0, %v3275_v23  ;;  %vm895_vm2 = vweird.f32 %v3275_v23  ;;  %1075 = vmatpush.msra.mxu2 %v1002_v53  ;;  %v988_v63 = vld [vmem:[%s3782_s16 + $0xc0] sm:$0xff]  ;;  %v989_v0 = vld [vmem:[%s3782_s16 + $0xc8] sm:$0xff]  ;;  %v990_v1 = vld [vmem:[%s3782_s16 + $0xd0] sm:$0xff]  ;;  %s4847_s28 = scalar_lea.vmem %s4846_s15, %s3758_s18 }
  0xed   : > { %1024 = vmatpush.msra.mxu0 %v997_v54  ;;  %1050 = vmatpush.msra.mxu1 %v998_v55  ;;  %v985_v2 = vld [vmem:[%s3782_s16 + $0xa8] sm:$0xff]  ;;  %v986_v3 = vld [vmem:[%s3782_s16 + $0xb0] sm:$0xff]  ;;  %v987_v4 = vld [vmem:[%s3782_s16 + $0xb8] sm:$0xff] }
  0xee   : > { %884 = vadd.xlane.f32.xlu0 %v878_v21  ;;  %v892_v25 = vsub.f32 1.0, %v891_v24  ;;  %1076 = vmatpush.msra.mxu2 %v999_v56  ;;  %v982_v5 = vld [vmem:[%s3782_s16 + $0x90] sm:$0xff]  ;;  %v983_v6 = vld [vmem:[%s3782_s16 + $0x98] sm:$0xff]  ;;  %v984_v7 = vld [vmem:[%s3782_s16 + $0xa0] sm:$0xff] }
  0xef   : > { %1025 = vmatpush.msra.mxu0 %v994_v57  ;;  %1051 = vmatpush.msra.mxu1 %v995_v58  ;;  %v979_v8 = vld [vmem:[%s3782_s16 + $0x78] sm:$0xff]  ;;  %v980_v9 = vld [vmem:[%s3782_s16 + $0x80] sm:$0xff]  ;;  %v981_v10 = vld [vmem:[%s3782_s16 + $0x88] sm:$0xff] }
  0xf0   : > { %v893_v26 = vmul.f32 %v3275_v23, %v892_v25  ;;  %1077 = vmatpush.msra.mxu2 %v996_v59  ;;  %v976_v11 = vld [vmem:[%s3782_s16 + $0x60] sm:$0xff]  ;;  %v977_v12 = vld [vmem:[%s3782_s16 + $0x68] sm:$0xff]  ;;  %v978_v13 = vld [vmem:[%s3782_s16 + $0x70] sm:$0xff] }
  0xf1   : > { %1026 = vmatpush.msra.mxu0 %v991_v60  ;;  %1052 = vmatpush.msra.mxu1 %v992_v61  ;;  %v973_v14 = vld [vmem:[%s3782_s16 + $0x48] sm:$0xff]  ;;  %v974_v15 = vld [vmem:[%s3782_s16 + $0x50] sm:$0xff]  ;;  %v975_v16 = vld [vmem:[%s3782_s16 + $0x58] sm:$0xff] }
  0xf2   : > { %v894_v33 = vadd.f32 %v3275_v23, %v893_v26  ;;  %1078 = vmatpush.msra.mxu2 %v993_v62  ;;  %v970_v17 = vld [vmem:[%s3782_s16 + $0x30] sm:$0xff]  ;;  %v967_v20 = vld [vmem:[%s3782_s16 + $0x18] sm:$0xff]  ;;  %v969_v22 = vld [vmem:[%s3782_s16 + $0x28] sm:$0xff] }
  0xf3   : > { %1027 = vmatpush.msra.mxu0 %v988_v63  ;;  %1053 = vmatpush.msra.mxu1 %v989_v0  ;;  %v965_v24 = vld [vmem:[%s3782_s16 + $0x8] sm:$0xff]  ;;  %v966_v25 = vld [vmem:[%s3782_s16 + $0x10] sm:$0xff]  ;;  %v3269_v51 = vld [vmem:[%s4845_s13] ss:$0 sm:$0xff] }
  0xf4   : > { %v3858_v34 = vsel %vm895_vm2, %v3275_v23, %v894_v33  ;;  %1079 = vmatpush.msra.mxu2 %v990_v1  ;;  %v964_v23 = vld [vmem:[%s3782_s16] sm:$0xff] }
  0xf5   : > { %1028 = vmatpush.msra.mxu0 %v985_v2  ;;  %1054 = vmatpush.msra.mxu1 %v986_v3 }
  0xf6   : > { %1080 = vmatpush.msra.mxu2 %v987_v4 }
  0xf7   : > { %1029 = vmatpush.msra.mxu0 %v982_v5  ;;  %1055 = vmatpush.msra.mxu1 %v983_v6 }
  0xf8   : > { %1081 = vmatpush.msra.mxu2 %v984_v7 }
  0xf9   : > { %1030 = vmatpush.msra.mxu0 %v979_v8  ;;  %1056 = vmatpush.msra.mxu1 %v980_v9 }
  0xfa   : > { %1082 = vmatpush.msra.mxu2 %v981_v10 }
  0xfb   : > { %1031 = vmatpush.msra.mxu0 %v976_v11  ;;  %1057 = vmatpush.msra.mxu1 %v977_v12 }
  0xfc   : > { %1083 = vmatpush.msra.mxu2 %v978_v13 }
  0xfd   : > { %1032 = vmatpush.msra.mxu0 %v973_v14  ;;  %1058 = vmatpush.msra.mxu1 %v974_v15 }
  0xfe   : > { %1084 = vmatpush.msra.mxu2 %v975_v16 }
  0xff   : > { %1033 = vmatpush.msra.mxu0 %v970_v17 }
 0x101   : > { %1034 = vmatpush.msra.mxu0 %v967_v20 }
 0x103   : > { %1035 = vmatpush.msra.mxu0 %v964_v23 }
 0x159   : > { %v883_v35 = vpop.xlane.xlu0 %882 }
 0x15a   : > { %v897_v36 = vmul.f32 %v3858_v34, %v883_v35 }
 0x15c   : > { %v3861_v37 = vsub.f32 %v877_v18, %v897_v36  ;;  %v971_v18 = vld [vmem:[%s3782_s16 + $0x38] sm:$0xff] }
 0x15d   : > { %1059 = vmatpush.msra.mxu1 %v971_v18 }
 0x15e   : > { %v903_v38 = vmul.f32 %v3861_v37, %v3861_v37 }
 0x15f   : > { %v889_v39 = vpop.xlane.xlu1 %888 }
 0x160   : > { %906 = vadd.xlane.f32.xlu1 %v903_v38  ;;  %v899_v41 = vmul.f32 %v3858_v34, %v889_v39 }
 0x161   : > { %v885_v40 = vpop.xlane.xlu0 %884 }
 0x162   : > { %v898_v42 = vmul.f32 %v3858_v34, %v885_v40  ;;  %v3869_v44 = vsub.f32 %v879_v19, %v899_v41  ;;  %v972_v19 = vld [vmem:[%s3782_s16 + $0x40] sm:$0xff] }
 0x163   : > { %1085 = vmatpush.msra.mxu2 %v972_v19 }
 0x164   : > { %v3867_v43 = vsub.f32 %v878_v21, %v898_v42  ;;  %v905_v46 = vmul.f32 %v3869_v44, %v3869_v44  ;;  %v968_v21 = vld [vmem:[%s3782_s16 + $0x20] sm:$0xff] }
 0x165   : > { %1060 = vmatpush.msra.mxu1 %v968_v21  ;;  %1086 = vmatpush.msra.mxu2 %v969_v22 }
 0x166   : > { %v904_v45 = vmul.f32 %v3867_v43, %v3867_v43  ;;  %v910_v47 = vsel %vm886_vm1, %v905_v46, 0.0 }
 0x167   : > { %1061 = vmatpush.msra.mxu1 %v965_v24  ;;  %1087 = vmatpush.msra.mxu2 %v966_v25 }
 0x168   : > { %908 = vadd.xlane.f32.xlu2 %v904_v45 }
 0x170   : > { %911 = vadd.xlane.f32.xlu2 %v910_v47  ;;  %v3268_v47 = vld [vmem:[%s4844_s5] ss:$0 sm:$0xff] }
 0x1d3   : > { %v907_v26 = vpop.xlane.xlu1 %906 }
 0x1d4   : > { %v913_v27 = vmul.f32 %v907_v26, %v3858_v34 }
 0x1d6   : > { %v916_v28 = vadd.f32 1e-06, %v913_v27 }
 0x1d8   : > { %3276 = vrsqrt.f32 %v916_v28  ;;  %vm925_vm4 = vweird.f32 %v916_v28 }
 0x1db   : > { %v909_v29 = vpop.xlane.xlu2 %908 }
 0x1dc   : > { %v914_v30 = vmul.f32 %v909_v29, %v3858_v34 }
 0x1de   : > { %v3277_v31 = vpop.eup %3276  ;;  %v917_v32 = vadd.f32 1e-06, %v914_v30 }
 0x1df   : > { %v920_v33 = vmul.f32 %v3277_v31, %v916_v28  ;;  %vm926_vm3 = vweird.f32 %v3277_v31 }
 0x1e0   : > { %3278 = vrsqrt.f32 %v917_v32  ;;  %vm927_vm5 = vmor %vm925_vm4, %vm926_vm3  ;;  %vm935_vm7 = vweird.f32 %v917_v32 }
 0x1e1   : > { %v921_v35 = vmul.f32 %v3277_v31, %v920_v33 }
 0x1e3   : > { %v922_v36 = vmul.f32 0.5, %v921_v35  ;;  %v912_v38 = vpop.xlane.xlu2 %911 }
 0x1e4   : > { %v915_v39 = vmul.f32 %v912_v38, %v3858_v34 }
 0x1e5   : > { %v923_v40 = vsub.f32 1.5, %v922_v36 }
 0x1e6   : > { %v3279_v41 = vpop.eup %3278  ;;  %v918_v42 = vadd.f32 1e-06, %v915_v39 }
 0x1e7   : > { %v924_v45 = vmul.f32 %v3277_v31, %v923_v40  ;;  %v930_v46 = vmul.f32 %v3279_v41, %v917_v32  ;;  %vm936_vm6 = vweird.f32 %v3279_v41 }
 0x1e8   : > { %3280 = vrsqrt.f32 %v918_v42  ;;  %vm937_vm8 = vmor %vm935_vm7, %vm936_vm6  ;;  %vm945_vm10 = vweird.f32 %v918_v42 }
 0x1e9   : > { %v928_v48 = vsel %vm927_vm5, %v3277_v31, %v924_v45  ;;  %v931_v49 = vmul.f32 %v3279_v41, %v930_v46 }
 0x1ea   : > { %v949_v50 = vmul.f32 %v928_v48, %v3861_v37 }
 0x1eb   : > { %v932_v52 = vmul.f32 0.5, %v931_v49 }
 0x1ec   : > { %v955_v53 = vmul.f32 %v3268_v47, %v949_v50 }
 0x1ed   : > { %v933_v54 = vsub.f32 1.5, %v932_v52 }
 0x1ee   : > { %v3281_v55 = vpop.eup %3280  ;;  %v961_v56 = vadd.f32 %v3269_v51, %v955_v53 }
 0x1ef   : > { %v934_v57 = vmul.f32 %v3279_v41, %v933_v54  ;;  %v940_v58 = vmul.f32 %v3281_v55, %v918_v42  ;;  %vm946_vm9 = vweird.f32 %v3281_v55 }
 0x1f0   : > { %1036 = vmatmul.f32.vlgmr.msra.gmra.mxu0 %v961_v56  ;;  %1062 = vmatmul.f32.vlgmr.msra.gmra.mxu1 %v961_v56  ;;  %vm947_vm11 = vmor %vm945_vm10, %vm946_vm9 }
 0x1f1   : > { %v938_v59 = vsel %vm937_vm8, %v3279_v41, %v934_v57  ;;  %v941_v60 = vmul.f32 %v3281_v55, %v940_v58  ;;  %1088 = vmatmul.f32.vlgmr.msra.gmra.mxu2 %v961_v56 }
 0x1f2   : > { %v950_v37 = vmul.f32 %v938_v59, %v3867_v43  ;;  %v1012_v43 = vld [vmem:[%s3791_s21] sm:$0x7]  ;;  %s3539_s21 = smov 64  }
 0x1f3   : > { %v942_v61 = vmul.f32 0.5, %v941_v60  ;;  %v1015_v6 = vperm.slane %v1012_v43, 1  ;;  %v1014_v21 = vperm.slane %v1012_v43, 0 }
 0x1f4   : > { %v956_v62 = vmul.f32 %v3268_v47, %v950_v37 }
 0x1f5   : > { %v943_v63 = vsub.f32 1.5, %v942_v61 }
 0x1f6   : > { %v962_v0 = vadd.f32 %v3269_v51, %v956_v62 }
 0x1f7   : > { %v944_v1 = vmul.f32 %v3281_v55, %v943_v63 }
 0x1f8   : > { %1039 = vmatmul.f32.gmra.mxu0 %v962_v0  ;;  %1065 = vmatmul.f32.gmra.mxu1 %v962_v0 }
 0x1f9   : > { %v948_v2 = vsel %vm947_vm11, %v3281_v55, %v944_v1  ;;  %1091 = vmatmul.f32.gmra.mxu2 %v962_v0 }
 0x1fa   : > { %v951_v3 = vmul.f32 %v948_v2, %v3869_v44  ;;  %v1016_v44 = vperm.slane %v1012_v43, 2 }
 0x1fc   : > { %v957_v4 = vmul.f32 %v3268_v47, %v951_v3 }
 0x1fe   : > { %v963_v5 = vadd.f32 %v3269_v51, %v957_v4 }
 0x200   : > { %1042 = vmatmul.f32.gmra.mxu0 %v963_v5  ;;  %1068 = vmatmul.f32.gmra.mxu1 %v963_v5 }
 0x201   : > { %1094 = vmatmul.f32.gmra.mxu2 %v963_v5 }
 0x26d   : > { %v1037_v7 = vpop.f32.mrf.mxu0  ;;  %v1063_v8 = vpop.f32.mrf.mxu1 }
 0x26e   : > { %v3935_v9 = vadd.f32 %v1063_v8, %v1015_v6  ;;  %v1038_v24 = vadd.f32 %v1037_v7, %v1014_v21 }
 0x270   : > { %1229 = vrot.lane.b32.xlu2 %v3935_v9, %s3538_s26  ;;  %v3961_v27 = vmul.f32 0.17677669, %v1038_v24  ;;  %v1220_v24 = vld [vmem:[%s3739_s17 + $0x8] sm:$0xff] }
 0x274   : > { %v1089_v10 = vpop.f32.mrf.mxu2 }
 0x275   : > { %v1040_v11 = vpop.f32.mrf.mxu0  ;;  %v1066_v12 = vpop.f32.mrf.mxu1  ;;  %v1090_v15 = vadd.f32 %v1089_v10, %v1016_v44 }
 0x276   : > { %v3939_v13 = vadd.f32 %v1066_v12, %v1015_v6  ;;  %v1041_v28 = vadd.f32 %v1040_v11, %v1014_v21 }
 0x278   : > { %1231 = vrot.lane.b32.xlu1 %v3939_v13, %s3538_s26  ;;  %v3967_v29 = vmul.f32 0.17677669, %v1041_v28 }
 0x27c   : > { %v1092_v14 = vpop.f32.mrf.mxu2 }
 0x27d   : > { %v1093_v16 = vadd.f32 %v1092_v14, %v1016_v44  ;;  %v1069_v17 = vpop.f32.mrf.mxu1  ;;  %v1043_v19 = vpop.f32.mrf.mxu0 }
 0x27e   : > { %v3943_v18 = vadd.f32 %v1069_v17, %v1015_v6  ;;  %v1044_v22 = vadd.f32 %v1043_v19, %v1014_v21 }
 0x27f   : > { %v3945_v20 = vpack.i.bf16 %v1090_v15, %v1093_v16 }
 0x280   : > { %1233 = vrot.lane.b32.xlu0 %v3943_v18, %s3538_s26  ;;  %3072 = vmatpush.xpose.msk.msra.mxu3 %vm1101_vm12, %v3943_v18  ;;  %v3953_v25 = vmul.f32 0.17677669, %v1044_v22  ;;  %v1222_v22 = vld [vmem:[%s3739_s17 + $0x18] sm:$0xff] }
 0x284   : > { %v1095_v23 = vpop.f32.mrf.mxu2  ;;  %3073 = vmatpush.xpose.msk.msra.mxu3 %vm1101_vm12, %v3939_v13 }
 0x285   : > { %v3955_v26 = vadd.f32 %v1095_v23, %v1016_v44  ;;  %v1221_v23 = vld [vmem:[%s3739_s17 + $0x10] sm:$0xff] }
 0x288   : > { %3074 = vmatpush.xpose.msk.msra.mxu3 %vm1101_vm12, %v3935_v9  ;;  %1227 = vrot.lane.b32.xlu0 %v3953_v25, %s3538_s26 }
 0x28b   : > { %3075 = vmatmul.msk.f32.vlgmr.msra.gmra.mxu3 %vm1101_vm12, %v3961_v27 }
 0x28c   : > { %3078 = vmatpush.msk.msrb.mxu3 %vm886_vm1, %v3955_v26 }
 0x28e   : > { %1207 = vmatpush.msrb.mxu3 %v1093_v16 }
 0x290   : > { %1208 = vmatpush.msrb.mxu3 %v1090_v15 }
 0x293   : > { %3076 = vmatmul.msk.f32.gmra.mxu3 %vm1101_vm12, %v3967_v29 }
 0x29b   : > { %3077 = vmatmul.msk.f32.gmra.mxu3 %vm1101_vm12, %v3953_v25 }
 0x2ca   : > { %v1230_v32 = vpop.permute.xlu2 %1229 }
 0x2ea   : > { %v1232_v31 = vpop.permute.xlu1 %1231 }
 0x2f2   : > { %v1234_v30 = vpop.permute.xlu0 %1233 }
 0x2f3   : > { %3082 = vmatpush.xpose.msk.msrb.mxu0 %vm1101_vm12, %v1234_v30  ;;  %3155 = vmatpush.xpose.msk.msrb.mxu2 %vm1101_vm12, %v1234_v30 }
 0x2f7   : > { %3083 = vmatpush.xpose.msk.msrb.mxu0 %vm1101_vm12, %v1232_v31  ;;  %3156 = vmatpush.xpose.msk.msrb.mxu2 %vm1101_vm12, %v1232_v31 }
 0x2fa   : > { %v1228_v33 = vpop.permute.xlu0 %1227 }
 0x2fb   : > { %3084 = vmatpush.xpose.msk.msrb.mxu0 %vm1101_vm12, %v1230_v32  ;;  %3157 = vmatpush.xpose.msk.msrb.mxu2 %vm1101_vm12, %v1230_v32 }
 0x2fe   : > { %3087 = vmatmul.msk.f32.vlgmr.msrb.gmra.mxu2 %vm1101_vm12, %v1228_v33 }
 0x30e   : > { %v1137_v35 = vpop.f32.mrf.mxu3 }
 0x30f   : > { %v1147_v36 = vsel %vm1146_vm13, %v1137_v35, -inf }
 0x310   : > { %1148 = vmax.xlane.f32.xlu2 %v1147_v36 }
 0x316   : > { %v1140_v38 = vpop.f32.mrf.mxu3 }
 0x317   : > { %v1150_v39 = vsel %vm1146_vm13, %v1140_v38, -inf }
 0x318   : > { %1151 = vmax.xlane.f32.xlu1 %v1150_v39 }
 0x31e   : > { %v1143_v40 = vpop.f32.mrf.mxu3 }
 0x31f   : > { %v1154_v41 = vsel %vm1153_vm14, %v1143_v40, -inf }
 0x320   : > { %1155 = vmax.xlane.f32.xlu0 %v1154_v41 }
 0x381   : > { %v1270_v53 = vpop.f32.mrf.mxu2 }
 0x382   : > { %v1279_v58 = vsel %vm1153_vm14, %v1270_v53, -inf }
 0x383   : > { %v1149_v42 = vpop.xlane.xlu2 %1148 }
 0x384   : > { %v1157_v45 = vsub.f32 %v1137_v35, %v1149_v42 }
 0x386   : > { %v1160_v46 = vmul.f32 1.442695, %v1157_v45 }
 0x388   : > { %3282 = vpow2.f32 %v1160_v46 }
 0x38b   : > { %v1152_v47 = vpop.xlane.xlu1 %1151 }
 0x38c   : > { %v1158_v48 = vsub.f32 %v1140_v38, %v1152_v47 }
 0x38e   : > { %v3283_v49 = vpop.eup %3282  ;;  %v1162_v50 = vmul.f32 1.442695, %v1158_v48 }
 0x38f   : > { %v1166_v51 = vsel %vm1146_vm13, %v3283_v49, 0.0 }
 0x390   : > { %3284 = vpow2.f32 %v1162_v50  ;;  %1167 = vadd.xlane.f32.xlu2 %v1166_v51 }
 0x393   : > { %v1156_v52 = vpop.xlane.xlu0 %1155 }
 0x394   : > { %v1159_v54 = vsub.f32 %v1143_v40, %v1156_v52 }
 0x396   : > { %v3285_v55 = vpop.eup %3284  ;;  %v1164_v56 = vmul.f32 1.442695, %v1159_v54 }
 0x397   : > { %v1169_v57 = vsel %vm1146_vm13, %v3285_v55, 0.0 }
 0x398   : > { %3286 = vpow2.f32 %v1164_v56  ;;  %1170 = vadd.xlane.f32.xlu1 %v1169_v57  ;;  %1280 = vmax.xlane.f32.xlu2 %v1279_v58 }
 0x39e   : > { %v3287_v59 = vpop.eup %3286 }
 0x39f   : > { %v1172_v60 = vsel %vm1153_vm14, %v3287_v59, 0.0 }
 0x3a0   : > { %1173 = vadd.xlane.f32.xlu0 %v1172_v60 }
 0x3b0   : > { %3254 = vrot.lane.b32.xlu2 %v3945_v20, %s3538_s26 }
 0x3b1   : > { %1223 = vrot.lane.b32.xlu1 %v3961_v27, %s3538_s26 }
 0x3b4   : > { %1312 = vrot.lane.b32.xlu0 %v3955_v26, %s3538_s26 }
 0x3b8   : > { %1437 = vrot.lane.b32.xlu2 %v3943_v18, %s3539_s21 }
 0x3b9   : > { %1435 = vrot.lane.b32.xlu1 %v3939_v13, %s3539_s21 }
 0x3bc   : > { %1225 = vrot.lane.b32.xlu0 %v3967_v29, %s3538_s26 }
 0x3c0   : > { %1605 = vrot.lane.b32.xlu2 %v3939_v13, %s3540_s11 }
 0x3c4   : > { %1607 = vrot.lane.b32.xlu0 %v3943_v18, %s3540_s11 }
 0x3c8   : > { %1427 = vrot.lane.b32.xlu2 %v3961_v27, %s3539_s21 }
 0x3cc   : > { %1433 = vrot.lane.b32.xlu0 %v3935_v9, %s3539_s21 }
 0x3d0   : > { %1599 = vrot.lane.b32.xlu2 %v3967_v29, %s3540_s11 }
 0x3d4   : > { %1597 = vrot.lane.b32.xlu0 %v3961_v27, %s3540_s11 }
 0x3dc   : > { %1431 = vrot.lane.b32.xlu0 %v3953_v25, %s3539_s21 }
 0x403   : > { %v1168_v37 = vpop.xlane.xlu2 %1167 }
 0x404   : > { %3288 = vrcp.f32 %v1168_v37 }
 0x40a   : > { %v3289_v61 = vpop.eup %3288 }
 0x40b   : > { %v1171_v62 = vpop.xlane.xlu1 %1170  ;;  %v1281_v63 = vpop.xlane.xlu2 %1280  ;;  %v1178_v0 = vmul.f32 %v3289_v61, %v3283_v49 }
 0x40c   : > { %3290 = vrcp.f32 %v1171_v62  ;;  %v1284_v1 = vsub.f32 %v1270_v53, %v1281_v63 }
 0x40d   : > { %3079 = vmatmul.msk.f32.vlgmr.msrb.gmra.mxu3 %vm1146_vm13, %v1178_v0 }
 0x40e   : > { %v1289_v2 = vmul.f32 1.442695, %v1284_v1 }
 0x410   : > { %3292 = vpow2.f32 %v1289_v2 }
 0x412   : > { %v3291_v3 = vpop.eup %3290 }
 0x413   : > { %v1174_v4 = vpop.xlane.xlu0 %1173  ;;  %v3255_v5 = vpop.permute.xlu2 %3254  ;;  %v1179_v43 = vmul.f32 %v3291_v3, %v3285_v55 }
 0x414   : > { %3294 = vrcp.f32 %v1174_v4  ;;  %v3256_v44 = vunpack.i.l.bf16 %v3255_v5  ;;  %v3257_v14 = vunpack.i.h.bf16 %v3255_v5 }
 0x415   : > { %3080 = vmatmul.msk.f32.gmra.mxu3 %vm1146_vm13, %v1179_v43 }
 0x416   : > { %v3293_v6 = vpop.eup %3292 }
 0x417   : > { %v1297_v7 = vsel %vm1153_vm14, %v3293_v6, 0.0 }
 0x418   : > { %1298 = vadd.xlane.f32.xlu1 %v1297_v7 }
 0x41a   : > { %v3295_v8 = vpop.eup %3294 }
 0x41b   : > { %v1438_v10 = vpop.permute.xlu2 %1437  ;;  %v1180_v11 = vmul.f32 %v3295_v8, %v3287_v59 }
 0x41c   : > { %3098 = vmatpush.xpose.msk.msra.mxu0 %vm1101_vm12, %v1438_v10 }
 0x41d   : > { %3081 = vmatmul.msk.f32.gmra.mxu3 %vm1146_vm13, %v1180_v11 }
 0x423   : > { %v1224_v12 = vpop.permute.xlu1 %1223  ;;  %v1606_v18 = vpop.permute.xlu2 %1605 }
 0x424   : > { %3085 = vmatmul.msk.f32.vlgmr.msrb.gmra.mxu0 %vm1101_vm12, %v1224_v12 }
 0x426   : > { %v1313_v13 = vpop.permute.xlu0 %1312 }
 0x427   : > { %3088 = vmatpush.msk.msrb.mxu1 %vm886_vm1, %v1313_v13  ;;  %3158 = vmatpush.msk.msra.mxu3 %vm886_vm1, %v1313_v13 }
 0x429   : > { %1341 = vmatpush.msrb.mxu1 %v3256_v44  ;;  %3159 = vmatpush.msra.mxu3 %v3256_v44 }
 0x42b   : > { %v1436_v15 = vpop.permute.xlu1 %1435  ;;  %1342 = vmatpush.msrb.mxu1 %v3257_v14  ;;  %3160 = vmatpush.msra.mxu3 %v3257_v14  ;;  %v1428_v21 = vpop.permute.xlu2 %1427 }
 0x42c   : > { %3099 = vmatpush.xpose.msk.msra.mxu0 %vm1101_vm12, %v1436_v15 }
 0x42d   : > { %1413 = vmatpush.msrb.mxu3 %v1222_v22 }
 0x42e   : > { %v1226_v16 = vpop.permute.xlu0 %1225 }
 0x42f   : > { %3086 = vmatmul.msk.f32.gmra.mxu0 %vm1101_vm12, %v1226_v16  ;;  %1414 = vmatpush.msrb.mxu3 %v1221_v23 }
 0x431   : > { %1603 = vrot.lane.b32.xlu1 %v3935_v9, %s3540_s11  ;;  %1415 = vmatpush.msrb.mxu3 %v1220_v24  ;;  %v1219_v9 = vld [vmem:[%s3739_s17] sm:$0xff] }
 0x433   : > { %1416 = vmatpush.msrb.mxu3 %v1219_v9  ;;  %v1600_v42 = vpop.permute.xlu2 %1599 }
 0x436   : > { %v1608_v17 = vpop.permute.xlu0 %1607 }
 0x439   : > { %1429 = vrot.lane.b32.xlu1 %v3967_v29, %s3539_s21 }
 0x43e   : > { %v1434_v19 = vpop.permute.xlu0 %1433 }
 0x43f   : > { %3100 = vmatpush.xpose.msk.msra.mxu0 %vm1101_vm12, %v1434_v19 }
 0x441   : > { %1601 = vrot.lane.b32.xlu1 %v3953_v25, %s3540_s11 }
 0x442   : > { %3101 = vmatmul.msk.f32.vlgmr.msra.gmra.mxu0 %vm1101_vm12, %v1428_v21 }
 0x446   : > { %v1598_v35 = vpop.permute.xlu0 %1597 }
 0x44e   : > { %v1432_v41 = vpop.permute.xlu0 %1431 }
 0x48b   : > { %v1299_v27 = vpop.xlane.xlu1 %1298 }
 0x48c   : > { %3296 = vrcp.f32 %v1299_v27 }
 0x490   : > { %v1210_v30 = vpop.f32.mrf.mxu3 }
 0x492   : > { %v3297_v28 = vpop.eup %3296 }
 0x493   : > { %v1305_v29 = vmul.f32 %v3297_v28, %v3293_v6 }
 0x495   : > { %3091 = vmatmul.msk.f32.vlgmr.msra.gmra.mxu3 %vm1146_vm13, %v1305_v29 }
 0x496   : > { %3111 = vmatpush.xpose.msk.msra.mxu3 %vm1101_vm12, %v1608_v17 }
 0x498   : > { %v1213_v31 = vpop.f32.mrf.mxu3 }
 0x49a   : > { %3112 = vmatpush.xpose.msk.msra.mxu3 %vm1101_vm12, %v1606_v18 }
 0x49d   : > { %3095 = vmatmul.msk.f32.vlgmr.msrb.gmra.mxu3 %vm1101_vm12, %v1210_v30 }
 0x4a0   : > { %v1216_v38 = vpop.f32.mrf.mxu3 }
 0x4a1   : > { %v1264_v25 = vpop.f32.mrf.mxu0 }
 0x4a2   : > { %v1273_v32 = vsel %vm1146_vm13, %v1264_v25, -inf }
 0x4a3   : > { %1274 = vmax.xlane.f32.xlu2 %v1273_v32  ;;  %v1604_v33 = vpop.permute.xlu1 %1603 }
 0x4a4   : > { %3113 = vmatpush.xpose.msk.msra.mxu3 %vm1101_vm12, %v1604_v33 }
 0x4a5   : > { %3096 = vmatmul.msk.f32.gmra.mxu3 %vm1101_vm12, %v1213_v31 }
 0x4ab   : > { %v1430_v36 = vpop.permute.xlu1 %1429 }
 0x4ac   : > { %v1267_v39 = vpop.f32.mrf.mxu0  ;;  %3102 = vmatmul.msk.f32.gmra.mxu0 %vm1101_vm12, %v1430_v36 }
 0x4ad   : > { %3097 = vmatmul.msk.f32.gmra.mxu3 %vm1101_vm12, %v1216_v38  ;;  %v1276_v40 = vsel %vm1146_vm13, %v1267_v39, -inf }
 0x4ae   : > { %1277 = vmax.xlane.f32.xlu0 %v1276_v40 }
 0x4b3   : > { %v1602_v47 = vpop.permute.xlu1 %1601 }
 0x4b4   : > { %3103 = vmatmul.msk.f32.gmra.mxu0 %vm1101_vm12, %v1432_v41 }
 0x4b5   : > { %3114 = vmatmul.msk.f32.vlgmr.msra.gmra.mxu3 %vm1101_vm12, %v1598_v35 }
 0x4bd   : > { %3115 = vmatmul.msk.f32.gmra.mxu3 %vm1101_vm12, %v1600_v42 }
 0x4bf   : > { %v1468_v45 = vpop.f32.mrf.mxu0 }
 0x4c0   : > { %v1477_v46 = vsel %vm1146_vm13, %v1468_v45, -inf }
 0x4c1   : > { %1478 = vmax.xlane.f32.xlu1 %v1477_v46 }
 0x4c5   : > { %3116 = vmatmul.msk.f32.gmra.mxu3 %vm1101_vm12, %v1602_v47 }
 0x516   : > { %v1275_v53 = vpop.xlane.xlu2 %1274 }
 0x517   : > { %v1282_v55 = vsub.f32 %v1264_v25, %v1275_v53  ;;  %v1353_v53 = vld [vmem:[%s3739_s17 + $0x20] sm:$0xff] }
 0x518   : > { %v4050_v48 = vpop.f32.mrf.mxu3 }
 0x519   : > { %v1285_v58 = vmul.f32 1.442695, %v1282_v55 }
 0x520   : > { %v4052_v49 = vpop.f32.mrf.mxu3 }
 0x521   : > { %v1278_v50 = vpop.xlane.xlu0 %1277 }
 0x522   : > { %v1283_v51 = vsub.f32 %v1267_v39, %v1278_v50  ;;  %v1356_v50 = vld [vmem:[%s3739_s17 + $0x38] sm:$0xff] }
 0x523   : > { %1378 = vmatpush.msra.mxu2 %v1356_v50  ;;  %v3361_v50 = vld [vmem:[%s3810_s24 + $0x8] sm:$0xff] }
 0x524   : > { %v1287_v52 = vmul.f32 1.442695, %v1283_v51  ;;  %v1355_v51 = vld [vmem:[%s3739_s17 + $0x30] sm:$0xff] }
 0x525   : > { %1379 = vmatpush.msra.mxu2 %v1355_v51 }
 0x526   : > { %3298 = vpow2.f32 %v1287_v52  ;;  %v1354_v52 = vld [vmem:[%s3739_s17 + $0x28] sm:$0xff] }
 0x527   : > { %3300 = vpow2.f32 %v1285_v58  ;;  %1380 = vmatpush.msra.mxu2 %v1354_v52 }
 0x528   : > { %v4054_v54 = vpop.f32.mrf.mxu3 }
 0x529   : > { %v1471_v56 = vpop.f32.mrf.mxu0  ;;  %1381 = vmatpush.msra.mxu2 %v1353_v53 }
 0x52a   : > { %v1480_v57 = vsel %vm1146_vm13, %v1471_v56, -inf }
 0x52b   : > { %1481 = vmax.xlane.f32.xlu2 %v1480_v57 }
 0x52c   : > { %v3299_v59 = vpop.eup %3298 }
 0x52d   : > { %v1294_v61 = vsel %vm1146_vm13, %v3299_v59, 0.0  ;;  %v3301_v1 = vpop.eup %3300 }
 0x52e   : > { %v1291_v4 = vsel %vm1146_vm13, %v3301_v1, 0.0 }
 0x530   : > { %v4057_v60 = vpop.f32.mrf.mxu3 }
 0x531   : > { %v1474_v37 = vpop.f32.mrf.mxu0 }
 0x532   : > { %v1483_v62 = vsel %vm1153_vm14, %v1474_v37, -inf }
 0x533   : > { %1295 = vadd.xlane.f32.xlu2 %v1294_v61  ;;  %1484 = vmax.xlane.f32.xlu1 %v1483_v62  ;;  %v1557_v62 = vld [vmem:[%s3739_s17 + $0x50] sm:$0xff] }
 0x534   : > { %v1479_v63 = vpop.xlane.xlu1 %1478 }
 0x535   : > { %v1486_v0 = vsub.f32 %v1468_v45, %v1479_v63  ;;  %v1556_v63 = vld [vmem:[%s3739_s17 + $0x48] sm:$0xff] }
 0x537   : > { %v1489_v2 = vmul.f32 1.442695, %v1486_v0  ;;  %v1555_v0 = vld [vmem:[%s3739_s17 + $0x40] sm:$0xff] }
 0x538   : > { %v1638_v3 = vpop.f32.mrf.mxu3 }
 0x539   : > { %3302 = vpow2.f32 %v1489_v2  ;;  %v1647_v8 = vsel %vm1146_vm13, %v1638_v3, -inf }
 0x53b   : > { %1292 = vadd.xlane.f32.xlu1 %v1291_v4 }
 0x53f   : > { %v3303_v5 = vpop.eup %3302 }
 0x540   : > { %v1641_v43 = vpop.f32.mrf.mxu3  ;;  %v1495_v6 = vsel %vm1146_vm13, %v3303_v5, 0.0 }
 0x541   : > { %1496 = vadd.xlane.f32.xlu0 %v1495_v6  ;;  %v1650_v7 = vsel %vm1146_vm13, %v1641_v43, -inf }
 0x542   : > { %1651 = vmax.xlane.f32.xlu2 %v1650_v7 }
 0x548   : > { %v1644_v19 = vpop.f32.mrf.mxu3 }
 0x549   : > { %1648 = vmax.xlane.f32.xlu0 %v1647_v8  ;;  %v1653_v22 = vsel %vm1153_vm14, %v1644_v19, -inf }
 0x554   : > { %1514 = vrot.lane.b32.xlu1 %v3955_v26, %s3539_s21 }
 0x55a   : > { %3259 = vrot.lane.b32.xlu2 %v3945_v20, %s3539_s21 }
 0x55c   : > { %3264 = vrot.lane.b32.xlu1 %v3945_v20, %s3540_s11 }
 0x59e   : > { %v1482_v10 = vpop.xlane.xlu2 %1481 }
 0x59f   : > { %v1487_v11 = vsub.f32 %v1471_v56, %v1482_v10 }
 0x5a1   : > { %v1491_v12 = vmul.f32 1.442695, %v1487_v11 }
 0x5a3   : > { %3304 = vpow2.f32 %v1491_v12 }
 0x5a6   : > { %v1485_v13 = vpop.xlane.xlu1 %1484  ;;  %v1296_v17 = vpop.xlane.xlu2 %1295 }
 0x5a7   : > { %v1488_v44 = vsub.f32 %v1474_v37, %v1485_v13  ;;  %v1558_v37 = vld [vmem:[%s3739_s17 + $0x58] sm:$0xff] }
 0x5a8   : > { %1580 = vmatpush.msrb.mxu2 %v1558_v37 }
 0x5a9   : > { %v3305_v14 = vpop.eup %3304  ;;  %v1493_v15 = vmul.f32 1.442695, %v1488_v44 }
 0x5aa   : > { %v1498_v16 = vsel %vm1146_vm13, %v3305_v14, 0.0  ;;  %1581 = vmatpush.msrb.mxu2 %v1557_v62 }
 0x5ab   : > { %3306 = vpow2.f32 %v1493_v15  ;;  %1499 = vadd.xlane.f32.xlu0 %v1498_v16 }
 0x5ac   : > { %1582 = vmatpush.msrb.mxu2 %v1556_v63 }
 0x5ae   : > { %v1293_v18 = vpop.xlane.xlu1 %1292  ;;  %1583 = vmatpush.msrb.mxu2 %v1555_v0 }
 0x5af   : > { %3308 = vrcp.f32 %v1293_v18  ;;  %v1728_v18 = vld [vmem:[%s3739_s17 + $0x78] sm:$0xff] }
 0x5b0   : > { %3310 = vrcp.f32 %v1296_v17 }
 0x5b1   : > { %v4072_v21 = vpop.eup %3306 }
 0x5b2   : > { %v1501_v20 = vsel %vm1153_vm14, %v4072_v21, 0.0 }
 0x5b3   : > { %1502 = vadd.xlane.f32.xlu2 %v1501_v20  ;;  %1654 = vmax.xlane.f32.xlu0 %v1653_v22 }
 0x5b4   : > { %v1497_v23 = vpop.xlane.xlu0 %1496 }
 0x5b5   : > { %v3309_v24 = vpop.eup %3308  ;;  %v1652_v9 = vpop.xlane.xlu2 %1651 }
 0x5b6   : > { %v1657_v27 = vsub.f32 %v1641_v43, %v1652_v9  ;;  %v1303_v28 = vmul.f32 %v3309_v24, %v3301_v1  ;;  %v3311_v30 = vpop.eup %3310  ;;  %v1725_v24 = vld [vmem:[%s3739_s17 + $0x60] sm:$0xff] }
 0x5b7   : > { %v1304_v32 = vmul.f32 %v3311_v30, %v3299_v59 }
 0x5b8   : > { %v1661_v29 = vmul.f32 1.442695, %v1657_v27  ;;  %3089 = vmatmul.msk.f32.vlgmr.msrb.gmra.mxu1 %vm1146_vm13, %v1303_v28 }
 0x5ba   : > { %3312 = vpow2.f32 %v1661_v29 }
 0x5bb   : > { %3314 = vrcp.f32 %v1497_v23 }
 0x5bc   : > { %v1649_v25 = vpop.xlane.xlu0 %1648 }
 0x5bd   : > { %v1656_v31 = vsub.f32 %v1638_v3, %v1649_v25  ;;  %v3260_v38 = vpop.permute.xlu2 %3259 }
 0x5be   : > { %v3261_v42 = vunpack.i.l.bf16 %v3260_v38  ;;  %v3262_v46 = vunpack.i.h.bf16 %v3260_v38  ;;  %v3270_v38 = vld [vmem:[%s4847_s28] ss:$0 sm:$0xff] }
 0x5bf   : > { %v1659_v33 = vmul.f32 1.442695, %v1656_v31 }
 0x5c0   : > { %v4078_v35 = vpop.eup %3312  ;;  %3090 = vmatmul.msk.f32.gmra.mxu1 %vm1146_vm13, %v1304_v32 }
 0x5c1   : > { %3316 = vpow2.f32 %v1659_v33  ;;  %v1668_v36 = vsel %vm1146_vm13, %v4078_v35, 0.0  ;;  %v3315_v39 = vpop.eup %3314 }
 0x5c2   : > { %1669 = vadd.xlane.f32.xlu1 %v1668_v36  ;;  %v1507_v47 = vmul.f32 %v3315_v39, %v3303_v5  ;;  %v3360_v39 = vld [vmem:[%s3810_s24] sm:$0xff] }
 0x5c6   : > { %v1515_v40 = vpop.permute.xlu1 %1514 }
 0x5c7   : > { %v3317_v41 = vpop.eup %3316  ;;  %3104 = vmatpush.msk.msra.mxu1 %vm886_vm1, %v1515_v40 }
 0x5c8   : > { %v1665_v45 = vsel %vm1146_vm13, %v3317_v41, 0.0 }
 0x5c9   : > { %1666 = vadd.xlane.f32.xlu0 %v1665_v45  ;;  %1543 = vmatpush.msra.mxu1 %v3261_v42 }
 0x5cb   : > { %1544 = vmatpush.msra.mxu1 %v3262_v46 }
 0x5cc   : > { %3105 = vmatmul.msk.f32.vlgmr.msra.gmra.mxu1 %vm1146_vm13, %v1507_v47 }
 0x5cd   : > { %1750 = vmatpush.msrb.mxu1 %v1728_v18  ;;  %v1903_v18 = vld [vmem:[%s4848_s14 + $0x190] sm:$0xff] }
 0x5ce   : > { %v3265_v6 = vpop.permute.xlu1 %3264 }
 0x5cf   : > { %v3266_v13 = vunpack.i.l.bf16 %v3265_v6  ;;  %v3267_v44 = vunpack.i.h.bf16 %v3265_v6  ;;  %v1916_v6 = vld [vmem:[%s4848_s14 + $0x1f8] sm:$0xff] }
 0x5dd   : > { %1684 = vrot.lane.b32.xlu0 %v3955_v26, %s3540_s11 }
 0x61e   : > { %v1500_v55 = vpop.xlane.xlu0 %1499 }
 0x61f   : > { %3318 = vrcp.f32 %v1500_v55 }
 0x625   : > { %v3319_v56 = vpop.eup %3318 }
 0x626   : > { %v1503_v57 = vpop.xlane.xlu2 %1502  ;;  %v1655_v58 = vpop.xlane.xlu0 %1654  ;;  %v1508_v59 = vmul.f32 %v3319_v56, %v3305_v14 }
 0x627   : > { %3320 = vrcp.f32 %v1503_v57  ;;  %v1658_v26 = vsub.f32 %v1644_v19, %v1655_v58  ;;  %v1727_v19 = vld [vmem:[%s3739_s17 + $0x70] sm:$0xff] }
 0x628   : > { %3106 = vmatmul.msk.f32.gmra.mxu1 %vm1146_vm13, %v1508_v59 }
 0x629   : > { %v1663_v61 = vmul.f32 1.442695, %v1658_v26  ;;  %1751 = vmatpush.msrb.mxu1 %v1727_v19 }
 0x62b   : > { %3322 = vpow2.f32 %v1663_v61 }
 0x62d   : > { %v3321_v1 = vpop.eup %3320 }
 0x62e   : > { %v1509_v2 = vmul.f32 %v3321_v1, %v4072_v21  ;;  %v1726_v21 = vld [vmem:[%s3739_s17 + $0x68] sm:$0xff] }
 0x62f   : > { %1752 = vmatpush.msrb.mxu1 %v1726_v21  ;;  %v1904_v21 = vld [vmem:[%s4848_s14 + $0x198] sm:$0xff] }
 0x630   : > { %3107 = vmatmul.msk.f32.gmra.mxu1 %vm1146_vm13, %v1509_v2 }
 0x631   : > { %v3323_v3 = vpop.eup %3322  ;;  %1753 = vmatpush.msrb.mxu1 %v1725_v24 }
 0x632   : > { %v1671_v4 = vsel %vm1153_vm14, %v3323_v3, 0.0 }
 0x633   : > { %1672 = vadd.xlane.f32.xlu0 %v1671_v4  ;;  %v1913_v4 = vld [vmem:[%s4848_s14 + $0x1e0] sm:$0xff]  ;;  %2005 = vmatpush.msra.mxu1 %v1916_v6 }
 0x634   : > { %v1857_v6 = vld [vmem:[%s4848_s14 + $0x20] sm:$0xff] }
 0x635   : > { %v1344_v5 = vpop.f32.mrf.mxu1  ;;  %v1670_v10 = vpop.xlane.xlu1 %1669 }
 0x636   : > { %3092 = vmatmul.msk.f32.vlgmr.msra.gmra.mxu2 %vm1101_vm12, %v1344_v5  ;;  %v1914_v5 = vld [vmem:[%s4848_s14 + $0x1e8] sm:$0xff] }
 0x637   : > { %1927 = vmatpush.msra.mxu2 %v1913_v4  ;;  %1953 = vmatpush.msrb.mxu3 %v1914_v5  ;;  %v1862_v4 = vld [vmem:[%s4848_s14 + $0x48] sm:$0xff]  ;;  %v1863_v5 = vld [vmem:[%s4848_s14 + $0x50] sm:$0xff] }
 0x63c   : > { %v1667_v7 = vpop.xlane.xlu0 %1666 }
 0x63d   : > { %v1347_v43 = vpop.f32.mrf.mxu1  ;;  %3324 = vrcp.f32 %v1667_v7  ;;  %v1909_v7 = vld [vmem:[%s4848_s14 + $0x1c0] sm:$0xff] }
 0x63e   : > { %3093 = vmatmul.msk.f32.gmra.mxu2 %vm1101_vm12, %v1347_v43  ;;  %3326 = vrcp.f32 %v1670_v10  ;;  %v1915_v43 = vld [vmem:[%s4848_s14 + $0x1f0] sm:$0xff] }
 0x63f   : > { %v1911_v10 = vld [vmem:[%s4848_s14 + $0x1d0] sm:$0xff]  ;;  %1928 = vmatpush.msra.mxu2 %v1909_v7  ;;  %v1858_v7 = vld [vmem:[%s4848_s14 + $0x28] sm:$0xff] }
 0x643   : > { %v3325_v12 = vpop.eup %3324 }
 0x644   : > { %v1677_v14 = vmul.f32 %v3325_v12, %v3317_v41 }
 0x646   : > { %3094 = vmatmul.msk.f32.gmra.mxu2 %vm1101_vm12, %v4050_v48  ;;  %v3327_v48 = vpop.eup %3326 }
 0x647   : > { %v1678_v15 = vmul.f32 %v3327_v48, %v4078_v35 }
 0x649   : > { %v1546_v8 = vpop.f32.mrf.mxu1 }
 0x64e   : > { %3108 = vmatmul.msk.f32.vlgmr.msrb.gmra.mxu2 %vm1101_vm12, %v1546_v8  ;;  %v1910_v8 = vld [vmem:[%s4848_s14 + $0x1c8] sm:$0xff] }
 0x64f   : > { %v1685_v11 = vpop.permute.xlu0 %1684  ;;  %1954 = vmatpush.msrb.mxu3 %v1910_v8  ;;  %v1859_v8 = vld [vmem:[%s4848_s14 + $0x30] sm:$0xff] }
 0x650   : > { %3117 = vmatpush.msk.msrb.mxu0 %vm886_vm1, %v1685_v11  ;;  %v1912_v11 = vld [vmem:[%s4848_s14 + $0x1d8] sm:$0xff] }
 0x651   : > { %2006 = vmatpush.msra.mxu1 %v1912_v11  ;;  %v1853_v11 = vld [vmem:[%s4848_s14] sm:$0xff] }
 0x652   : > { %1713 = vmatpush.msrb.mxu0 %v3266_v13  ;;  %v1905_v13 = vld [vmem:[%s4848_s14 + $0x1a0] sm:$0xff] }
 0x653   : > { %1929 = vmatpush.msra.mxu2 %v1905_v13  ;;  %v1855_v13 = vld [vmem:[%s4848_s14 + $0x10] sm:$0xff] }
 0x654   : > { %1714 = vmatpush.msrb.mxu0 %v3267_v44  ;;  %v1906_v44 = vld [vmem:[%s4848_s14 + $0x1a8] sm:$0xff] }
 0x655   : > { %3118 = vmatmul.msk.f32.vlgmr.msrb.gmra.mxu0 %vm1146_vm13, %v1677_v14  ;;  %v1907_v14 = vld [vmem:[%s4848_s14 + $0x1b0] sm:$0xff]  ;;  %1955 = vmatpush.msrb.mxu3 %v1906_v44  ;;  %v1856_v44 = vld [vmem:[%s4848_s14 + $0x18] sm:$0xff] }
 0x656   : > { %1979 = vmatpush.msra.mxu0 %v1915_v43  ;;  %v1864_v43 = vld [vmem:[%s4848_s14 + $0x58] sm:$0xff] }
 0x658   : > { %1980 = vmatpush.msra.mxu0 %v1911_v10  ;;  %v1860_v10 = vld [vmem:[%s4848_s14 + $0x38] sm:$0xff] }
 0x65a   : > { %1981 = vmatpush.msra.mxu0 %v1907_v14 }
 0x65c   : > { %1982 = vmatpush.msra.mxu0 %v1903_v18 }
 0x65d   : > { %3119 = vmatmul.msk.f32.gmra.mxu0 %vm1146_vm13, %v1678_v15  ;;  %v1908_v15 = vld [vmem:[%s4848_s14 + $0x1b8] sm:$0xff] }
 0x65e   : > { %2007 = vmatpush.msra.mxu1 %v1908_v15 }
 0x660   : > { %2008 = vmatpush.msra.mxu1 %v1904_v21 }
 0x6a5   : > { %v1549_v16 = vpop.f32.mrf.mxu1 }
 0x6a6   : > { %v1673_v17 = vpop.xlane.xlu0 %1672  ;;  %3109 = vmatmul.msk.f32.gmra.mxu2 %vm1101_vm12, %v1549_v16  ;;  %v1901_v16 = vld [vmem:[%s4848_s14 + $0x180] sm:$0xff] }
 0x6a7   : > { %3328 = vrcp.f32 %v1673_v17  ;;  %v1902_v17 = vld [vmem:[%s4848_s14 + $0x188] sm:$0xff]  ;;  %1930 = vmatpush.msra.mxu2 %v1901_v16 }
 0x6a8   : > { %1956 = vmatpush.msrb.mxu3 %v1902_v17 }
 0x6ad   : > { %v3329_v20 = vpop.eup %3328  ;;  %v1552_v22 = vpop.f32.mrf.mxu1 }
 0x6ae   : > { %3110 = vmatmul.msk.f32.gmra.mxu2 %vm1101_vm12, %v1552_v22  ;;  %v1679_v23 = vmul.f32 %v3329_v20, %v3323_v3  ;;  %v1897_v20 = vld [vmem:[%s4848_s14 + $0x160] sm:$0xff]  ;;  %v1898_v22 = vld [vmem:[%s4848_s14 + $0x168] sm:$0xff] }
 0x6af   : > { %1931 = vmatpush.msra.mxu2 %v1897_v20  ;;  %1957 = vmatpush.msrb.mxu3 %v1898_v22 }
 0x6b0   : > { %3120 = vmatmul.msk.f32.gmra.mxu0 %vm1146_vm13, %v1679_v23  ;;  %v1899_v23 = vld [vmem:[%s4848_s14 + $0x170] sm:$0xff] }
 0x6b1   : > { %1983 = vmatpush.msra.mxu0 %v1899_v23 }
 0x6b9   : > { %v1383_v29 = vpop.f32.mrf.mxu2 }
 0x6ba   : > { %v1419_v32 = vadd.f32 %v4052_v49, %v1383_v29  ;;  %v1895_v29 = vld [vmem:[%s4848_s14 + $0x150] sm:$0xff] }
 0x6bb   : > { %1984 = vmatpush.msra.mxu0 %v1895_v29  ;;  %v3271_v29 = vld [vmem:[%s4849_s12] ss:$0 sm:$0xff] }
 0x6c1   : > { %v1386_v30 = vpop.f32.mrf.mxu2 }
 0x6c2   : > { %v1422_v42 = vadd.f32 %v4054_v54, %v1386_v30  ;;  %v3362_v54 = vld [vmem:[%s3810_s24 + $0x10] sm:$0x1] }
 0x6c9   : > { %v1389_v25 = vpop.f32.mrf.mxu2 }
 0x6ca   : > { %v1425_v55 = vadd.f32 %v4057_v60, %v1389_v25  ;;  %v1896_v25 = vld [vmem:[%s4848_s14 + $0x158] sm:$0xff] }
 0x6d1   : > { %v1585_v31 = vpop.f32.mrf.mxu2 }
 0x6d2   : > { %v1716_v9 = vpop.f32.mrf.mxu0  ;;  %v1594_v33 = vadd.f32 %v1585_v31, %v1419_v32  ;;  %v1889_v31 = vld [vmem:[%s4848_s14 + $0x120] sm:$0xff]  ;;  %v1890_v32 = vld [vmem:[%s4848_s14 + $0x128] sm:$0xff] }
 0x6d3   : > { %3121 = vmatmul.msk.f32.vlgmr.msrb.gmra.mxu1 %vm1101_vm12, %v1716_v9  ;;  %v1900_v9 = vld [vmem:[%s4848_s14 + $0x178] sm:$0xff] }
 0x6d4   : > { %2009 = vmatpush.msra.mxu1 %v1900_v9 }
 0x6d6   : > { %2010 = vmatpush.msra.mxu1 %v1896_v25 }
 0x6da   : > { %v1719_v27 = vpop.f32.mrf.mxu0 }
 0x6db   : > { %3122 = vmatmul.msk.f32.gmra.mxu1 %vm1101_vm12, %v1719_v27  ;;  %v1893_v27 = vld [vmem:[%s4848_s14 + $0x140] sm:$0xff] }
 0x6dc   : > { %1932 = vmatpush.msra.mxu2 %v1893_v27 }
 0x6de   : > { %1933 = vmatpush.msra.mxu2 %v1889_v31 }
 0x729   : > { %v1588_v41 = vpop.f32.mrf.mxu2 }
 0x72a   : > { %v1595_v46 = vadd.f32 %v1588_v41, %v1422_v42  ;;  %v1881_v41 = vld [vmem:[%s4848_s14 + $0xe0] sm:$0xff]  ;;  %v1882_v42 = vld [vmem:[%s4848_s14 + $0xe8] sm:$0xff] }
 0x72d   : > { %v1722_v28 = vpop.f32.mrf.mxu0 }
 0x72e   : > { %3123 = vmatmul.msk.f32.gmra.mxu1 %vm1101_vm12, %v1722_v28  ;;  %v1894_v28 = vld [vmem:[%s4848_s14 + $0x148] sm:$0xff] }
 0x72f   : > { %1958 = vmatpush.msrb.mxu3 %v1894_v28 }
 0x731   : > { %v1591_v53 = vpop.f32.mrf.mxu2  ;;  %1959 = vmatpush.msrb.mxu3 %v1890_v32  ;;  %v3272_v32 = vld [vmem:[%s809_s30] ss:$0 sm:$0xff] }
 0x732   : > { %v1596_v56 = vadd.f32 %v1591_v53, %v1425_v55  ;;  %v1880_v53 = vld [vmem:[%s4848_s14 + $0xd8] sm:$0xff]  ;;  %v1873_v55 = vld [vmem:[%s4848_s14 + $0xa0] sm:$0xff] }
 0x750   : > { %v1755_v35 = vpop.f32.mrf.mxu1 }
 0x751   : > { %v1764_v36 = vadd.f32 %v1755_v35, %v1594_v33  ;;  %v1891_v33 = vld [vmem:[%s4848_s14 + $0x130] sm:$0xff]  ;;  %v1892_v35 = vld [vmem:[%s4848_s14 + $0x138] sm:$0xff] }
 0x752   : > { %1985 = vmatpush.msra.mxu0 %v1891_v33  ;;  %2011 = vmatpush.msra.mxu1 %v1892_v35 }
 0x753   : > { %v1767_v40 = vadd.f32 %v3360_v39, %v1764_v36  ;;  %v1885_v36 = vld [vmem:[%s4848_s14 + $0x100] sm:$0xff]  ;;  %v1887_v39 = vld [vmem:[%s4848_s14 + $0x110] sm:$0xff] }
 0x754   : > { %1934 = vmatpush.msra.mxu2 %v1885_v36  ;;  %1986 = vmatpush.msra.mxu0 %v1887_v39 }
 0x755   : > { %v4127_v45 = vadd.f32 %v3270_v38, %v1767_v40  ;;  %v1888_v40 = vld [vmem:[%s4848_s14 + $0x118] sm:$0xff] }
 0x756   : > { %2012 = vmatpush.msra.mxu1 %v1888_v40  ;;  %1935 = vmatpush.msra.mxu2 %v1881_v41 }
 0x757   : > { %1779 = vadd.xlane.f32.xlu2 %v4127_v45 }
 0x758   : > { %v1758_v49 = vpop.f32.mrf.mxu1 }
 0x759   : > { %v1765_v47 = vadd.f32 %v1758_v49, %v1595_v46  ;;  %v1883_v46 = vld [vmem:[%s4848_s14 + $0xf0] sm:$0xff]  ;;  %v1884_v49 = vld [vmem:[%s4848_s14 + $0xf8] sm:$0xff] }
 0x75a   : > { %1987 = vmatpush.msra.mxu0 %v1883_v46  ;;  %2013 = vmatpush.msra.mxu1 %v1884_v49 }
 0x75b   : > { %v1768_v51 = vadd.f32 %v3361_v50, %v1765_v47  ;;  %v1877_v47 = vld [vmem:[%s4848_s14 + $0xc0] sm:$0xff]  ;;  %v1878_v50 = vld [vmem:[%s4848_s14 + $0xc8] sm:$0xff] }
 0x75c   : > { %1936 = vmatpush.msra.mxu2 %v1877_v47  ;;  %2014 = vmatpush.msra.mxu1 %v1880_v53 }
 0x75d   : > { %v4131_v52 = vadd.f32 %v3270_v38, %v1768_v51  ;;  %v1879_v51 = vld [vmem:[%s4848_s14 + $0xd0] sm:$0xff] }
 0x75e   : > { %1988 = vmatpush.msra.mxu0 %v1879_v51  ;;  %1937 = vmatpush.msra.mxu2 %v1873_v55 }
 0x75f   : > { %1781 = vadd.xlane.f32.xlu1 %v4131_v52 }
 0x7ab   : > { %v1761_v57 = vpop.f32.mrf.mxu1 }
 0x7ac   : > { %v1766_v58 = vadd.f32 %v1761_v57, %v1596_v56  ;;  %v1874_v56 = vld [vmem:[%s4848_s14 + $0xa8] sm:$0xff]  ;;  %v1875_v57 = vld [vmem:[%s4848_s14 + $0xb0] sm:$0xff] }
 0x7ad   : > { %1989 = vmatpush.msra.mxu0 %v1875_v57 }
 0x7ae   : > { %v1769_v59 = vadd.f32 %v3362_v54, %v1766_v58  ;;  %v1876_v58 = vld [vmem:[%s4848_s14 + $0xb8] sm:$0xff]  ;;  %v1869_v54 = vld [vmem:[%s4848_s14 + $0x80] sm:$0xff] }
 0x7af   : > { %2015 = vmatpush.msra.mxu1 %v1876_v58  ;;  %1938 = vmatpush.msra.mxu2 %v1869_v54 }
 0x7b0   : > { %v4136_v37 = vadd.f32 %v3270_v38, %v1769_v59  ;;  %v1886_v38 = vld [vmem:[%s4848_s14 + $0x108] sm:$0xff] }
 0x7b1   : > { %1960 = vmatpush.msrb.mxu3 %v1886_v38  ;;  %v1870_v59 = vld [vmem:[%s4848_s14 + $0x88] sm:$0xff] }
 0x7b2   : > { %v1783_v26 = vsel %vm886_vm1, %v4136_v37, 0.0 }
 0x7b3   : > { %1784 = vadd.xlane.f32.xlu2 %v1783_v26  ;;  %1961 = vmatpush.msrb.mxu3 %v1882_v42  ;;  %v1871_v26 = vld [vmem:[%s4848_s14 + $0x90] sm:$0xff] }
 0x7b4   : > { %1990 = vmatpush.msra.mxu0 %v1871_v26  ;;  %v1917_v26 = vld [vmem:[%s3805_s8] sm:$0xf] }
 0x7b5   : > { %1962 = vmatpush.msrb.mxu3 %v1878_v50 }
 0x7b7   : > { %1963 = vmatpush.msrb.mxu3 %v1874_v56 }
 0x7b9   : > { %1964 = vmatpush.msrb.mxu3 %v1870_v59 }
 0x7ca   : > { %v1780_v61 = vpop.xlane.xlu2 %1779 }
 0x7cb   : > { %v1786_v62 = vmul.f32 %v1780_v61, %v3858_v34  ;;  %v1872_v61 = vld [vmem:[%s4848_s14 + $0x98] sm:$0xff] }
 0x7cc   : > { %2016 = vmatpush.msra.mxu1 %v1872_v61  ;;  %v4240_v61 = vperm.slane %v1917_v26, 2 }
 0x7cd   : > { %v4142_v60 = vsub.f32 %v4127_v45, %v1786_v62  ;;  %v1865_v62 = vld [vmem:[%s4848_s14 + $0x60] sm:$0xff] }
 0x7ce   : > { %1939 = vmatpush.msra.mxu2 %v1865_v62  ;;  %v4242_v62 = vperm.slane %v1917_v26, 3 }
 0x7cf   : > { %v1792_v63 = vmul.f32 %v4142_v60, %v4142_v60 }
 0x7d1   : > { %1795 = vadd.xlane.f32.xlu1 %v1792_v63  ;;  %v1866_v63 = vld [vmem:[%s4848_s14 + $0x68] sm:$0xff] }
 0x7d2   : > { %v1782_v0 = vpop.xlane.xlu1 %1781  ;;  %1965 = vmatpush.msrb.mxu3 %v1866_v63 }
 0x7d3   : > { %v1787_v1 = vmul.f32 %v1782_v0, %v3858_v34  ;;  %v1867_v0 = vld [vmem:[%s4848_s14 + $0x70] sm:$0xff] }
 0x7d4   : > { %1991 = vmatpush.msra.mxu0 %v1867_v0  ;;  %1966 = vmatpush.msrb.mxu3 %v1862_v4  ;;  %v4252_v4 = vperm.slane %v1917_v26, 1 }
 0x7d5   : > { %v4148_v2 = vsub.f32 %v4131_v52, %v1787_v1  ;;  %v1868_v1 = vld [vmem:[%s4848_s14 + $0x78] sm:$0xff] }
 0x7d6   : > { %2017 = vmatpush.msra.mxu1 %v1868_v1  ;;  %1992 = vmatpush.msra.mxu0 %v1863_v5 }
 0x7d7   : > { %v1793_v3 = vmul.f32 %v4148_v2, %v4148_v2  ;;  %1967 = vmatpush.msrb.mxu3 %v1858_v7 }
 0x7d8   : > { %2018 = vmatpush.msra.mxu1 %v1864_v43  ;;  %1993 = vmatpush.msra.mxu0 %v1859_v8 }
 0x7d9   : > { %1797 = vadd.xlane.f32.xlu0 %v1793_v3  ;;  %v1861_v3 = vld [vmem:[%s4848_s14 + $0x40] sm:$0xff] }
 0x7da   : > { %1940 = vmatpush.msra.mxu2 %v1861_v3  ;;  %2019 = vmatpush.msra.mxu1 %v1860_v10 }
 0x7db   : > { %1994 = vmatpush.msra.mxu0 %v1855_v13 }
 0x7dc   : > { %1941 = vmatpush.msra.mxu2 %v1857_v6  ;;  %2020 = vmatpush.msra.mxu1 %v1856_v44 }
 0x7de   : > { %1942 = vmatpush.msra.mxu2 %v1853_v11 }
 0x826   : > { %v1785_v12 = vpop.xlane.xlu2 %1784 }
 0x827   : > { %v1788_v48 = vmul.f32 %v1785_v12, %v3858_v34  ;;  %v1854_v12 = vld [vmem:[%s4848_s14 + $0x8] sm:$0xff] }
 0x828   : > { %1968 = vmatpush.msrb.mxu3 %v1854_v12 }
 0x829   : > { %v4169_v19 = vsub.f32 %v4136_v37, %v1788_v48 }
 0x82b   : > { %v1794_v24 = vmul.f32 %v4169_v19, %v4169_v19 }
 0x82d   : > { %v1799_v30 = vsel %vm886_vm1, %v1794_v24, 0.0 }
 0x82e   : > { %1800 = vadd.xlane.f32.xlu2 %v1799_v30 }
 0x844   : > { %v1796_v14 = vpop.xlane.xlu1 %1795 }
 0x845   : > { %v1802_v48 = vmul.f32 %v1796_v14, %v3858_v34 }
 0x847   : > { %v1805_v15 = vadd.f32 1e-06, %v1802_v48 }
 0x849   : > { %3330 = vrsqrt.f32 %v1805_v15  ;;  %vm1814_vm0 = vweird.f32 %v1805_v15 }
 0x84c   : > { %v1798_v16 = vpop.xlane.xlu0 %1797 }
 0x84d   : > { %v1803_v17 = vmul.f32 %v1798_v16, %v3858_v34 }
 0x84f   : > { %v3331_v18 = vpop.eup %3330  ;;  %v1806_v21 = vadd.f32 1e-06, %v1803_v17 }
 0x850   : > { %v1809_v20 = vmul.f32 %v3331_v18, %v1805_v15  ;;  %vm1815_vm15 = vweird.f32 %v3331_v18 }
 0x851   : > { %3332 = vrsqrt.f32 %v1806_v21  ;;  %vm1816_vm2 = vmor %vm1814_vm0, %vm1815_vm15  ;;  %vm1824_vm4 = vweird.f32 %v1806_v21 }
 0x852   : > { %v1810_v22 = vmul.f32 %v3331_v18, %v1809_v20 }
 0x854   : > { %v1811_v23 = vmul.f32 0.5, %v1810_v22 }
 0x856   : > { %v1812_v24 = vsub.f32 1.5, %v1811_v23 }
 0x857   : > { %v3333_v9 = vpop.eup %3332 }
 0x858   : > { %v1813_v27 = vmul.f32 %v3331_v18, %v1812_v24  ;;  %v1819_v28 = vmul.f32 %v3333_v9, %v1806_v21  ;;  %vm1825_vm3 = vweird.f32 %v3333_v9 }
 0x859   : > { %vm1826_vm5 = vmor %vm1824_vm4, %vm1825_vm3 }
 0x85a   : > { %v1817_v30 = vsel %vm1816_vm2, %v3331_v18, %v1813_v27  ;;  %v1820_v25 = vmul.f32 %v3333_v9, %v1819_v28 }
 0x85b   : > { %v1838_v31 = vmul.f32 %v1817_v30, %v4142_v60 }
 0x85c   : > { %v1821_v33 = vmul.f32 0.5, %v1820_v25 }
 0x85d   : > { %v1844_v35 = vmul.f32 %v3271_v29, %v1838_v31 }
 0x85e   : > { %v1822_v36 = vsub.f32 1.5, %v1821_v33 }
 0x85f   : > { %v1850_v38 = vadd.f32 %v3272_v32, %v1844_v35 }
 0x860   : > { %v1823_v39 = vmul.f32 %v3333_v9, %v1822_v36 }
 0x861   : > { %1943 = vmatmul.f32.vlgmr.msra.gmra.mxu2 %v1850_v38  ;;  %1969 = vmatmul.f32.vlgmr.msrb.gmra.mxu3 %v1850_v38 }
 0x862   : > { %v1827_v40 = vsel %vm1826_vm5, %v3333_v9, %v1823_v39  ;;  %1995 = vmatmul.f32.vlgmr.msra.gmra.mxu0 %v1850_v38  ;;  %2021 = vmatmul.f32.vlgmr.msra.gmra.mxu1 %v1850_v38 }
 0x863   : > { %v1839_v60 = vmul.f32 %v1827_v40, %v4148_v2 }
 0x865   : > { %v1845_v41 = vmul.f32 %v3271_v29, %v1839_v60 }
 0x867   : > { %v1851_v42 = vadd.f32 %v3272_v32, %v1845_v41 }
 0x869   : > { %1946 = vmatmul.f32.gmra.mxu2 %v1851_v42  ;;  %1972 = vmatmul.f32.gmra.mxu3 %v1851_v42 }
 0x86a   : > { %1998 = vmatmul.f32.gmra.mxu0 %v1851_v42  ;;  %2024 = vmatmul.f32.gmra.mxu1 %v1851_v42 }
 0x8a1   : > { %v1801_v46 = vpop.xlane.xlu2 %1800 }
 0x8a2   : > { %v1804_v49 = vmul.f32 %v1801_v46, %v3858_v34 }
 0x8a4   : > { %v1807_v47 = vadd.f32 1e-06, %v1804_v49 }
 0x8a6   : > { %3334 = vrsqrt.f32 %v1807_v47  ;;  %vm1834_vm7 = vweird.f32 %v1807_v47 }
 0x8ac   : > { %v3335_v50 = vpop.eup %3334 }
 0x8ad   : > { %v1829_v51 = vmul.f32 %v3335_v50, %v1807_v47  ;;  %vm1835_vm6 = vweird.f32 %v3335_v50 }
 0x8ae   : > { %vm1836_vm8 = vmor %vm1834_vm7, %vm1835_vm6 }
 0x8af   : > { %v1830_v53 = vmul.f32 %v3335_v50, %v1829_v51 }
 0x8b1   : > { %v1831_v55 = vmul.f32 0.5, %v1830_v53 }
 0x8b3   : > { %v1832_v56 = vsub.f32 1.5, %v1831_v55 }
 0x8b5   : > { %v1833_v57 = vmul.f32 %v3335_v50, %v1832_v56 }
 0x8b7   : > { %v1837_v2 = vsel %vm1836_vm8, %v3335_v50, %v1833_v57 }
 0x8b8   : > { %v1840_v58 = vmul.f32 %v1837_v2, %v4169_v19  ;;  %v4250_v19 = vperm.slane %v1917_v26, 0 }
 0x8ba   : > { %v1846_v54 = vmul.f32 %v3271_v29, %v1840_v58 }
 0x8bc   : > { %v1852_v59 = vadd.f32 %v3272_v32, %v1846_v54 }
 0x8be   : > { %1949 = vmatmul.f32.gmra.mxu2 %v1852_v59  ;;  %1975 = vmatmul.f32.gmra.mxu3 %v1852_v59 }
 0x8bf   : > { %2001 = vmatmul.f32.gmra.mxu0 %v1852_v59  ;;  %2027 = vmatmul.f32.gmra.mxu1 %v1852_v59 }
 0x8df   : > { %v1996_v63 = vpop.f32.mrf.mxu0  ;;  %v2022_v0 = vpop.f32.mrf.mxu1 }
 0x8e0   : > { %v4245_v1 = vadd.f32 %v1996_v63, %v4240_v61  ;;  %v4248_v3 = vadd.f32 %v2022_v0, %v4242_v62 }
 0x8e2   : > { %v4255_v5 = vmul.f32 0.70710677, %v4245_v1  ;;  %v4258_v43 = vmul.f32 0.70710677, %v4248_v3 }
 0x8e4   : > { %v2135_v6 = vmul.f32 %v4255_v5, %v4255_v5  ;;  %v2175_v7 = vmul.f32 %v4258_v43, %v4258_v43  ;;  %v1944_v8 = vpop.f32.mrf.mxu2  ;;  %v1970_v10 = vpop.f32.mrf.mxu3 }
 0x8e5   : > { %v4265_v11 = vadd.f32 %v1944_v8, %v4250_v19  ;;  %v4268_v12 = vadd.f32 %v1970_v10, %v4252_v4 }
 0x8e6   : > { %v4270_v13 = vmin.f32 %v2135_v6, 16.0  ;;  %v4272_v44 = vmin.f32 %v2175_v7, 16.0 }
 0x8e7   : > { %v4275_v14 = vmul.f32 0.70710677, %v4265_v11  ;;  %v4278_v48 = vmul.f32 0.70710677, %v4268_v12  ;;  %v1999_v50 = vpop.f32.mrf.mxu0 }
 0x8e8   : > { %v2137_v15 = vmul.f32 2.1237322e-06, %v4270_v13  ;;  %v2148_v16 = vmul.f32 3.8918573e-05, %v4270_v13  ;;  %v2177_v17 = vmul.f32 2.1237322e-06, %v4272_v44  ;;  %v4308_v0 = vadd.f32 %v1999_v50, %v4240_v61 }
 0x8e9   : > { %v2188_v18 = vmul.f32 3.8918573e-05, %v4272_v44  ;;  %v2055_v21 = vmul.f32 %v4275_v14, %v4275_v14  ;;  %v2095_v20 = vmul.f32 %v4278_v48, %v4278_v48 }
 0x8ea   : > { %v2138_v22 = vadd.f32 0.00028619796, %v2137_v15  ;;  %v2149_v23 = vadd.f32 0.001143296, %v2148_v16  ;;  %v2178_v24 = vadd.f32 0.00028619796, %v2177_v17 }
 0x8eb   : > { %v2189_v9 = vadd.f32 0.001143296, %v2188_v18  ;;  %v4288_v27 = vmin.f32 %v2055_v21, 16.0  ;;  %v4290_v28 = vmin.f32 %v2095_v20, 16.0  ;;  %v2606_v15 = vld [vmem:[%s3812_s2 + $0x178] sm:$0xff] }
 0x8ec   : > { %v2139_v29 = vmul.f32 %v2138_v22, %v4270_v13  ;;  %v2150_v30 = vmul.f32 %v2149_v23, %v4270_v13  ;;  %v2179_v25 = vmul.f32 %v2178_v24, %v4272_v44  ;;  %v2622_v16 = vld [vmem:[%s3812_s2 + $0x1f8] sm:$0xff]  ;;  %2679 = vmatpush.msrb.mxu0 %v2606_v15  ;;  %v4352_v15 = vmul.f32 0.5, %v4248_v3  ;;  %v2601_v3 = vld [vmem:[%s3812_s2 + $0x150] sm:$0xff] }
 0x8ed   : > { %v2190_v31 = vmul.f32 %v2189_v9, %v4272_v44  ;;  %v2057_v32 = vmul.f32 2.1237322e-06, %v4288_v27  ;;  %v2068_v33 = vmul.f32 3.8918573e-05, %v4288_v27  ;;  %v2097_v35 = vmul.f32 2.1237322e-06, %v4290_v28  ;;  %2705 = vmatpush.msrb.mxu1 %v2622_v16 }
 0x8ee   : > { %v2140_v36 = vadd.f32 0.0036580483, %v2139_v29  ;;  %v2151_v38 = vadd.f32 0.014752088, %v2150_v30  ;;  %v2180_v39 = vadd.f32 0.0036580483, %v2179_v25 }
 0x8ef   : > { %v2191_v40 = vadd.f32 0.014752088, %v2190_v31  ;;  %v2058_v60 = vadd.f32 0.00028619796, %v2057_v32  ;;  %v2069_v41 = vadd.f32 0.001143296, %v2068_v33 }
 0x8f0   : > { %v2141_v42 = vmul.f32 %v2140_v36, %v4270_v13  ;;  %v2152_v46 = vmul.f32 %v2151_v38, %v4270_v13  ;;  %v2181_v49 = vmul.f32 %v2180_v39, %v4272_v44  ;;  %v2098_v47 = vadd.f32 0.00028619796, %v2097_v35  ;;  %v2605_v35 = vld [vmem:[%s3812_s2 + $0x170] sm:$0xff]  ;;  %v2604_v38 = vld [vmem:[%s3812_s2 + $0x168] sm:$0xff] }
 0x8f1   : > { %v2192_v51 = vmul.f32 %v2191_v40, %v4272_v44  ;;  %v2059_v53 = vmul.f32 %v2058_v60, %v4288_v27  ;;  %v2070_v55 = vmul.f32 %v2069_v41, %v4288_v27  ;;  %v2108_v56 = vmul.f32 3.8918573e-05, %v4290_v28  ;;  %v2621_v36 = vld [vmem:[%s3812_s2 + $0x1f0] sm:$0xff]  ;;  %2680 = vmatpush.msrb.mxu0 %v2605_v35  ;;  %v2571_v35 = vld [vmem:[%s3812_s2 + $0x60] sm:$0xff] }
 0x8f2   : > { %v2142_v57 = vadd.f32 0.05243302, %v2141_v42  ;;  %v2153_v2 = vadd.f32 0.112945676, %v2152_v46  ;;  %v2182_v58 = vadd.f32 0.05243302, %v2181_v49  ;;  %v2099_v54 = vmul.f32 %v2098_v47, %v4290_v28  ;;  %2706 = vmatpush.msrb.mxu1 %v2621_v36 }
 0x8f3   : > { %v2193_v59 = vadd.f32 0.112945676, %v2192_v51  ;;  %v2060_v26 = vadd.f32 0.0036580483, %v2059_v53  ;;  %v2071_v63 = vadd.f32 0.014752088, %v2070_v55  ;;  %2681 = vmatpush.msrb.mxu0 %v2604_v38 }
 0x8f4   : > { %v2143_v6 = vmul.f32 %v2142_v57, %v4270_v13  ;;  %v2154_v7 = vmul.f32 %v2153_v2, %v4270_v13  ;;  %v2183_v8 = vmul.f32 %v2182_v58, %v4272_v44  ;;  %v2100_v10 = vadd.f32 0.0036580483, %v2099_v54  ;;  %v2620_v42 = vld [vmem:[%s3812_s2 + $0x1e8] sm:$0xff]  ;;  %v2574_v47 = vld [vmem:[%s3812_s2 + $0x78] sm:$0xff]  ;;  %v2603_v2 = vld [vmem:[%s3812_s2 + $0x160] sm:$0xff] }
 0x8f5   : > { %v2194_v17 = vmul.f32 %v2193_v59, %v4272_v44  ;;  %v2061_v18 = vmul.f32 %v2060_v26, %v4288_v27  ;;  %v2072_v21 = vmul.f32 %v2071_v63, %v4288_v27  ;;  %v2109_v20 = vadd.f32 0.001143296, %v2108_v56  ;;  %v2025_v56 = vpop.f32.mrf.mxu1  ;;  %2707 = vmatpush.msrb.mxu1 %v2620_v42  ;;  %v2590_v57 = vld [vmem:[%s3812_s2 + $0xf8] sm:$0xff]  ;;  %2627 = vmatpush.msrb.mxu2 %v2574_v47  ;;  %v2619_v58 = vld [vmem:[%s3812_s2 + $0x1e0] sm:$0xff]  ;;  %v2573_v54 = vld [vmem:[%s3812_s2 + $0x70] sm:$0xff]  ;;  %v1947_v26 = vpop.f32.mrf.mxu2 }
 0x8f6   : > { %v2144_v22 = vadd.f32 0.18741608, %v2143_v6  ;;  %v2155_v23 = vadd.f32 0.4994258, %v2154_v7  ;;  %v2184_v24 = vadd.f32 0.18741608, %v2183_v8  ;;  %v2101_v9 = vmul.f32 %v2100_v10, %v4290_v28  ;;  %2653 = vmatpush.msra.mxu3 %v2590_v57  ;;  %v1973_v63 = vpop.f32.mrf.mxu3  ;;  %2682 = vmatpush.msrb.mxu0 %v2603_v2 }
 0x8f7   : > { %v2195_v29 = vadd.f32 0.4994258, %v2194_v17  ;;  %v2062_v30 = vadd.f32 0.05243302, %v2061_v18  ;;  %v2073_v25 = vadd.f32 0.112945676, %v2072_v21  ;;  %v2110_v31 = vmul.f32 %v2109_v20, %v4290_v28  ;;  %2708 = vmatpush.msrb.mxu1 %v2619_v58  ;;  %2628 = vmatpush.msrb.mxu2 %v2573_v54 }
 0x8f8   : > { %v2145_v32 = vmul.f32 %v2144_v22, %v4270_v13  ;;  %v2156_v33 = vmul.f32 %v2155_v23, %v4270_v13  ;;  %v2185_v49 = vmul.f32 %v2184_v24, %v4272_v44  ;;  %v4333_v13 = vmul.f32 0.70710677, %v4308_v0  ;;  %v2589_v6 = vld [vmem:[%s3812_s2 + $0xf0] sm:$0xff]  ;;  %v2602_v7 = vld [vmem:[%s3812_s2 + $0x158] sm:$0xff]  ;;  %v2572_v18 = vld [vmem:[%s3812_s2 + $0x68] sm:$0xff] }
 0x8f9   : > { %v2196_v39 = vmul.f32 %v2195_v29, %v4272_v44  ;;  %v2063_v40 = vmul.f32 %v2062_v30, %v4288_v27  ;;  %v2074_v60 = vmul.f32 %v2073_v25, %v4288_v27  ;;  %v2111_v41 = vadd.f32 0.014752088, %v2110_v31  ;;  %v2618_v8 = vld [vmem:[%s3812_s2 + $0x1d8] sm:$0xff]  ;;  %2654 = vmatpush.msra.mxu3 %v2589_v6  ;;  %v2588_v21 = vld [vmem:[%s3812_s2 + $0xe8] sm:$0xff]  ;;  %2683 = vmatpush.msrb.mxu0 %v2602_v7  ;;  %v2617_v30 = vld [vmem:[%s3812_s2 + $0x1d0] sm:$0xff] }
 0x8fa   : > { %v4329_v46 = vadd.f32 1.0, %v2156_v33  ;;  %v2102_v53 = vadd.f32 0.05243302, %v2101_v9  ;;  %v2146_v44 = vadd.f32 1.1283791, %v2145_v32  ;;  %v4349_v10 = vmul.f32 0.5, %v4245_v1  ;;  %2709 = vmatpush.msrb.mxu1 %v2618_v8  ;;  %2629 = vmatpush.msrb.mxu2 %v2572_v18 }
 0x8fb   : > { %v4336_v50 = vadd.f32 1.0, %v2196_v39  ;;  %v2075_v51 = vadd.f32 0.4994258, %v2074_v60  ;;  %v2112_v55 = vmul.f32 %v2111_v41, %v4290_v28  ;;  %v2064_v59 = vadd.f32 0.18741608, %v2063_v40  ;;  %2655 = vmatpush.msra.mxu3 %v2588_v21  ;;  %2684 = vmatpush.msrb.mxu0 %v2601_v3  ;;  %v2587_v36 = vld [vmem:[%s3812_s2 + $0xe0] sm:$0xff] }
 0x8fc   : > { %3336 = vrcp.f32 %v4329_v46  ;;  %v2186_v16 = vadd.f32 1.1283791, %v2185_v49  ;;  %v4355_v17 = vadd.f32 %v2025_v56, %v4242_v62  ;;  %v4360_v20 = vmul.f32 0.5, %v4265_v11  ;;  %2710 = vmatpush.msrb.mxu1 %v2617_v30  ;;  %v2600_v38 = vld [vmem:[%s3812_s2 + $0x148] sm:$0xff]  ;;  %2630 = vmatpush.msrb.mxu2 %v2571_v35  ;;  %v2569_v2 = vld [vmem:[%s3812_s2 + $0x50] sm:$0xff]  ;;  %v2614_v3 = vld [vmem:[%s3812_s2 + $0x1b8] sm:$0xff] }
 0x8fd   : > { %3338 = vrcp.f32 %v4336_v50  ;;  %v2076_v22 = vmul.f32 %v2075_v51, %v4288_v27  ;;  %v2113_v23 = vadd.f32 0.112945676, %v2112_v55  ;;  %v2295_v1 = vmul.f32 %v4333_v13, %v4333_v13  ;;  %2656 = vmatpush.msra.mxu3 %v2587_v36  ;;  %v2616_v60 = vld [vmem:[%s3812_s2 + $0x1c8] sm:$0xff]  ;;  %2685 = vmatpush.msrb.mxu0 %v2600_v38  ;;  %v2586_v51 = vld [vmem:[%s3812_s2 + $0xd8] sm:$0xff]  ;;  %v2613_v35 = vld [vmem:[%s3812_s2 + $0x1b0] sm:$0xff] }
 0x8fe   : > { %v2167_v24 = vand.u32 2147483647, %v4329_v46  ;;  %v2103_v9 = vmul.f32 %v2102_v53, %v4290_v28  ;;  %v4369_v29 = vadd.f32 %v1947_v26, %v4250_v19  ;;  %v4372_v11 = vadd.f32 %v1973_v63, %v4252_v4  ;;  %2711 = vmatpush.msrb.mxu1 %v2616_v60  ;;  %v2599_v53 = vld [vmem:[%s3812_s2 + $0x140] sm:$0xff]  ;;  %v2585_v63 = vld [vmem:[%s3812_s2 + $0xd0] sm:$0xff] }
 0x8ff   : > { %v4376_v25 = vmul.f32 %v2146_v44, %v4255_v5  ;;  %v2065_v31 = vmul.f32 %v2064_v59, %v4288_v27  ;;  %v4379_v32 = vadd.f32 1.0, %v2076_v22  ;;  %v2114_v33 = vmul.f32 %v2113_v23, %v4290_v28  ;;  %2657 = vmatpush.msra.mxu3 %v2586_v51  ;;  %v2615_v44 = vld [vmem:[%s3812_s2 + $0x1c0] sm:$0xff]  ;;  %2686 = vmatpush.msrb.mxu0 %v2599_v53 }
 0x900   : > { %vm2163_vm9 = vweird.f32 %v4329_v46  ;;  %v2169_v5 = vand.u32 2147483648, %v4329_v46  ;;  %v4390_v27 = vmul.f32 %v2186_v16, %v4258_v43  ;;  %v4393_v40 = vmul.f32 0.70710677, %v4355_v17  ;;  %v2570_v43 = vld [vmem:[%s3812_s2 + $0x58] sm:$0xff]  ;;  %2712 = vmatpush.msrb.mxu1 %v2615_v44  ;;  %v2567_v36 = vld [vmem:[%s3812_s2 + $0x40] sm:$0xff] }
 0x901   : > { %v2207_v49 = vand.u32 2147483647, %v4336_v50  ;;  %v2209_v47 = vand.u32 2147483648, %v4336_v50  ;;  %3340 = vrcp.f32 %v4379_v32  ;;  %vm4406_vm10 = vcmp.eq.f32.partialorder %v2167_v24, 8.507059e+37  ;;  %2631 = vmatpush.msrb.mxu2 %v2570_v43  ;;  %2658 = vmatpush.msra.mxu3 %v2585_v63  ;;  %v2598_v16 = vld [vmem:[%s3812_s2 + $0x138] sm:$0xff]  ;;  %v2568_v24 = vld [vmem:[%s3812_s2 + $0x48] sm:$0xff] }
 0x902   : > { %v4385_v39 = vpop.eup %3336  ;;  %vm2203_vm11 = vweird.f32 %v4336_v50  ;;  %v2104_v57 = vadd.f32 0.18741608, %v2103_v9  ;;  %v2066_v54 = vadd.f32 1.1283791, %v2065_v31  ;;  %v2115_v59 = vadd.f32 0.4994258, %v2114_v33  ;;  %2687 = vmatpush.msrb.mxu0 %v2598_v16  ;;  %2713 = vmatpush.msrb.mxu1 %v2614_v3 }
 0x903   : > { %v4396_v41 = vpop.eup %3338  ;;  %v2159_v42 = vmul.f32 %v4385_v39, %v4329_v46  ;;  %v2335_v26 = vmul.f32 %v4393_v40, %v4393_v40  ;;  %vm2164_vm12 = vweird.f32 %v4385_v39  ;;  %v2170_v6 = vor.u32 1.1754944e-38, %v2169_v5  ;;  %2632 = vmatpush.msrb.mxu2 %v2569_v2  ;;  %v2597_v33 = vld [vmem:[%s3812_s2 + $0x130] sm:$0xff]  ;;  %v2611_v16 = vld [vmem:[%s3812_s2 + $0x1a0] sm:$0xff] }
 0x904   : > { %v2199_v56 = vmul.f32 %v4396_v41, %v4336_v50  ;;  %v4419_v8 = vmin.f32 %v2295_v1, 16.0  ;;  %vm4423_vm13 = vcmp.eq.f32.partialorder %v2207_v49, 8.507059e+37  ;;  %v2210_v22 = vor.u32 1.1754944e-38, %v2209_v47  ;;  %v2584_v1 = vld [vmem:[%s3812_s2 + $0xc8] sm:$0xff]  ;;  %vm4446_vm15 = vmor %vm2163_vm9, %vm2164_vm12  ;;  %2688 = vmatpush.msrb.mxu0 %v2597_v33  ;;  %v2583_v47 = vld [vmem:[%s3812_s2 + $0xc0] sm:$0xff]  ;;  %2714 = vmatpush.msrb.mxu1 %v2613_v35 }
 0x905   : > { %v2160_v58 = vsub.f32 1.0, %v2159_v42  ;;  %v2116_v23 = vmul.f32 %v2115_v59, %v4290_v28  ;;  %vm2204_vm14 = vweird.f32 %v4396_v41  ;;  %v2105_v30 = vmul.f32 %v2104_v57, %v4290_v28  ;;  %2633 = vmatpush.msrb.mxu2 %v2568_v24  ;;  %2659 = vmatpush.msra.mxu3 %v2584_v1  ;;  %v2566_v57 = vld [vmem:[%s3812_s2 + $0x38] sm:$0xff]  ;;  %v2595_v59 = vld [vmem:[%s3812_s2 + $0x120] sm:$0xff]  ;;  %v2609_v28 = vld [vmem:[%s3812_s2 + $0x190] sm:$0xff] }
 0x906   : > { %v2200_v7 = vsub.f32 1.0, %v2199_v56  ;;  %v4434_v31 = vmin.f32 %v2335_v26, 16.0  ;;  %v4451_v60 = vmul.f32 %v2066_v54, %v4275_v14  ;;  %v2087_v42 = vand.u32 2147483647, %v4379_v32  ;;  %v2596_v14 = vld [vmem:[%s3812_s2 + $0x128] sm:$0xff]  ;;  %vm4472_vm0 = vmor %vm2203_vm11, %vm2204_vm14  ;;  %v2594_v24 = vld [vmem:[%s3812_s2 + $0x118] sm:$0xff] }
 0x907   : > { %v2161_v18 = vmul.f32 %v4385_v39, %v2160_v58  ;;  %v4439_v38 = vpop.eup %3340  ;;  %v4454_v49 = vadd.f32 1.0, %v2116_v23  ;;  %v2089_v51 = vand.u32 2147483648, %v4379_v32  ;;  %v2297_v53 = vmul.f32 2.1237322e-06, %v4419_v8  ;;  %2634 = vmatpush.msrb.mxu2 %v2567_v36  ;;  %v2612_v56 = vld [vmem:[%s3812_s2 + $0x1a8] sm:$0xff]  ;;  %2660 = vmatpush.msra.mxu3 %v2583_v47  ;;  %v2581_v23 = vld [vmem:[%s3812_s2 + $0xb0] sm:$0xff] }
 0x908   : > { %v2201_v9 = vmul.f32 %v4396_v41, %v2200_v7  ;;  %v2079_v46 = vmul.f32 %v4439_v38, %v4379_v32  ;;  %v4478_v58 = vmul.f32 0.70710677, %v4369_v29  ;;  %v4481_v54 = vmul.f32 0.70710677, %v4372_v11  ;;  %2689 = vmatpush.msrb.mxu0 %v2596_v14  ;;  %2715 = vmatpush.msrb.mxu1 %v2612_v56  ;;  %v2610_v1 = vld [vmem:[%s3812_s2 + $0x198] sm:$0xff]  ;;  %v2608_v14 = vld [vmem:[%s3812_s2 + $0x188] sm:$0xff] }
 0x909   : > { %v2162_v5 = vadd.f32 %v4385_v39, %v2161_v18  ;;  %3342 = vrcp.f32 %v4454_v49  ;;  %v2337_v7 = vmul.f32 2.1237322e-06, %v4434_v31  ;;  %2635 = vmatpush.msrb.mxu2 %v2566_v57  ;;  %v2565_v18 = vld [vmem:[%s3812_s2 + $0x30] sm:$0xff]  ;;  %vm4497_vm2 = vcmp.eq.f32.partialorder %v2087_v42, 8.507059e+37  ;;  %v2563_v42 = vld [vmem:[%s3812_s2 + $0x20] sm:$0xff] }
 0x90a   : > { %v2202_v43 = vadd.f32 %v4396_v41, %v2201_v9  ;;  %v2080_v63 = vsub.f32 1.0, %v2079_v46  ;;  %2690 = vmatpush.msrb.mxu0 %v2595_v59  ;;  %v2564_v9 = vld [vmem:[%s3812_s2 + $0x28] sm:$0xff]  ;;  %vm2084_vm3 = vweird.f32 %v4439_v38  ;;  %v2298_v21 = vadd.f32 0.00028619796, %v2297_v53  ;;  %2716 = vmatpush.msrb.mxu1 %v2611_v16  ;;  %v2578_v16 = vld [vmem:[%s3812_s2 + $0x98] sm:$0xff] }
 0x90b   : > { %v2166_v44 = vsel %vm4446_vm15, %v4385_v39, %v2162_v5  ;;  %v2582_v39 = vld [vmem:[%s3812_s2 + $0xb8] sm:$0xff]  ;;  %2636 = vmatpush.msrb.mxu2 %v2565_v18  ;;  %v2090_v36 = vor.u32 1.1754944e-38, %v2089_v51  ;;  %v2215_v5 = vmul.f32 %v4478_v58, %v4478_v58  ;;  %vm2083_vm4 = vweird.f32 %v4379_v32  ;;  %v2579_v51 = vld [vmem:[%s3812_s2 + $0xa0] sm:$0xff]  ;;  %v2592_v53 = vld [vmem:[%s3812_s2 + $0x108] sm:$0xff] }
 0x90c   : > { %v2171_v50 = vsel %vm4406_vm10, %v2170_v6, %v2166_v44  ;;  %v2206_v26 = vsel %vm4472_vm0, %v4396_v41, %v2202_v43  ;;  %v4501_v41 = vadd.f32 1.1283791, %v2105_v30  ;;  %2661 = vmatpush.msra.mxu3 %v2582_v39  ;;  %v2593_v30 = vld [vmem:[%s3812_s2 + $0x110] sm:$0xff]  ;;  %2691 = vmatpush.msrb.mxu0 %v2594_v24  ;;  %v2338_v46 = vadd.f32 0.00028619796, %v2337_v7  ;;  %vm4526_vm5 = vmor %vm2083_vm4, %vm2084_vm3  ;;  %v2562_v39 = vld [vmem:[%s3812_s2 + $0x18] sm:$0xff] }
 0x90d   : > { %v2172_v3 = vmul.f32 %v2171_v50, %v4376_v25  ;;  %v2211_v55 = vsel %vm4423_vm13, %v2210_v22, %v2206_v26  ;;  %v2081_v25 = vmul.f32 %v4439_v38, %v2080_v63  ;;  %v2580_v22 = vld [vmem:[%s3812_s2 + $0xa8] sm:$0xff]  ;;  %2717 = vmatpush.msrb.mxu1 %v2610_v1  ;;  %2637 = vmatpush.msrb.mxu2 %v2564_v9  ;;  %v4530_v2 = vmin.f32 %v2215_v5, 16.0  ;;  %v2591_v18 = vld [vmem:[%s3812_s2 + $0x100] sm:$0xff] }
 0x90e   : > { %v2212_v33 = vmul.f32 %v2211_v55, %v4390_v27  ;;  %v2255_v27 = vmul.f32 %v4481_v54, %v4481_v54  ;;  %2662 = vmatpush.msra.mxu3 %v2581_v23  ;;  %2692 = vmatpush.msrb.mxu0 %v2593_v30  ;;  %v2308_v59 = vmul.f32 3.8918573e-05, %v4419_v8  ;;  %v2299_v7 = vmul.f32 %v2298_v21, %v4419_v8  ;;  %v2575_v44 = vld [vmem:[%s3812_s2 + $0x80] sm:$0xff] }
 0x90f   : > { %v3126_v35 = vclamps-f32 %v2172_v3, 1.0  ;;  %v2082_v43 = vadd.f32 %v4439_v38, %v2081_v25  ;;  %v4522_v56 = vpop.eup %3342  ;;  %2718 = vmatpush.msrb.mxu1 %v2609_v28  ;;  %2638 = vmatpush.msrb.mxu2 %v2563_v42  ;;  %v2127_v55 = vand.u32 2147483647, %v4454_v49  ;;  %v2129_v24 = vand.u32 2147483648, %v4454_v49  ;;  %v2576_v42 = vld [vmem:[%s3812_s2 + $0x88] sm:$0xff] }
 0x910   : > { %v3127_v47 = vclamps-f32 %v2212_v33, 1.0  ;;  %v4532_v32 = vmin.f32 %v2255_v27, 16.0  ;;  %2663 = vmatpush.msra.mxu3 %v2580_v22  ;;  %v2119_v63 = vmul.f32 %v4522_v56, %v4454_v49  ;;  %2693 = vmatpush.msrb.mxu0 %v2592_v53  ;;  %v2217_v25 = vmul.f32 2.1237322e-06, %v4530_v2  ;;  %v2577_v22 = vld [vmem:[%s3812_s2 + $0x90] sm:$0xff]  ;;  %v2559_v53 = vld [vmem:[%s3812_s2] sm:$0xff] }
 0x911   : > { %v2537_v57 = vadd.f32 1.0, %v3126_v35  ;;  %v2086_v26 = vsel %vm4526_vm5, %v4439_v38, %v2082_v43  ;;  %v2607_v38 = vld [vmem:[%s3812_s2 + $0x180] sm:$0xff]  ;;  %2719 = vmatpush.msrb.mxu1 %v2608_v14  ;;  %2639 = vmatpush.msrb.mxu2 %v2562_v39  ;;  %vm2124_vm6 = vweird.f32 %v4522_v56  ;;  %v2339_v6 = vmul.f32 %v2338_v46, %v4434_v31 }
 0x912   : > { %v2538_v50 = vadd.f32 1.0, %v3127_v47  ;;  %v2091_v3 = vsel %vm4497_vm2, %v2090_v36, %v2086_v26  ;;  %2664 = vmatpush.msra.mxu3 %v2579_v51  ;;  %v2120_v33 = vsub.f32 1.0, %v2119_v63  ;;  %v2257_v21 = vmul.f32 2.1237322e-06, %v4532_v32  ;;  %2694 = vmatpush.msrb.mxu0 %v2591_v18  ;;  %v2560_v36 = vld [vmem:[%s3812_s2 + $0x8] sm:$0xff] }
 0x913   : > { %v2549_v23 = vmul.f32 %v2537_v57, %v4349_v10  ;;  %v2092_v9 = vmul.f32 %v2091_v3, %v4451_v60  ;;  %v2561_v10 = vld [vmem:[%s3812_s2 + $0x10] sm:$0xff]  ;;  %v2218_v35 = vadd.f32 0.00028619796, %v2217_v25  ;;  %2720 = vmatpush.msrb.mxu1 %v2607_v38  ;;  %v2348_v5 = vmul.f32 3.8918573e-05, %v4434_v31 }
 0x914   : > { %v2550_v1 = vmul.f32 %v2538_v50, %v4352_v15  ;;  %2665 = vmatpush.msra.mxu3 %v2578_v16  ;;  %v2309_v15 = vadd.f32 0.001143296, %v2308_v59  ;;  %v2121_v60 = vmul.f32 %v4522_v56, %v2120_v33  ;;  %vm2123_vm7 = vweird.f32 %v4454_v49  ;;  %2640 = vmatpush.msrb.mxu2 %v2561_v10 }
 0x915   : > { %v3124_v30 = vclamps-f32 %v2092_v9, 1.0  ;;  %2695 = vmatmul.f32.vlgmr.msrb.gmra.mxu0 %v2549_v23  ;;  %v2300_v27 = vadd.f32 0.0036580483, %v2299_v7  ;;  %v2258_v28 = vadd.f32 0.00028619796, %v2257_v21  ;;  %v2219_v51 = vmul.f32 %v2218_v35, %v4530_v2  ;;  %vm2125_vm8 = vmor %vm2123_vm7, %vm2124_vm6 }
 0x916   : > { %2721 = vmatmul.f32.vlgmr.msrb.gmra.mxu1 %v2550_v1  ;;  %v2310_v47 = vmul.f32 %v2309_v15, %v4419_v8  ;;  %v2122_v46 = vadd.f32 %v4522_v56, %v2121_v60  ;;  %2666 = vmatpush.msra.mxu3 %v2577_v22  ;;  %v2349_v14 = vadd.f32 0.001143296, %v2348_v5  ;;  %v2107_v57 = vmul.f32 %v4501_v41, %v4278_v48 }
 0x917   : > { %v2535_v43 = vadd.f32 1.0, %v3124_v30  ;;  %vm2128_vm9 = vcmp.eq.f32.partialorder %v2127_v55, 8.507059e+37  ;;  %v2130_v49 = vor.u32 1.1754944e-38, %v2129_v24  ;;  %2641 = vmatpush.msrb.mxu2 %v2560_v36  ;;  %v2340_v26 = vadd.f32 0.0036580483, %v2339_v6 }
 0x918   : > { %v2311_v39 = vadd.f32 0.014752088, %v2310_v47  ;;  %v2126_v50 = vsel %vm2125_vm8, %v4522_v56, %v2122_v46  ;;  %2667 = vmatpush.msra.mxu3 %v2576_v42  ;;  %v2350_v63 = vmul.f32 %v2349_v14, %v4434_v31  ;;  %v2220_v16 = vadd.f32 0.0036580483, %v2219_v51 }
 0x919   : > { %v2547_v59 = vmul.f32 %v2535_v43, %v4360_v20  ;;  %v2131_v7 = vsel %vm2128_vm9, %v2130_v49, %v2126_v50  ;;  %v2259_v48 = vmul.f32 %v2258_v28, %v4532_v32  ;;  %2642 = vmatpush.msrb.mxu2 %v2559_v53  ;;  %v2228_v3 = vmul.f32 3.8918573e-05, %v4530_v2 }
 0x91a   : > { %v2312_v41 = vmul.f32 %v2311_v39, %v4419_v8  ;;  %v2132_v18 = vmul.f32 %v2131_v7, %v2107_v57  ;;  %2668 = vmatpush.msra.mxu3 %v2575_v44  ;;  %v2351_v23 = vadd.f32 0.014752088, %v2350_v63  ;;  %v2301_v20 = vmul.f32 %v2300_v27, %v4419_v8 }
 0x91b   : > { %2643 = vmatmul.f32.vlgmr.msrb.gmra.mxu2 %v2547_v59  ;;  %v2268_v55 = vmul.f32 3.8918573e-05, %v4532_v32  ;;  %v2341_v38 = vmul.f32 %v2340_v26, %v4434_v31  ;;  %v2229_v9 = vadd.f32 0.001143296, %v2228_v3  ;;  %v2221_v33 = vmul.f32 %v2220_v16, %v4530_v2 }
 0x91c   : > { %v2313_v56 = vadd.f32 0.112945676, %v2312_v41  ;;  %v3125_v24 = vclamps-f32 %v2132_v18, 1.0  ;;  %v2352_v1 = vmul.f32 %v2351_v23, %v4434_v31  ;;  %v2260_v25 = vadd.f32 0.0036580483, %v2259_v48 }
 0x91d   : > { %v2269_v6 = vadd.f32 0.001143296, %v2268_v55  ;;  %v2032_v21 = vmul.f32 0.5, %v4268_v12  ;;  %v2230_v30 = vmul.f32 %v2229_v9, %v4530_v2  ;;  %v2302_v60 = vadd.f32 0.05243302, %v2301_v20 }
 0x91e   : > { %v2314_v10 = vmul.f32 %v2313_v56, %v4419_v8  ;;  %v2536_v22 = vadd.f32 1.0, %v3125_v24  ;;  %v2353_v15 = vadd.f32 0.112945676, %v2352_v1  ;;  %v2342_v27 = vadd.f32 0.05243302, %v2341_v38 }
 0x91f   : > { %v2270_v36 = vmul.f32 %v2269_v6, %v4532_v32  ;;  %v2231_v42 = vadd.f32 0.014752088, %v2230_v30  ;;  %v2222_v47 = vadd.f32 0.05243302, %v2221_v33  ;;  %v2261_v43 = vmul.f32 %v2260_v25, %v4532_v32 }
 0x920   : > { %v2315_v35 = vadd.f32 0.4994258, %v2314_v10  ;;  %v2548_v5 = vmul.f32 %v2536_v22, %v2032_v21  ;;  %v2354_v28 = vmul.f32 %v2353_v15, %v4434_v31  ;;  %v2303_v14 = vmul.f32 %v2302_v60, %v4419_v8 }
 0x921   : > { %v2271_v51 = vadd.f32 0.014752088, %v2270_v36  ;;  %v2232_v53 = vmul.f32 %v2231_v42, %v4530_v2  ;;  %v2343_v44 = vmul.f32 %v2342_v27, %v4434_v31  ;;  %v2223_v50 = vmul.f32 %v2222_v47, %v4530_v2 }
 0x922   : > { %v2316_v46 = vmul.f32 %v2315_v35, %v4419_v8  ;;  %2669 = vmatmul.f32.vlgmr.msra.gmra.mxu3 %v2548_v5  ;;  %v2355_v12 = vadd.f32 0.4994258, %v2354_v28  ;;  %v2262_v26 = vadd.f32 0.05243302, %v2261_v43  ;;  %v2304_v16 = vadd.f32 0.18741608, %v2303_v14 }
 0x923   : > { %v2272_v49 = vmul.f32 %v2271_v51, %v4532_v32  ;;  %v2233_v59 = vadd.f32 0.112945676, %v2232_v53  ;;  %v2344_v41 = vadd.f32 0.18741608, %v2343_v44  ;;  %v2224_v18 = vadd.f32 0.18741608, %v2223_v50 }
 0x924   : > { %v2317_v57 = vadd.f32 1.0, %v2316_v46  ;;  %v2356_v39 = vmul.f32 %v2355_v12, %v4434_v31  ;;  %v2263_v23 = vmul.f32 %v2262_v26, %v4532_v32  ;;  %v2305_v55 = vmul.f32 %v2304_v16, %v4419_v8 }
 0x925   : > { %v2234_v7 = vmul.f32 %v2233_v59, %v4530_v2  ;;  %v2273_v48 = vadd.f32 0.112945676, %v2272_v49  ;;  %v2345_v1 = vmul.f32 %v2344_v41, %v4434_v31  ;;  %v2225_v33 = vmul.f32 %v2224_v18, %v4530_v2 }
 0x926   : > { %3344 = vrcp.f32 %v2317_v57  ;;  %v2357_v63 = vadd.f32 1.0, %v2356_v39  ;;  %v2264_v25 = vadd.f32 0.18741608, %v2263_v23  ;;  %v2037_v22 = vmul.f32 0.5, %v4308_v0 }
 0x927   : > { %v2235_v3 = vadd.f32 0.4994258, %v2234_v7  ;;  %v2274_v20 = vmul.f32 %v2273_v48, %v4532_v32  ;;  %v2306_v30 = vadd.f32 1.1283791, %v2305_v55  ;;  %v2329_v60 = vand.u32 2147483648, %v2317_v57 }
 0x928   : > { %3346 = vrcp.f32 %v2357_v63  ;;  %v2327_v31 = vand.u32 2147483647, %v2317_v57  ;;  %v2226_v5 = vadd.f32 1.1283791, %v2225_v33  ;;  %v2265_v27 = vmul.f32 %v2264_v25, %v4532_v32 }
 0x929   : > { %v2236_v24 = vmul.f32 %v2235_v3, %v4530_v2  ;;  %v2275_v38 = vadd.f32 0.4994258, %v2274_v20  ;;  %v2346_v2 = vadd.f32 1.1283791, %v2345_v1  ;;  %vm2323_vm11 = vweird.f32 %v2317_v57 }
 0x92a   : > { %v2369_v47 = vand.u32 2147483648, %v2357_v63  ;;  %v2330_v0 = vor.u32 1.1754944e-38, %v2329_v60  ;;  %v2367_v46 = vand.u32 2147483647, %v2357_v63  ;;  %v2307_v51 = vmul.f32 %v2306_v30, %v4333_v13 }
 0x92b   : > { %v4603_v10 = vadd.f32 1.0, %v2236_v24  ;;  %v2276_v6 = vmul.f32 %v2275_v38, %v4532_v32  ;;  %v2038_v12 = vmul.f32 0.5, %v4355_v17  ;;  %vm2328_vm14 = vcmp.eq.f32.partialorder %v2327_v31, 8.507059e+37 }
 0x92c   : > { %v3345_v56 = vpop.eup %3344  ;;  %vm2363_vm15 = vweird.f32 %v2357_v63  ;;  %v2347_v44 = vmul.f32 %v2346_v2, %v4393_v40  ;;  %v2370_v59 = vor.u32 1.1754944e-38, %v2369_v47  ;;  %v2227_v26 = vmul.f32 %v2226_v5, %v4478_v58 }
 0x92d   : > { %v2319_v9 = vmul.f32 %v3345_v56, %v2317_v57  ;;  %3348 = vrcp.f32 %v4603_v10  ;;  %vm2324_vm10 = vweird.f32 %v3345_v56  ;;  %v4608_v36 = vadd.f32 1.0, %v2276_v6 }
 0x92e   : > { %v3347_v21 = vpop.eup %3346  ;;  %vm2325_vm12 = vmor %vm2323_vm11, %vm2324_vm10  ;;  %v2247_v57 = vand.u32 2147483647, %v4603_v10  ;;  %v2266_v13 = vadd.f32 1.1283791, %v2265_v27  ;;  %vm2368_vm2 = vcmp.eq.f32.partialorder %v2367_v46, 8.507059e+37  ;;  %vm2243_vm3 = vweird.f32 %v4603_v10 }
 0x92f   : > { %v2320_v15 = vsub.f32 1.0, %v2319_v9  ;;  %v2359_v8 = vmul.f32 %v3347_v21, %v2357_v63  ;;  %3350 = vrcp.f32 %v4608_v36  ;;  %vm2364_vm13 = vweird.f32 %v3347_v21 }
 0x930   : > { %vm2365_vm0 = vmor %vm2363_vm15, %vm2364_vm13  ;;  %v2249_v63 = vand.u32 2147483648, %v4603_v10  ;;  %vm4620_vm4 = vcmp.eq.f32.partialorder %v2247_v57, 8.507059e+37  ;;  %v2289_v20 = vand.u32 2147483648, %v4608_v36  ;;  %vm2283_vm8 = vweird.f32 %v4608_v36 }
 0x931   : > { %v2321_v35 = vmul.f32 %v3345_v56, %v2320_v15  ;;  %v2360_v28 = vsub.f32 1.0, %v2359_v8  ;;  %v2267_v47 = vmul.f32 %v2266_v13, %v4481_v54 }
 0x932   : > { %v2250_v6 = vor.u32 1.1754944e-38, %v2249_v63 }
 0x933   : > { %v2322_v42 = vadd.f32 %v3345_v56, %v2321_v35  ;;  %v2361_v43 = vmul.f32 %v3347_v21, %v2360_v28  ;;  %v3349_v14 = vpop.eup %3348 }
 0x934   : > { %v2239_v50 = vmul.f32 %v3349_v14, %v4603_v10  ;;  %vm2244_vm5 = vweird.f32 %v3349_v14 }
 0x935   : > { %v2326_v53 = vsel %vm2325_vm12, %v3345_v56, %v2322_v42  ;;  %v2362_v32 = vadd.f32 %v3347_v21, %v2361_v43  ;;  %v3351_v17 = vpop.eup %3350  ;;  %vm2245_vm6 = vmor %vm2243_vm3, %vm2244_vm5 }
 0x936   : > { %v2331_v49 = vsel %vm2328_vm14, %v2330_v0, %v2326_v53  ;;  %v2240_v41 = vsub.f32 1.0, %v2239_v50  ;;  %v2279_v23 = vmul.f32 %v3351_v17, %v4608_v36  ;;  %vm2284_vm7 = vweird.f32 %v3351_v17 }
 0x937   : > { %v2332_v39 = vmul.f32 %v2331_v49, %v2307_v51  ;;  %v2366_v7 = vsel %vm2365_vm0, %v3347_v21, %v2362_v32  ;;  %v2287_v21 = vand.u32 2147483647, %v4608_v36  ;;  %vm2285_vm9 = vmor %vm2283_vm8, %vm2284_vm7 }
 0x938   : > { %v2371_v48 = vsel %vm2368_vm2, %v2370_v59, %v2366_v7  ;;  %v2241_v58 = vmul.f32 %v3349_v14, %v2240_v41  ;;  %v2280_v38 = vsub.f32 1.0, %v2279_v23 }
 0x939   : > { %v3130_v16 = vclamps-f32 %v2332_v39, 1.0  ;;  %v2372_v18 = vmul.f32 %v2371_v48, %v2347_v44  ;;  %vm2288_vm10 = vcmp.eq.f32.partialorder %v2287_v21, 8.507059e+37 }
 0x93a   : > { %v2242_v25 = vadd.f32 %v3349_v14, %v2241_v58  ;;  %v2281_v30 = vmul.f32 %v3351_v17, %v2280_v38 }
 0x93b   : > { %v2541_v3 = vadd.f32 1.0, %v3130_v16  ;;  %v3131_v24 = vclamps-f32 %v2372_v18, 1.0 }
 0x93c   : > { %v2002_v56 = vpop.f32.mrf.mxu0  ;;  %v2028_v55 = vpop.f32.mrf.mxu1  ;;  %v2282_v31 = vadd.f32 %v3351_v17, %v2281_v30 }
 0x93d   : > { %v4627_v1 = vadd.f32 %v2002_v56, %v4240_v61  ;;  %v4630_v9 = vadd.f32 %v2028_v55, %v4242_v62  ;;  %v2553_v33 = vmul.f32 %v2541_v3, %v2037_v22  ;;  %v2542_v15 = vadd.f32 1.0, %v3131_v24 }
 0x93e   : > { %v2246_v61 = vsel %vm2245_vm6, %v3349_v14, %v2242_v25  ;;  %v2290_v62 = vor.u32 1.1754944e-38, %v2289_v20  ;;  %v2286_v0 = vsel %vm2285_vm9, %v3351_v17, %v2282_v31 }
 0x93f   : > { %v4636_v60 = vmul.f32 0.70710677, %v4627_v1  ;;  %2698 = vmatmul.f32.gmra.mxu0 %v2553_v33  ;;  %v4640_v22 = vmul.f32 0.70710677, %v4630_v9  ;;  %v2554_v8 = vmul.f32 %v2542_v15, %v2038_v12  ;;  %v2251_v35 = vsel %vm4620_vm4, %v2250_v6, %v2246_v61 }
 0x940   : > { %v2252_v27 = vmul.f32 %v2251_v35, %v2227_v26  ;;  %v2291_v51 = vsel %vm2288_vm10, %v2290_v62, %v2286_v0  ;;  %v2036_v26 = vmul.f32 0.5, %v4372_v11 }
 0x941   : > { %v2455_v10 = vmul.f32 %v4636_v60, %v4636_v60  ;;  %v1950_v2 = vpop.f32.mrf.mxu2  ;;  %v1976_v5 = vpop.f32.mrf.mxu3  ;;  %v2495_v28 = vmul.f32 %v4640_v22, %v4640_v22  ;;  %2724 = vmatmul.f32.gmra.mxu1 %v2554_v8  ;;  %v2292_v53 = vmul.f32 %v2291_v51, %v2267_v47 }
 0x942   : > { %v4649_v36 = vadd.f32 %v1950_v2, %v4250_v19  ;;  %v4652_v42 = vadd.f32 %v1976_v5, %v4252_v4  ;;  %v3128_v46 = vclamps-f32 %v2252_v27, 1.0  ;;  %v2035_v4 = vmul.f32 0.5, %v4369_v29 }
 0x943   : > { %v4655_v43 = vmin.f32 %v2455_v10, 16.0  ;;  %v4657_v12 = vmin.f32 %v2495_v28, 16.0  ;;  %v3129_v32 = vclamps-f32 %v2292_v53, 1.0 }
 0x944   : > { %v4661_v19 = vmul.f32 0.70710677, %v4649_v36  ;;  %v2539_v49 = vadd.f32 1.0, %v3128_v46  ;;  %v4665_v54 = vmul.f32 0.70710677, %v4652_v42 }
 0x945   : > { %v2457_v14 = vmul.f32 2.1237322e-06, %v4655_v43  ;;  %v2468_v44 = vmul.f32 3.8918573e-05, %v4655_v43  ;;  %v2497_v59 = vmul.f32 2.1237322e-06, %v4657_v12 }
 0x946   : > { %v2551_v39 = vmul.f32 %v2539_v49, %v2035_v4  ;;  %v2375_v50 = vmul.f32 %v4661_v19, %v4661_v19  ;;  %v2540_v13 = vadd.f32 1.0, %v3129_v32  ;;  %v2415_v29 = vmul.f32 %v4665_v54, %v4665_v54 }
 0x947   : > { %v2458_v57 = vadd.f32 0.00028619796, %v2457_v14  ;;  %v2469_v7 = vadd.f32 0.001143296, %v2468_v44  ;;  %v2498_v41 = vadd.f32 0.00028619796, %v2497_v59 }
 0x948   : > { %2646 = vmatmul.f32.gmra.mxu2 %v2551_v39  ;;  %v2552_v16 = vmul.f32 %v2540_v13, %v2036_v26  ;;  %v4676_v63 = vmin.f32 %v2375_v50, 16.0  ;;  %v4678_v18 = vmin.f32 %v2415_v29, 16.0  ;;  %v2508_v20 = vmul.f32 3.8918573e-05, %v4657_v12 }
 0x949   : > { %v2459_v17 = vmul.f32 %v2458_v57, %v4655_v43  ;;  %v2470_v48 = vmul.f32 %v2469_v7, %v4655_v43  ;;  %v2499_v3 = vmul.f32 %v2498_v41, %v4657_v12 }
 0x94a   : > { %2672 = vmatmul.f32.gmra.mxu3 %v2552_v16  ;;  %v2377_v58 = vmul.f32 2.1237322e-06, %v4676_v63  ;;  %v2417_v56 = vmul.f32 2.1237322e-06, %v4678_v18  ;;  %v2509_v38 = vadd.f32 0.001143296, %v2508_v20 }
 0x94b   : > { %v2471_v40 = vadd.f32 0.014752088, %v2470_v48  ;;  %v2460_v23 = vadd.f32 0.0036580483, %v2459_v17  ;;  %v2500_v25 = vadd.f32 0.0036580483, %v2499_v3 }
 0x94c   : > { %v2378_v6 = vadd.f32 0.00028619796, %v2377_v58  ;;  %v2510_v21 = vmul.f32 %v2509_v38, %v4657_v12  ;;  %v2418_v15 = vadd.f32 0.00028619796, %v2417_v56  ;;  %v2388_v8 = vmul.f32 3.8918573e-05, %v4676_v63 }
 0x94d   : > { %v2472_v11 = vmul.f32 %v2471_v40, %v4655_v43  ;;  %v2461_v24 = vmul.f32 %v2460_v23, %v4655_v43  ;;  %v2428_v31 = vmul.f32 3.8918573e-05, %v4678_v18  ;;  %v2501_v10 = vmul.f32 %v2500_v25, %v4657_v12 }
 0x94e   : > { %v2511_v62 = vadd.f32 0.014752088, %v2510_v21  ;;  %v2379_v2 = vmul.f32 %v2378_v6, %v4676_v63  ;;  %v2389_v27 = vadd.f32 0.001143296, %v2388_v8  ;;  %v2419_v28 = vmul.f32 %v2418_v15, %v4678_v18 }
 0x94f   : > { %v2473_v55 = vadd.f32 0.112945676, %v2472_v11  ;;  %v2462_v61 = vadd.f32 0.05243302, %v2461_v24  ;;  %v2429_v0 = vadd.f32 0.001143296, %v2428_v31 }
 0x950   : > { %v2512_v5 = vmul.f32 %v2511_v62, %v4657_v12  ;;  %v2390_v53 = vmul.f32 %v2389_v27, %v4676_v63  ;;  %v2502_v14 = vadd.f32 0.05243302, %v2501_v10  ;;  %v2380_v4 = vadd.f32 0.0036580483, %v2379_v2 }
 0x951   : > { %v2474_v33 = vmul.f32 %v2473_v55, %v4655_v43  ;;  %v2463_v46 = vmul.f32 %v2462_v61, %v4655_v43  ;;  %v2420_v57 = vadd.f32 0.0036580483, %v2419_v28  ;;  %v2430_v44 = vmul.f32 %v2429_v0, %v4678_v18 }
 0x952   : > { %v2513_v51 = vadd.f32 0.112945676, %v2512_v5  ;;  %v2391_v32 = vadd.f32 0.014752088, %v2390_v53  ;;  %v2503_v13 = vmul.f32 %v2502_v14, %v4657_v12  ;;  %v2381_v29 = vmul.f32 %v2380_v4, %v4676_v63 }
 0x953   : > { %v2475_v30 = vadd.f32 0.4994258, %v2474_v33  ;;  %v2464_v39 = vadd.f32 0.18741608, %v2463_v46  ;;  %v2431_v26 = vadd.f32 0.014752088, %v2430_v44  ;;  %v2421_v48 = vmul.f32 %v2420_v57, %v4678_v18 }
 0x954   : > { %v2514_v49 = vmul.f32 %v2513_v51, %v4657_v12  ;;  %v2392_v50 = vmul.f32 %v2391_v32, %v4676_v63  ;;  %v2504_v20 = vadd.f32 0.18741608, %v2503_v13  ;;  %v2382_v56 = vadd.f32 0.05243302, %v2381_v29 }
 0x955   : > { %v2476_v35 = vmul.f32 %v2475_v30, %v4655_v43  ;;  %v2432_v41 = vmul.f32 %v2431_v26, %v4678_v18  ;;  %v2465_v40 = vmul.f32 %v2464_v39, %v4655_v43  ;;  %v2422_v24 = vadd.f32 0.05243302, %v2421_v48 }
 0x956   : > { %v2515_v59 = vadd.f32 0.4994258, %v2514_v49  ;;  %v2393_v17 = vadd.f32 0.112945676, %v2392_v50  ;;  %v2383_v61 = vmul.f32 %v2382_v56, %v4676_v63  ;;  %v2505_v8 = vmul.f32 %v2504_v20, %v4657_v12 }
 0x957   : > { %v2477_v47 = vadd.f32 1.0, %v2476_v35  ;;  %v2433_v58 = vadd.f32 0.112945676, %v2432_v41  ;;  %v2466_v6 = vadd.f32 1.1283791, %v2465_v40  ;;  %v2423_v27 = vmul.f32 %v2422_v24, %v4678_v18 }
 0x958   : > { %v2516_v7 = vmul.f32 %v2515_v59, %v4657_v12  ;;  %v2394_v3 = vmul.f32 %v2393_v17, %v4676_v63  ;;  %v2384_v51 = vadd.f32 0.18741608, %v2383_v61  ;;  %v2506_v12 = vadd.f32 1.1283791, %v2505_v8 }
 0x959   : > { %3352 = vrcp.f32 %v2477_v47  ;;  %v2489_v38 = vand.u32 2147483648, %v2477_v47  ;;  %v2434_v25 = vmul.f32 %v2433_v58, %v4678_v18  ;;  %v2487_v15 = vand.u32 2147483647, %v2477_v47 }
 0x95a   : > { %v2517_v11 = vadd.f32 1.0, %v2516_v7  ;;  %v2395_v33 = vadd.f32 0.4994258, %v2394_v3  ;;  %vm2483_vm12 = vweird.f32 %v2477_v47  ;;  %v2467_v5 = vmul.f32 %v2466_v6, %v4636_v60 }
 0x95b   : > { %v2435_v30 = vadd.f32 0.4994258, %v2434_v25  ;;  %v2490_v35 = vor.u32 1.1754944e-38, %v2489_v38  ;;  %vm2488_vm14 = vcmp.eq.f32.partialorder %v2487_v15, 8.507059e+37  ;;  %v2424_v4 = vadd.f32 0.18741608, %v2423_v27 }
 0x95c   : > { %3354 = vrcp.f32 %v2517_v11  ;;  %v2396_v43 = vmul.f32 %v2395_v33, %v4676_v63  ;;  %v2529_v32 = vand.u32 2147483648, %v2517_v11  ;;  %v2527_v44 = vand.u32 2147483647, %v2517_v11 }
 0x95d   : > { %v2436_v10 = vmul.f32 %v2435_v30, %v4678_v18  ;;  %v2041_v60 = vmul.f32 0.5, %v4627_v1  ;;  %v2385_v39 = vmul.f32 %v2384_v51, %v4676_v63  ;;  %vm2523_vm0 = vweird.f32 %v2517_v11 }
 0x95e   : > { %v2397_v31 = vadd.f32 1.0, %v2396_v43  ;;  %v2530_v29 = vor.u32 1.1754944e-38, %v2529_v32  ;;  %v2507_v17 = vmul.f32 %v2506_v12, %v4640_v22  ;;  %vm2528_vm3 = vcmp.eq.f32.partialorder %v2527_v44, 8.507059e+37 }
 0x95f   : > { %v3353_v16 = vpop.eup %3352  ;;  %v2437_v14 = vadd.f32 1.0, %v2436_v10  ;;  %v2386_v41 = vadd.f32 1.1283791, %v2385_v39  ;;  %v2042_v56 = vmul.f32 0.5, %v4630_v9 }
 0x960   : > { %v2479_v23 = vmul.f32 %v3353_v16, %v2477_v47  ;;  %vm2484_vm11 = vweird.f32 %v3353_v16  ;;  %3356 = vrcp.f32 %v2397_v31  ;;  %v2407_v3 = vand.u32 2147483647, %v2397_v31 }
 0x961   : > { %vm2485_vm13 = vmor %vm2483_vm12, %vm2484_vm11  ;;  %3358 = vrcp.f32 %v2437_v14  ;;  %v2409_v58 = vand.u32 2147483648, %v2397_v31  ;;  %v2387_v22 = vmul.f32 %v2386_v41, %v4661_v19  ;;  %vm2403_vm5 = vweird.f32 %v2397_v31 }
 0x962   : > { %v2480_v55 = vsub.f32 1.0, %v2479_v23  ;;  %v3355_v2 = vpop.eup %3354  ;;  %vm2408_vm7 = vcmp.eq.f32.partialorder %v2407_v3, 8.507059e+37  ;;  %v2449_v6 = vand.u32 2147483648, %v2437_v14  ;;  %v2447_v43 = vand.u32 2147483647, %v2437_v14 }
 0x963   : > { %v2519_v46 = vmul.f32 %v3355_v2, %v2517_v11  ;;  %vm2524_vm15 = vweird.f32 %v3355_v2  ;;  %v2410_v25 = vor.u32 1.1754944e-38, %v2409_v58  ;;  %vm2443_vm9 = vweird.f32 %v2437_v14 }
 0x964   : > { %v2481_v21 = vmul.f32 %v3353_v16, %v2480_v55  ;;  %vm2525_vm2 = vmor %vm2523_vm0, %vm2524_vm15  ;;  %v2450_v19 = vor.u32 1.1754944e-38, %v2449_v6  ;;  %vm2448_vm11 = vcmp.eq.f32.partialorder %v2447_v43, 8.507059e+37 }
 0x965   : > { %v2520_v47 = vsub.f32 1.0, %v2519_v46  ;;  %v2040_v46 = vmul.f32 0.5, %v4652_v42 }
 0x966   : > { %v2482_v62 = vadd.f32 %v3353_v16, %v2481_v21  ;;  %v3357_v50 = vpop.eup %3356 }
 0x967   : > { %v2521_v57 = vmul.f32 %v3355_v2, %v2520_v47  ;;  %v2399_v7 = vmul.f32 %v3357_v50, %v2397_v31  ;;  %v3359_v23 = vpop.eup %3358  ;;  %vm2404_vm4 = vweird.f32 %v3357_v50 }
 0x968   : > { %v2486_v28 = vsel %vm2485_vm13, %v3353_v16, %v2482_v62  ;;  %v2425_v16 = vmul.f32 %v2424_v4, %v4678_v18  ;;  %v2439_v11 = vmul.f32 %v3359_v23, %v2437_v14  ;;  %vm2405_vm6 = vmor %vm2403_vm5, %vm2404_vm4  ;;  %vm2444_vm8 = vweird.f32 %v3359_v23 }
 0x969   : > { %v2491_v0 = vsel %vm2488_vm14, %v2490_v35, %v2486_v28  ;;  %v2522_v26 = vadd.f32 %v3355_v2, %v2521_v57  ;;  %v2400_v1 = vsub.f32 1.0, %v2399_v7  ;;  %vm2445_vm10 = vmor %vm2443_vm9, %vm2444_vm8 }
 0x96a   : > { %v2492_v53 = vmul.f32 %v2491_v0, %v2467_v5  ;;  %v2426_v55 = vadd.f32 1.1283791, %v2425_v16  ;;  %v2440_v38 = vsub.f32 1.0, %v2439_v11 }
 0x96b   : > { %v2526_v48 = vsel %vm2525_vm2, %v3355_v2, %v2522_v26  ;;  %v2401_v20 = vmul.f32 %v3357_v50, %v2400_v1  ;;  %v2039_v2 = vmul.f32 0.5, %v4649_v36 }
 0x96c   : > { %v3134_v49 = vclamps-f32 %v2492_v53, 1.0  ;;  %v2531_v40 = vsel %vm2528_vm3, %v2530_v29, %v2526_v48  ;;  %v2441_v15 = vmul.f32 %v3359_v23, %v2440_v38  ;;  %v2427_v8 = vmul.f32 %v2426_v55, %v4665_v54  ;;  %v3273_v54 = vld [vmem:[%s816_s29] ss:$0 sm:$0xff] }
 0x96d   : > { %v2532_v63 = vmul.f32 %v2531_v40, %v2507_v17  ;;  %v2402_v18 = vadd.f32 %v3357_v50, %v2401_v20 }
 0x96e   : > { %v2545_v59 = vadd.f32 1.0, %v3134_v49  ;;  %v2442_v9 = vadd.f32 %v3359_v23, %v2441_v15 }
 0x96f   : > { %v3135_v24 = vclamps-f32 %v2532_v63, 1.0  ;;  %v2406_v21 = vsel %vm2405_vm6, %v3357_v50, %v2402_v18 }
 0x970   : > { %v2557_v13 = vmul.f32 %v2545_v59, %v2041_v60  ;;  %v2411_v61 = vsel %vm2408_vm7, %v2410_v25, %v2406_v21  ;;  %v2446_v31 = vsel %vm2445_vm10, %v3359_v23, %v2442_v9 }
 0x971   : > { %v2546_v33 = vadd.f32 1.0, %v3135_v24  ;;  %v2412_v62 = vmul.f32 %v2411_v61, %v2387_v22  ;;  %v2451_v10 = vsel %vm2448_vm11, %v2450_v19, %v2446_v31 }
 0x972   : > { %2701 = vmatmul.f32.gmra.mxu0 %v2557_v13  ;;  %v2452_v27 = vmul.f32 %v2451_v10, %v2427_v8 }
 0x973   : > { %v2558_v30 = vmul.f32 %v2546_v33, %v2042_v56  ;;  %v3132_v35 = vclamps-f32 %v2412_v62, 1.0 }
 0x974   : > { %v3133_v0 = vclamps-f32 %v2452_v27, 1.0 }
 0x975   : > { %2727 = vmatmul.f32.gmra.mxu1 %v2558_v30  ;;  %v2543_v5 = vadd.f32 1.0, %v3132_v35 }
 0x976   : > { %v2544_v51 = vadd.f32 1.0, %v3133_v0 }
 0x977   : > { %v2555_v28 = vmul.f32 %v2543_v5, %v2039_v2 }
 0x978   : > { %v2556_v53 = vmul.f32 %v2544_v51, %v2040_v46 }
 0x979   : > { %2649 = vmatmul.f32.gmra.mxu2 %v2555_v28 }
 0x97a   : > { %2675 = vmatmul.f32.gmra.mxu3 %v2556_v53 }
 0x992   : > { %v2696_v36 = vpop.f32.mrf.mxu0 }
 0x993   : > { %v2722_v32 = vpop.f32.mrf.mxu1 }
 0x99e   : > { %v2644_v47 = vpop.f32.mrf.mxu2 }
 0x99f   : > { %v2645_v14 = vadd.f32 %v3273_v54, %v2644_v47 }
 0x9a5   : > { %v2670_v12 = vpop.f32.mrf.mxu3 }
 0x9a6   : > { %v2671_v4 = vadd.f32 %v2670_v12, %v2645_v14 }
 0x9a8   : > { %v2697_v49 = vadd.f32 %v2696_v36, %v2671_v4 }
 0x9aa   : > { %v2723_v57 = vadd.f32 %v2722_v32, %v2697_v49 }
 0x9ac   : > { %v2731_v44 = vadd.f32 %v2723_v57, %v4127_v45 }
 0x9bc   : > { %v2699_v50 = vpop.f32.mrf.mxu0 }
 0x9be   : > { %v2725_v13 = vpop.f32.mrf.mxu1 }
 0x9cb   : > { %v2647_v42 = vpop.f32.mrf.mxu2 }
 0x9cc   : > { %v2648_v60 = vadd.f32 %v3273_v54, %v2647_v42 }
 0x9cd   : > { %v2673_v39 = vpop.f32.mrf.mxu3 }
 0x9ce   : > { %v2674_v59 = vadd.f32 %v2673_v39, %v2648_v60 }
 0x9d0   : > { %v2700_v26 = vadd.f32 %v2699_v50, %v2674_v59 }
 0x9d2   : > { %v2726_v29 = vadd.f32 %v2725_v13, %v2700_v26 }
 0x9d4   : > { %v2732_v7 = vadd.f32 %v2726_v29, %v4131_v52 }
 0x9ef   : > { %v2702_v40 = vpop.f32.mrf.mxu0 }
 0x9f2   : > { %v2728_v23 = vpop.f32.mrf.mxu1 }
 0x9fc   : > { %v2650_v17 = vpop.f32.mrf.mxu2 }
 0x9fd   : > { %v2651_v16 = vadd.f32 %v3273_v54, %v2650_v17  ;;  %v2676_v48 = vpop.f32.mrf.mxu3 }
 0x9ff   : > { %v2677_v41 = vadd.f32 %v2676_v48, %v2651_v16 }
 0xa01   : > { %v2703_v1 = vadd.f32 %v2702_v40, %v2677_v41  ;;  %2737 = sbr.rel (%p3136_p3) target bundleno = 2569 (0xa09), region = 108 }
 0xa03   : > { %v2729_v63 = vadd.f32 %v2728_v23, %v2703_v1 }
 0xa05   : > { %v2733_v45 = vadd.f32 %v2729_v63, %v4136_v37 }
 0xa06   : > { %2738 = vst [vmem:[%s3810_s24] sm:$0xff] %v2731_v44 }
 0xa07   : > { %2739 = vst [vmem:[%s3810_s24 + $0x8] sm:$0xff] %v2732_v7 }
 0xa08   : > { %2740 = vst [vmem:[%s3810_s24 + $0x10] sm:$0x1] %v2733_v45 }
 0xa09 PF: > { %p3137_p4 = scmp.ne.s32.totalorder %s3515_s27, 3 }
 0xa0a   : > { %s4866_s29 = sld [smem:[#allocation29_spill]] (!%p3137_p4) }
 0xa0b   : > { %2744 = sbr.rel (%p3137_p4) target bundleno = 2852 (0xb24), region = 112  ;;  %s4867_s0 = sld [smem:[#allocation30_spill]] (!%p3137_p4) }
 0xa10   : > { %2749 = vadd.xlane.f32.xlu1 %v2732_v7  ;;  %v2751_v52 = vsel %vm886_vm1, %v2733_v45, 0.0 }
 0xa11   : > { %2752 = vadd.xlane.f32.xlu0 %v2751_v52  ;;  %v3364_v47 = vld [vmem:[%s4867_s0] ss:$0 sm:$0xff] }
 0xa19   : > { %2747 = vadd.xlane.f32.xlu0 %v2731_v44 }
 0xa83   : > { %v2750_v3 = vpop.xlane.xlu1 %2749 }
 0xa84   : > { %v2755_v37 = vmul.f32 %v2750_v3, %v3858_v34  ;;  %v2753_v58 = vpop.xlane.xlu0 %2752 }
 0xa85   : > { %v2756_v20 = vmul.f32 %v2753_v58, %v3858_v34 }
 0xa86   : > { %v2758_v11 = vsub.f32 %v2732_v7, %v2755_v37 }
 0xa87   : > { %v2759_v55 = vsub.f32 %v2733_v45, %v2756_v20 }
 0xa88   : > { %v2761_v56 = vmul.f32 %v2758_v11, %v2758_v11 }
 0xa89   : > { %v2762_v18 = vmul.f32 %v2759_v55, %v2759_v55 }
 0xa8a   : > { %2765 = vadd.xlane.f32.xlu2 %v2761_v56 }
 0xa8b   : > { %v2767_v33 = vsel %vm886_vm1, %v2762_v18, 0.0 }
 0xa8c   : > { %v2748_v24 = vpop.xlane.xlu0 %2747 }
 0xa8d   : > { %v2754_v22 = vmul.f32 %v2748_v24, %v3858_v34 }
 0xa8f   : > { %v2757_v38 = vsub.f32 %v2731_v44, %v2754_v22 }
 0xa91   : > { %v2760_v25 = vmul.f32 %v2757_v38, %v2757_v38 }
 0xa92   : > { %2768 = vadd.xlane.f32.xlu2 %v2767_v33 }
 0xa93   : > { %2763 = vadd.xlane.f32.xlu1 %v2760_v25 }
 0xafd   : > { %v2766_v6 = vpop.xlane.xlu2 %2765 }
 0xafe   : > { %v2771_v21 = vmul.f32 %v2766_v6, %v3858_v34 }
 0xb00   : > { %v2774_v15 = vadd.f32 1e-06, %v2771_v21 }
 0xb02   : > { %3365 = vrsqrt.f32 %v2774_v15  ;;  %vm2792_vm12 = vweird.f32 %v2774_v15 }
 0xb05   : > { %v2769_v43 = vpop.xlane.xlu2 %2768 }
 0xb06   : > { %v2772_v30 = vmul.f32 %v2769_v43, %v3858_v34  ;;  %v2764_v61 = vpop.xlane.xlu1 %2763 }
 0xb07   : > { %v2770_v62 = vmul.f32 %v2764_v61, %v3858_v34  ;;  %v3363_v34 = vld [vmem:[%s4866_s29] ss:$0 sm:$0xff] }
 0xb08   : > { %v3366_v9 = vpop.eup %3365  ;;  %v2775_v19 = vadd.f32 1e-06, %v2772_v30 }
 0xb09   : > { %v2787_v8 = vmul.f32 %v3366_v9, %v2774_v15  ;;  %v2773_v35 = vadd.f32 1e-06, %v2770_v62  ;;  %vm2793_vm1 = vweird.f32 %v3366_v9 }
 0xb0a   : > { %3367 = vrsqrt.f32 %v2775_v19  ;;  %vm2794_vm13 = vmor %vm2792_vm12, %vm2793_vm1  ;;  %vm2802_vm0 = vweird.f32 %v2775_v19 }
 0xb0b   : > { %v2788_v31 = vmul.f32 %v3366_v9, %v2787_v8  ;;  %3369 = vrsqrt.f32 %v2773_v35  ;;  %vm2782_vm3 = vweird.f32 %v2773_v35 }
 0xb0d   : > { %v2789_v10 = vmul.f32 0.5, %v2788_v31 }
 0xb0f   : > { %v2790_v2 = vsub.f32 1.5, %v2789_v10 }
 0xb10   : > { %v3368_v5 = vpop.eup %3367 }
 0xb11   : > { %v3370_v27 = vpop.eup %3369  ;;  %v2791_v28 = vmul.f32 %v3366_v9, %v2790_v2  ;;  %v2797_v0 = vmul.f32 %v3368_v5, %v2775_v19  ;;  %vm2803_vm14 = vweird.f32 %v3368_v5 }
 0xb12   : > { %v2777_v46 = vmul.f32 %v3370_v27, %v2773_v35  ;;  %vm2783_vm15 = vweird.f32 %v3370_v27  ;;  %vm2804_vm2 = vmor %vm2802_vm0, %vm2803_vm14 }
 0xb13   : > { %v2795_v51 = vsel %vm2794_vm13, %v3366_v9, %v2791_v28  ;;  %v2798_v53 = vmul.f32 %v3368_v5, %v2797_v0  ;;  %vm2784_vm4 = vmor %vm2782_vm3, %vm2783_vm15 }
 0xb14   : > { %v2807_v54 = vmul.f32 %v2795_v51, %v2758_v11  ;;  %v2778_v14 = vmul.f32 %v3370_v27, %v2777_v46 }
 0xb15   : > { %v2799_v12 = vmul.f32 0.5, %v2798_v53 }
 0xb16   : > { %v2813_v4 = vmul.f32 %v3363_v34, %v2807_v54  ;;  %v2779_v36 = vmul.f32 0.5, %v2778_v14 }
 0xb17   : > { %v2800_v49 = vsub.f32 1.5, %v2799_v12 }
 0xb18   : > { %v2819_v32 = vadd.f32 %v3364_v47, %v2813_v4  ;;  %v2780_v57 = vsub.f32 1.5, %v2779_v36 }
 0xb19   : > { %v2801_v44 = vmul.f32 %v3368_v5, %v2800_v49 }
 0xb1a   : > { %2822 = vst [vmem:[%s3810_s24 + $0x8] sm:$0xff] %v2819_v32  ;;  %v2781_v42 = vmul.f32 %v3370_v27, %v2780_v57 }
 0xb1b   : > { %v2805_v60 = vsel %vm2804_vm2, %v3368_v5, %v2801_v44 }
 0xb1c   : > { %v2808_v39 = vmul.f32 %v2805_v60, %v2759_v55  ;;  %v2785_v59 = vsel %vm2784_vm4, %v3370_v27, %v2781_v42 }
 0xb1d   : > { %v2806_v50 = vmul.f32 %v2785_v59, %v2757_v38 }
 0xb1e   : > { %v2814_v26 = vmul.f32 %v3363_v34, %v2808_v39 }
 0xb1f   : > { %v2812_v13 = vmul.f32 %v3363_v34, %v2806_v50 }
 0xb20   : > { %v2820_v29 = vadd.f32 %v3364_v47, %v2814_v26 }
 0xb21   : > { %v2818_v7 = vadd.f32 %v3364_v47, %v2812_v13 }
 0xb22   : > { %2823 = vst [vmem:[%s3810_s24 + $0x10] sm:$0x1] %v2820_v29 }
 0xb23   : > { %2821 = vst [vmem:[%s3810_s24] sm:$0xff] %v2818_v7 }
 0xb24 PF: > { %s4868_s13 = sld [smem:[#allocation13_spill]] }
 0xb25   : > { %s4869_s24 = sld [smem:[#allocation9_spill]] }
 0xb26   : > { %s4870_s25 = sld [smem:[#allocation10_spill]] }
 0xb27   : > { %s4871_s26 = sld [smem:[#allocation16_spill]] }
 0xb28   : > { %s4872_s27 = sld [smem:[#allocation11_spill]] }
 0xb29   : > { %s4873_s28 = sld [smem:[#allocation12_spill]] }
 0xb2a   : > { %s33_s30 = sadd.s32 1, %s4868_s13   ;;  %s4874_s29 = sld [smem:[#allocation14_spill]] }
 0xb2b   : > { %p30_p5 = scmp.ge.s32.totalorder %s33_s30, 10   ;;  %s4875_s0 = sld [smem:[#allocation15_spill]] }
 0xb2d   :  { %32 = sbr.rel (!%p30_p5) target bundleno = 22 (0x16), region = 194 }
 0xb32   :  { %2845 = vsyncpa [#allocation3], 1 }
 0xb33   :  { %2847 = vsyncpa [#allocation3 + $0x1], 1 }
 0xb34   :  { %2848 = vsyncpa [#allocation5], 1 }
 0xb35   :  { %2850 = vsyncpa [#allocation5 + $0x1], 1 }

</bundles_post_ra>
